<compile_context>
chip_gen: v7x
topology: tpu7x:2x2x1
jax: 0.10.0
libtpu: 0.0.40
codegen_flags: <defaults>
</compile_context>

<pallas_src>
import functools

import jax
import jax.numpy as jnp
from jax.experimental import pallas as pl
from jax.experimental.pallas import tpu as pltpu


# ----------------------------- fused Pallas kernel ---------------------------------

def _mish(x):
    # mish(x) = x * tanh(softplus(x)) = x * t*(t+2) / (t*(t+2) + 2),  t = exp(x).
    t = jnp.exp(jnp.minimum(x, 20.0))
    g = t * (t + 2.0)
    y = x * g * pl.reciprocal(g + 2.0, approx=True)
    return jnp.where(x > 20.0, x, y)


def _ensemble_mnet_kernel(x_ref, w1_ref, b1_ref, w2_ref, b2_ref, sel_ref,
                          wt1_ref, bf1_ref, w2bd_ref, bf2_ref, wobd_ref, bfo_ref,
                          mask_ref, avg_ref, out_ref, *,
                          kt, pool, tp, n_models, c1, c2, bb):
    f32 = jnp.float32
    bf16 = jnp.bfloat16
    M = n_models
    T = x_ref.shape[-1]
    t1 = T - kt + 1
    t2 = t1 - kt + 1
    L = (tp - 1) * pool + 1                      # last pooled time index + 1

    # ---- per-sample conv stack: conv1 -> Mish -> conv2(+BN) -> MaxPool -> Mish -----
    h3_list = []
    for s in range(bb):
        xb = x_ref[s]                            # (n_chs, T) bf16, time on lanes
        # conv1: kt taps folded into the contraction dim -> one MXU dot (K = kt*n_chs)
        xcat = jnp.concatenate([xb[:, j:j + t1] for j in range(kt)], axis=0)
        h1 = jnp.dot(w1_ref[...], xcat, preferred_element_type=f32) + b1_ref[...]
        h1 = _mish(h1).astype(bf16)              # (M*c1, t1), rows (model, channel)
        # conv2 (+ folded eval BN): kt-folded, block-diagonal over models
        h1cat = jnp.concatenate([h1[:, j:j + t2] for j in range(kt)], axis=0)
        h2 = jnp.dot(w2_ref[...], h1cat, preferred_element_type=f32) + b2_ref[...]
        # MaxPool2d((1, pool)): running max of `pool` shifted slices, then a 0/1 bf16
        # selection matmul picks every pool-th column; Mish on the small pooled tile.
        run = h2[:, 0:L]
        for i in range(1, pool):
            run = jnp.maximum(run, h2[:, i:i + L])
        pooled = jnp.dot(run.astype(bf16), sel_ref[...], preferred_element_type=f32)
        h3_list.append(_mish(pooled))            # (M*c2, tp) f32, rows (channel, model)

    # ---- FC1 for all samples & models at once.  The PyTorch (C, T) flatten is folded
    # into wt1 at pack time: per channel c, a (bb*M, tp) LHS (rows (sample, model))
    # hits a (tp, M*n_fc1) weight slice; chained dot-adds accumulate (MRB-friendly).
    n_f1 = bf1_ref.shape[-1]
    h4 = jnp.zeros((bb * M, n_f1), f32)
    for c in range(c2):
        lhs_c = jnp.concatenate(
            [h3_list[s][c * M:(c + 1) * M, :] for s in range(bb)], axis=0)
        h4 = h4 + jnp.dot(lhs_c.astype(bf16), wt1_ref[c], preferred_element_type=f32)
    h4 = _mish(h4 + bf1_ref[...]).astype(bf16)   # (bb*M, M*n_fc1)

    # FC2 / FC_out as single block-diagonal dots: each row's own model block stays
    # correct; cross-model blocks are dead values removed by the mask below.
    # (Dropout = identity in eval mode.)
    h5 = _mish(jnp.dot(h4, w2bd_ref[...], preferred_element_type=f32) + bf2_ref[...])
    logits_full = (jnp.dot(h5.astype(bf16), wobd_ref[...], preferred_element_type=f32)
                   + bfo_ref[...])               # (bb*M, M*K)

    # ---- pick each row's own model block, per-model softmax, ensemble mean ---------
    K = out_ref.shape[-1]
    masked = logits_full * mask_ref[...]
    logits = masked[:, 0:K]
    for m in range(1, M):
        logits = logits + masked[:, m * K:(m + 1) * K]        # (bb*M, K)
    mx = jnp.max(logits, axis=-1, keepdims=True)
    e = jnp.exp(logits - mx)
    probs = e / jnp.sum(e, axis=-1, keepdims=True)            # exact: rows sum to 1
    out_ref[0] = jnp.dot(avg_ref[...], probs, preferred_element_type=f32)


# ------------------------------- wrapper & packing ----------------------------------

def ensemble_mnet_forward(packed, meta, x):
    """EnsembleMNet_1000.forward: 5 SingleMNets -> softmax(dim=-1) -> mean over models."""
    B, n_chs, T = x.shape
    bb = meta["bb"]
    K = meta["n_classes"]
    n_steps = (B + bb - 1) // bb
    B_pad = n_steps * bb
    xb = x.astype(jnp.bfloat16)
    if B_pad != B:
        xb = jnp.pad(xb, ((0, B_pad - B), (0, 0), (0, 0)))

    names = ["W1", "b1", "W2", "b2", "sel", "WT1", "bf1",
             "W2bd", "bf2", "Wobd", "bfo", "mask", "avg"]

    def _const_spec(arr):
        if arr.ndim == 2:
            return pl.BlockSpec(arr.shape, lambda b: (0, 0))
        return pl.BlockSpec(arr.shape, lambda b: (0, 0, 0))

    kernel = functools.partial(
        _ensemble_mnet_kernel, kt=meta["kt"], pool=meta["pool"], tp=meta["tp"],
        n_models=meta["n_models"], c1=meta["c1"], c2=meta["c2"], bb=bb)

    res = pl.pallas_call(
        kernel,
        out_shape=jax.ShapeDtypeStruct((n_steps, bb, K), jnp.float32),
        grid=(n_steps,),
        in_specs=[pl.BlockSpec((bb, n_chs, T), lambda b: (b, 0, 0))]   # bb samples/step
                 + [_const_spec(packed[n]) for n in names],            # resident weights
        out_specs=pl.BlockSpec((1, bb, K), lambda b: (b, 0, 0)),
        compiler_params=pltpu.CompilerParams(
            dimension_semantics=("parallel",),
            vmem_limit_bytes=32 * 1024 * 1024),
    )(xb, *[packed[n] for n in names])
    return res.reshape(B_pad, K)[:B]


def pack_ensemble_params(all_params, *, kt, pool, t_in, bb):
    """Prepack the 5 models once: kt-folded ensemble-batched conv1, kt-folded
    block-diagonal conv2 with eval BN folded, bf16 pool-selection matrix, flatten
    folded into FC1 weights, block-diagonal FC2/FC_out, block-select mask, avg matrix."""
    M = len(all_params)
    c1, n_chs, _ = all_params[0]["conv1_w"].shape
    c2 = all_params[0]["conv2_w"].shape[0]
    n_fc1 = all_params[0]["fc1_w"].shape[1]
    n_fc2 = all_params[0]["fc2_w"].shape[1]
    K = all_params[0]["fc_out_w"].shape[1]
    t1 = t_in - kt + 1
    t2 = t1 - kt + 1
    tp = t2 // pool
    L = (tp - 1) * pool + 1
    eps = 1e-5

    # conv1 kt-folded: rows (model, out_channel), cols j*n_chs + in_channel.
    w1 = jnp.stack([p["conv1_w"] for p in all_params], axis=0)          # (M,c1,n_chs,kt)
    W1 = jnp.transpose(w1, (0, 1, 3, 2)).reshape(M * c1, kt * n_chs)
    b1 = jnp.stack([p["conv1_b"] for p in all_params], axis=0).reshape(M * c1, 1)

    # conv2 kt-folded, BN folded, block-diagonal per tap; output rows (channel, model).
    W2 = jnp.zeros((M * c2, kt * M * c1), jnp.float32)
    b2_cols = []
    for m, p in enumerate(all_params):
        scale = p["bn_gamma"] / jnp.sqrt(p["bn_var"] + eps)              # (c2,)
        w2_eff = p["conv2_w"] * scale[:, None, None]                     # (c2,c1,kt)
        b2_eff = (p["conv2_b"] - p["bn_mean"]) * scale + p["bn_beta"]    # (c2,)
        for j in range(kt):
            col0 = j * M * c1 + m * c1
            W2 = W2.at[m::M, col0:col0 + c1].set(w2_eff[:, :, j])
        b2_cols.append(b2_eff)
    b2 = jnp.stack(b2_cols, axis=1).reshape(M * c2, 1)                   # row = c*M + m

    # 0/1 selection matrix picking every pool-th column of the running max (exact bf16).
    sel = jnp.zeros((L, tp), jnp.float32)
    sel = sel.at[jnp.arange(tp) * pool, jnp.arange(tp)].set(1.0)

    # FC1 with PyTorch (C, T) flatten folded in: WT1[c, t, m*n_fc1+f] = fc1_w[m][c*tp+t, f]
    wf1 = jnp.stack([p["fc1_w"] for p in all_params], axis=0)            # (M, c2*tp, n_fc1)
    WT1 = jnp.transpose(wf1.reshape(M, c2, tp, n_fc1), (1, 2, 0, 3)).reshape(
        c2, tp, M * n_fc1)
    bf1 = jnp.stack([p["fc1_b"] for p in all_params], axis=0).reshape(1, M * n_fc1)

    # FC2 / FC_out block-diagonal over models.
    W2bd = jnp.zeros((M * n_fc1, M * n_fc2), jnp.float32)
    Wobd = jnp.zeros((M * n_fc2, M * K), jnp.float32)
    for m, p in enumerate(all_params):
        W2bd = W2bd.at[m * n_fc1:(m + 1) * n_fc1, m * n_fc2:(m + 1) * n_fc2].set(p["fc2_w"])
        Wobd = Wobd.at[m * n_fc2:(m + 1) * n_fc2, m * K:(m + 1) * K].set(p["fc_out_w"])
    bf2 = jnp.stack([p["fc2_b"] for p in all_params], axis=0).reshape(1, M * n_fc2)
    bfo = jnp.stack([p["fc_out_b"] for p in all_params], axis=0).reshape(1, M * K)

    # block-select mask (row (s,m) keeps columns of model block m) and averaging matrix.
    rowm = jnp.arange(bb * M) % M
    colm = jnp.arange(M * K) // K
    mask = (rowm[:, None] == colm[None, :]).astype(jnp.float32)          # (bb*M, M*K)
    avg = jnp.zeros((bb, bb * M), jnp.float32)
    avg = avg.at[jnp.repeat(jnp.arange(bb), M), jnp.arange(bb * M)].set(1.0 / M)

    packed = dict(
        W1=W1.astype(jnp.bfloat16), b1=b1.astype(jnp.float32),
        W2=W2.astype(jnp.bfloat16), b2=b2.astype(jnp.float32),
        sel=sel.astype(jnp.bfloat16),
        WT1=WT1.astype(jnp.bfloat16), bf1=bf1.astype(jnp.float32),
        W2bd=W2bd.astype(jnp.bfloat16), bf2=bf2.astype(jnp.float32),
        Wobd=Wobd.astype(jnp.bfloat16), bfo=bfo.astype(jnp.float32),
        mask=mask, avg=avg,
    )
    meta = dict(kt=kt, pool=pool, tp=tp, n_models=M, c1=c1, c2=c2,
                n_classes=K, n_fc1=n_fc1, n_fc2=n_fc2, bb=bb)
    return packed, meta


def init_single_mnet_params(key, n_chs, n_classes, *, t_in, c1=8, c2=8, kt=4,
                            pool=5, n_fc1=32, n_fc2=16):
    t1 = t_in - kt + 1
    t2 = t1 - kt + 1
    tp = t2 // pool
    n_flat = c2 * tp
    keys = jax.random.split(key, 14)

    def w(k, shape, scale):
        return scale * jax.random.normal(k, shape, jnp.float32)

    return dict(
        conv1_w=w(keys[0], (c1, n_chs, kt), 0.2),     # Conv2d(1, c1, (n_chs, kt))
        conv1_b=w(keys[1], (c1,), 0.1),
        conv2_w=w(keys[2], (c2, c1, kt), 0.2),        # Conv2d(c1, c2, (1, kt))
        conv2_b=w(keys[3], (c2,), 0.1),
        bn_gamma=1.0 + 0.1 * jax.random.normal(keys[4], (c2,), jnp.float32),
        bn_beta=0.1 * jax.random.normal(keys[5], (c2,), jnp.float32),
        bn_mean=0.05 * jax.random.normal(keys[6], (c2,), jnp.float32),
        bn_var=jnp.abs(1.0 + 0.1 * jax.random.normal(keys[7], (c2,), jnp.float32)),
        fc1_w=w(keys[8], (n_flat, n_fc1), 0.15),
        fc1_b=w(keys[9], (n_fc1,), 0.05),
        fc2_w=w(keys[10], (n_fc1, n_fc2), 0.15),
        fc2_b=w(keys[11], (n_fc2,), 0.05),
        fc_out_w=w(keys[12], (n_fc2, n_classes), 0.15),
        fc_out_b=w(keys[13], (n_classes,), 0.05),
    )


# ------------------------------- pure-JAX reference ----------------------------------

def reference_forward(all_params, x, *, kt, pool):
    """f32 reference of the stand-in SingleMNet ensemble (eval mode), for validation."""
    eps = 1e-5

    def mish(v):
        return v * jnp.tanh(jnp.logaddexp(0.0, v))

    B, n_chs, T = x.shape
    t1 = T - kt + 1
    t2 = t1 - kt + 1
    tp = t2 // pool
    probs = []
    for p in all_params:
        h1 = sum(jnp.einsum("on,bnt->bot", p["conv1_w"][:, :, j], x[:, :, j:j + t1])
                 for j in range(kt)) + p["conv1_b"][None, :, None]
        h1 = mish(h1)
        h2 = sum(jnp.einsum("oi,bit->bot", p["conv2_w"][:, :, j], h1[:, :, j:j + t2])
                 for j in range(kt)) + p["conv2_b"][None, :, None]
        h2 = ((h2 - p["bn_mean"][None, :, None])
              / jnp.sqrt(p["bn_var"][None, :, None] + eps)
              * p["bn_gamma"][None, :, None] + p["bn_beta"][None, :, None])
        h3 = mish(h2[:, :, :tp * pool].reshape(B, -1, tp, pool).max(axis=-1))
        flat = h3.reshape(B, -1)
        h4 = mish(flat @ p["fc1_w"] + p["fc1_b"])
        h5 = mish(h4 @ p["fc2_w"] + p["fc2_b"])
        logits = h5 @ p["fc_out_w"] + p["fc_out_b"]
        probs.append(jax.nn.softmax(logits, axis=-1))
    return jnp.mean(jnp.stack(probs, axis=0), axis=0)


# --------------------------------------- main ----------------------------------------

if __name__ == "__main__":
    DISEASE_TYPES = ["HV", "AD", "DLB", "NPH"]
    N_MODELS = 5
    B, N_CHS, T = 8, 4, 64                            # small stand-in for (B, 19, 1000)
    KT, POOL, BB = 4, 5, 4                            # BB samples fused per grid step

    key = jax.random.PRNGKey(0)
    kx, kp = jax.random.split(key)
    x = jax.random.normal(kx, (B, N_CHS, T), jnp.float32)

    model_keys = jax.random.split(kp, N_MODELS)
    all_params = [
        init_single_mnet_params(model_keys[i], N_CHS, len(DISEASE_TYPES),
                                t_in=T, kt=KT, pool=POOL)
        for i in range(N_MODELS)
    ]
    packed, meta = pack_ensemble_params(all_params, kt=KT, pool=POOL, t_in=T, bb=BB)

    fwd = jax.jit(lambda inp: ensemble_mnet_forward(packed, meta, inp))
    pred_proba_diag = fwd(x)
    jax.block_until_ready(pred_proba_diag)

    assert pred_proba_diag.shape == (B, len(DISEASE_TYPES))
    assert bool(jnp.all(jnp.isfinite(pred_proba_diag)))
    assert bool(jnp.allclose(jnp.sum(pred_proba_diag, axis=-1), 1.0, atol=1e-4))

    ref = reference_forward(all_params, x, kt=KT, pool=POOL)
    max_err = float(jnp.max(jnp.abs(pred_proba_diag - ref)))
    assert bool(jnp.allclose(pred_proba_diag, ref, atol=5e-2)), max_err

    print("KERNEL_OK")
</pallas_src>

<mosaic_0001>
module attributes {stable_mosaic.version = 11 : i64} {
  func.func @_ensemble_mnet_kernel(%arg0: i32, %arg1: memref<4x4x64xbf16, #tpu.memory_space<vmem>>, %arg2: memref<40x16xbf16, #tpu.memory_space<vmem>>, %arg3: memref<40x1xf32, #tpu.memory_space<vmem>>, %arg4: memref<40x160xbf16, #tpu.memory_space<vmem>>, %arg5: memref<40x1xf32, #tpu.memory_space<vmem>>, %arg6: memref<51x11xbf16, #tpu.memory_space<vmem>>, %arg7: memref<8x11x160xbf16, #tpu.memory_space<vmem>>, %arg8: memref<1x160xf32, #tpu.memory_space<vmem>>, %arg9: memref<160x80xbf16, #tpu.memory_space<vmem>>, %arg10: memref<1x80xf32, #tpu.memory_space<vmem>>, %arg11: memref<80x20xbf16, #tpu.memory_space<vmem>>, %arg12: memref<1x20xf32, #tpu.memory_space<vmem>>, %arg13: memref<20x20xf32, #tpu.memory_space<vmem>>, %arg14: memref<4x20xf32, #tpu.memory_space<vmem>>, %arg15: memref<1x4x4xf32, #tpu.memory_space<vmem>>) attributes {dimension_semantics = [#tpu.dimension_semantics<parallel>], iteration_bounds = array<i64: 2>, scalar_prefetch = 0 : i64, scratch_operands = 0 : i64, tpu.core_type = #tpu.core_type<tc>, window_params = [{transform_indices = @transform_0, window_bounds = array<i64: 4, 4, 64>}, {pipeline_mode = #tpu.pipeline_mode<synchronous>, transform_indices = @transform_1, window_bounds = array<i64: 40, 16>}, {pipeline_mode = #tpu.pipeline_mode<synchronous>, transform_indices = @transform_2, window_bounds = array<i64: 40, 1>}, {pipeline_mode = #tpu.pipeline_mode<synchronous>, transform_indices = @transform_3, window_bounds = array<i64: 40, 160>}, {pipeline_mode = #tpu.pipeline_mode<synchronous>, transform_indices = @transform_4, window_bounds = array<i64: 40, 1>}, {pipeline_mode = #tpu.pipeline_mode<synchronous>, transform_indices = @transform_5, window_bounds = array<i64: 51, 11>}, {pipeline_mode = #tpu.pipeline_mode<synchronous>, transform_indices = @transform_6, window_bounds = array<i64: 8, 11, 160>}, {pipeline_mode = #tpu.pipeline_mode<synchronous>, transform_indices = @transform_7, window_bounds = array<i64: 1, 160>}, {pipeline_mode = #tpu.pipeline_mode<synchronous>, transform_indices = @transform_8, window_bounds = array<i64: 160, 80>}, {pipeline_mode = #tpu.pipeline_mode<synchronous>, transform_indices = @transform_9, window_bounds = array<i64: 1, 80>}, {pipeline_mode = #tpu.pipeline_mode<synchronous>, transform_indices = @transform_10, window_bounds = array<i64: 80, 20>}, {pipeline_mode = #tpu.pipeline_mode<synchronous>, transform_indices = @transform_11, window_bounds = array<i64: 1, 20>}, {pipeline_mode = #tpu.pipeline_mode<synchronous>, transform_indices = @transform_12, window_bounds = array<i64: 20, 20>}, {pipeline_mode = #tpu.pipeline_mode<synchronous>, transform_indices = @transform_13, window_bounds = array<i64: 4, 20>}, {transform_indices = @transform_14, window_bounds = array<i64: 1, 4, 4>}]} {
    %c0 = arith.constant 0 : index
    %c0_0 = arith.constant 0 : index
    %c0_1 = arith.constant 0 : index
    %0 = vector.load %arg1[%c0, %c0_0, %c0_1] : memref<4x4x64xbf16, #tpu.memory_space<vmem>>, vector<1x4x64xbf16>
    %1 = vector.shape_cast %0 : vector<1x4x64xbf16> to vector<4x64xbf16>
    %2 = vector.extract_strided_slice %1 {offsets = [0, 0], sizes = [4, 61], strides = [1, 1]} : vector<4x64xbf16> to vector<4x61xbf16>
    %3 = vector.extract_strided_slice %1 {offsets = [0, 1], sizes = [4, 61], strides = [1, 1]} : vector<4x64xbf16> to vector<4x61xbf16>
    %4 = vector.extract_strided_slice %1 {offsets = [0, 2], sizes = [4, 61], strides = [1, 1]} : vector<4x64xbf16> to vector<4x61xbf16>
    %5 = vector.extract_strided_slice %1 {offsets = [0, 3], sizes = [4, 61], strides = [1, 1]} : vector<4x64xbf16> to vector<4x61xbf16>
    %6 = tpu.concatenate %2, %3, %4, %5 in 0 : vector<4x61xbf16>, vector<4x61xbf16>, vector<4x61xbf16>, vector<4x61xbf16> -> vector<16x61xbf16>
    %c0_2 = arith.constant 0 : index
    %c0_3 = arith.constant 0 : index
    %7 = vector.load %arg2[%c0_2, %c0_3] : memref<40x16xbf16, #tpu.memory_space<vmem>>, vector<40x16xbf16>
    %cst = arith.constant dense<0.000000e+00> : vector<40x61xf32>
    %8 = tpu.matmul %7, %6, %cst {dimension_numbers = #tpu.dot_dimension_numbers<[1], [0], [0], [1], [0, 0, 1, 1], [], []>} : vector<40x16xbf16>, vector<16x61xbf16>, vector<40x61xf32> -> vector<40x61xf32>
    %c0_4 = arith.constant 0 : index
    %c0_5 = arith.constant 0 : index
    %9 = vector.load %arg3[%c0_4, %c0_5] : memref<40x1xf32, #tpu.memory_space<vmem>>, vector<40x1xf32>
    %10 = vector.broadcast %9 : vector<40x1xf32> to vector<40x61xf32>
    %11 = arith.addf %8, %10 : vector<40x61xf32>
    %cst_6 = arith.constant 2.000000e+01 : f32
    %12 = vector.broadcast %cst_6 : f32 to vector<40x61xf32>
    %13 = arith.minimumf %11, %12 : vector<40x61xf32>
    %14 = math.exp %13 : vector<40x61xf32>
    %cst_7 = arith.constant 2.000000e+00 : f32
    %15 = vector.broadcast %cst_7 : f32 to vector<40x61xf32>
    %16 = arith.addf %14, %15 : vector<40x61xf32>
    %17 = arith.mulf %14, %16 : vector<40x61xf32>
    %18 = arith.mulf %11, %17 : vector<40x61xf32>
    %cst_8 = arith.constant 2.000000e+00 : f32
    %19 = vector.broadcast %cst_8 : f32 to vector<40x61xf32>
    %20 = arith.addf %17, %19 : vector<40x61xf32>
    %21 = tpu.reciprocal %20 {approx = true} : vector<40x61xf32> -> vector<40x61xf32>
    %22 = arith.mulf %18, %21 : vector<40x61xf32>
    %cst_9 = arith.constant 2.000000e+01 : f32
    %23 = vector.broadcast %cst_9 : f32 to vector<40x61xf32>
    %24 = arith.cmpf ogt, %11, %23 : vector<40x61xf32>
    %25 = arith.select %24, %11, %22 : vector<40x61xi1>, vector<40x61xf32>
    %26 = arith.truncf %25 : vector<40x61xf32> to vector<40x61xbf16>
    %27 = vector.extract_strided_slice %26 {offsets = [0, 0], sizes = [40, 58], strides = [1, 1]} : vector<40x61xbf16> to vector<40x58xbf16>
    %28 = vector.extract_strided_slice %26 {offsets = [0, 1], sizes = [40, 58], strides = [1, 1]} : vector<40x61xbf16> to vector<40x58xbf16>
    %29 = vector.extract_strided_slice %26 {offsets = [0, 2], sizes = [40, 58], strides = [1, 1]} : vector<40x61xbf16> to vector<40x58xbf16>
    %30 = vector.extract_strided_slice %26 {offsets = [0, 3], sizes = [40, 58], strides = [1, 1]} : vector<40x61xbf16> to vector<40x58xbf16>
    %31 = tpu.concatenate %27, %28, %29, %30 in 0 : vector<40x58xbf16>, vector<40x58xbf16>, vector<40x58xbf16>, vector<40x58xbf16> -> vector<160x58xbf16>
    %c0_10 = arith.constant 0 : index
    %c0_11 = arith.constant 0 : index
    %32 = vector.load %arg4[%c0_10, %c0_11] : memref<40x160xbf16, #tpu.memory_space<vmem>>, vector<40x160xbf16>
    %cst_12 = arith.constant dense<0.000000e+00> : vector<40x58xf32>
    %33 = tpu.matmul %32, %31, %cst_12 {dimension_numbers = #tpu.dot_dimension_numbers<[1], [0], [0], [1], [0, 0, 1, 1], [], []>} : vector<40x160xbf16>, vector<160x58xbf16>, vector<40x58xf32> -> vector<40x58xf32>
    %c0_13 = arith.constant 0 : index
    %c0_14 = arith.constant 0 : index
    %34 = vector.load %arg5[%c0_13, %c0_14] : memref<40x1xf32, #tpu.memory_space<vmem>>, vector<40x1xf32>
    %35 = vector.broadcast %34 : vector<40x1xf32> to vector<40x58xf32>
    %36 = arith.addf %33, %35 : vector<40x58xf32>
    %37 = vector.extract_strided_slice %36 {offsets = [0, 0], sizes = [40, 51], strides = [1, 1]} : vector<40x58xf32> to vector<40x51xf32>
    %38 = vector.extract_strided_slice %36 {offsets = [0, 1], sizes = [40, 51], strides = [1, 1]} : vector<40x58xf32> to vector<40x51xf32>
    %39 = arith.maximumf %37, %38 : vector<40x51xf32>
    %40 = vector.extract_strided_slice %36 {offsets = [0, 2], sizes = [40, 51], strides = [1, 1]} : vector<40x58xf32> to vector<40x51xf32>
    %41 = arith.maximumf %39, %40 : vector<40x51xf32>
    %42 = vector.extract_strided_slice %36 {offsets = [0, 3], sizes = [40, 51], strides = [1, 1]} : vector<40x58xf32> to vector<40x51xf32>
    %43 = arith.maximumf %41, %42 : vector<40x51xf32>
    %44 = vector.extract_strided_slice %36 {offsets = [0, 4], sizes = [40, 51], strides = [1, 1]} : vector<40x58xf32> to vector<40x51xf32>
    %45 = arith.maximumf %43, %44 : vector<40x51xf32>
    %46 = arith.truncf %45 : vector<40x51xf32> to vector<40x51xbf16>
    %c0_15 = arith.constant 0 : index
    %c0_16 = arith.constant 0 : index
    %47 = vector.load %arg6[%c0_15, %c0_16] : memref<51x11xbf16, #tpu.memory_space<vmem>>, vector<51x11xbf16>
    %cst_17 = arith.constant dense<0.000000e+00> : vector<40x11xf32>
    %48 = tpu.matmul %46, %47, %cst_17 {dimension_numbers = #tpu.dot_dimension_numbers<[1], [0], [0], [1], [0, 0, 1, 1], [], []>} : vector<40x51xbf16>, vector<51x11xbf16>, vector<40x11xf32> -> vector<40x11xf32>
    %cst_18 = arith.constant 2.000000e+01 : f32
    %49 = vector.broadcast %cst_18 : f32 to vector<40x11xf32>
    %50 = arith.minimumf %48, %49 : vector<40x11xf32>
    %51 = math.exp %50 : vector<40x11xf32>
    %cst_19 = arith.constant 2.000000e+00 : f32
    %52 = vector.broadcast %cst_19 : f32 to vector<40x11xf32>
    %53 = arith.addf %51, %52 : vector<40x11xf32>
    %54 = arith.mulf %51, %53 : vector<40x11xf32>
    %55 = arith.mulf %48, %54 : vector<40x11xf32>
    %cst_20 = arith.constant 2.000000e+00 : f32
    %56 = vector.broadcast %cst_20 : f32 to vector<40x11xf32>
    %57 = arith.addf %54, %56 : vector<40x11xf32>
    %58 = tpu.reciprocal %57 {approx = true} : vector<40x11xf32> -> vector<40x11xf32>
    %59 = arith.mulf %55, %58 : vector<40x11xf32>
    %cst_21 = arith.constant 2.000000e+01 : f32
    %60 = vector.broadcast %cst_21 : f32 to vector<40x11xf32>
    %61 = arith.cmpf ogt, %48, %60 : vector<40x11xf32>
    %62 = arith.select %61, %48, %59 : vector<40x11xi1>, vector<40x11xf32>
    %c1 = arith.constant 1 : index
    %c0_22 = arith.constant 0 : index
    %c0_23 = arith.constant 0 : index
    %63 = vector.load %arg1[%c1, %c0_22, %c0_23] : memref<4x4x64xbf16, #tpu.memory_space<vmem>>, vector<1x4x64xbf16>
    %64 = vector.shape_cast %63 : vector<1x4x64xbf16> to vector<4x64xbf16>
    %65 = vector.extract_strided_slice %64 {offsets = [0, 0], sizes = [4, 61], strides = [1, 1]} : vector<4x64xbf16> to vector<4x61xbf16>
    %66 = vector.extract_strided_slice %64 {offsets = [0, 1], sizes = [4, 61], strides = [1, 1]} : vector<4x64xbf16> to vector<4x61xbf16>
    %67 = vector.extract_strided_slice %64 {offsets = [0, 2], sizes = [4, 61], strides = [1, 1]} : vector<4x64xbf16> to vector<4x61xbf16>
    %68 = vector.extract_strided_slice %64 {offsets = [0, 3], sizes = [4, 61], strides = [1, 1]} : vector<4x64xbf16> to vector<4x61xbf16>
    %69 = tpu.concatenate %65, %66, %67, %68 in 0 : vector<4x61xbf16>, vector<4x61xbf16>, vector<4x61xbf16>, vector<4x61xbf16> -> vector<16x61xbf16>
    %c0_24 = arith.constant 0 : index
    %c0_25 = arith.constant 0 : index
    %70 = vector.load %arg2[%c0_24, %c0_25] : memref<40x16xbf16, #tpu.memory_space<vmem>>, vector<40x16xbf16>
    %cst_26 = arith.constant dense<0.000000e+00> : vector<40x61xf32>
    %71 = tpu.matmul %70, %69, %cst_26 {dimension_numbers = #tpu.dot_dimension_numbers<[1], [0], [0], [1], [0, 0, 1, 1], [], []>} : vector<40x16xbf16>, vector<16x61xbf16>, vector<40x61xf32> -> vector<40x61xf32>
    %c0_27 = arith.constant 0 : index
    %c0_28 = arith.constant 0 : index
    %72 = vector.load %arg3[%c0_27, %c0_28] : memref<40x1xf32, #tpu.memory_space<vmem>>, vector<40x1xf32>
    %73 = vector.broadcast %72 : vector<40x1xf32> to vector<40x61xf32>
    %74 = arith.addf %71, %73 : vector<40x61xf32>
    %cst_29 = arith.constant 2.000000e+01 : f32
    %75 = vector.broadcast %cst_29 : f32 to vector<40x61xf32>
    %76 = arith.minimumf %74, %75 : vector<40x61xf32>
    %77 = math.exp %76 : vector<40x61xf32>
    %cst_30 = arith.constant 2.000000e+00 : f32
    %78 = vector.broadcast %cst_30 : f32 to vector<40x61xf32>
    %79 = arith.addf %77, %78 : vector<40x61xf32>
    %80 = arith.mulf %77, %79 : vector<40x61xf32>
    %81 = arith.mulf %74, %80 : vector<40x61xf32>
    %cst_31 = arith.constant 2.000000e+00 : f32
    %82 = vector.broadcast %cst_31 : f32 to vector<40x61xf32>
    %83 = arith.addf %80, %82 : vector<40x61xf32>
    %84 = tpu.reciprocal %83 {approx = true} : vector<40x61xf32> -> vector<40x61xf32>
    %85 = arith.mulf %81, %84 : vector<40x61xf32>
    %cst_32 = arith.constant 2.000000e+01 : f32
    %86 = vector.broadcast %cst_32 : f32 to vector<40x61xf32>
    %87 = arith.cmpf ogt, %74, %86 : vector<40x61xf32>
    %88 = arith.select %87, %74, %85 : vector<40x61xi1>, vector<40x61xf32>
    %89 = arith.truncf %88 : vector<40x61xf32> to vector<40x61xbf16>
    %90 = vector.extract_strided_slice %89 {offsets = [0, 0], sizes = [40, 58], strides = [1, 1]} : vector<40x61xbf16> to vector<40x58xbf16>
    %91 = vector.extract_strided_slice %89 {offsets = [0, 1], sizes = [40, 58], strides = [1, 1]} : vector<40x61xbf16> to vector<40x58xbf16>
    %92 = vector.extract_strided_slice %89 {offsets = [0, 2], sizes = [40, 58], strides = [1, 1]} : vector<40x61xbf16> to vector<40x58xbf16>
    %93 = vector.extract_strided_slice %89 {offsets = [0, 3], sizes = [40, 58], strides = [1, 1]} : vector<40x61xbf16> to vector<40x58xbf16>
    %94 = tpu.concatenate %90, %91, %92, %93 in 0 : vector<40x58xbf16>, vector<40x58xbf16>, vector<40x58xbf16>, vector<40x58xbf16> -> vector<160x58xbf16>
    %c0_33 = arith.constant 0 : index
    %c0_34 = arith.constant 0 : index
    %95 = vector.load %arg4[%c0_33, %c0_34] : memref<40x160xbf16, #tpu.memory_space<vmem>>, vector<40x160xbf16>
    %cst_35 = arith.constant dense<0.000000e+00> : vector<40x58xf32>
    %96 = tpu.matmul %95, %94, %cst_35 {dimension_numbers = #tpu.dot_dimension_numbers<[1], [0], [0], [1], [0, 0, 1, 1], [], []>} : vector<40x160xbf16>, vector<160x58xbf16>, vector<40x58xf32> -> vector<40x58xf32>
    %c0_36 = arith.constant 0 : index
    %c0_37 = arith.constant 0 : index
    %97 = vector.load %arg5[%c0_36, %c0_37] : memref<40x1xf32, #tpu.memory_space<vmem>>, vector<40x1xf32>
    %98 = vector.broadcast %97 : vector<40x1xf32> to vector<40x58xf32>
    %99 = arith.addf %96, %98 : vector<40x58xf32>
    %100 = vector.extract_strided_slice %99 {offsets = [0, 0], sizes = [40, 51], strides = [1, 1]} : vector<40x58xf32> to vector<40x51xf32>
    %101 = vector.extract_strided_slice %99 {offsets = [0, 1], sizes = [40, 51], strides = [1, 1]} : vector<40x58xf32> to vector<40x51xf32>
    %102 = arith.maximumf %100, %101 : vector<40x51xf32>
    %103 = vector.extract_strided_slice %99 {offsets = [0, 2], sizes = [40, 51], strides = [1, 1]} : vector<40x58xf32> to vector<40x51xf32>
    %104 = arith.maximumf %102, %103 : vector<40x51xf32>
    %105 = vector.extract_strided_slice %99 {offsets = [0, 3], sizes = [40, 51], strides = [1, 1]} : vector<40x58xf32> to vector<40x51xf32>
    %106 = arith.maximumf %104, %105 : vector<40x51xf32>
    %107 = vector.extract_strided_slice %99 {offsets = [0, 4], sizes = [40, 51], strides = [1, 1]} : vector<40x58xf32> to vector<40x51xf32>
    %108 = arith.maximumf %106, %107 : vector<40x51xf32>
    %109 = arith.truncf %108 : vector<40x51xf32> to vector<40x51xbf16>
    %c0_38 = arith.constant 0 : index
    %c0_39 = arith.constant 0 : index
    %110 = vector.load %arg6[%c0_38, %c0_39] : memref<51x11xbf16, #tpu.memory_space<vmem>>, vector<51x11xbf16>
    %cst_40 = arith.constant dense<0.000000e+00> : vector<40x11xf32>
    %111 = tpu.matmul %109, %110, %cst_40 {dimension_numbers = #tpu.dot_dimension_numbers<[1], [0], [0], [1], [0, 0, 1, 1], [], []>} : vector<40x51xbf16>, vector<51x11xbf16>, vector<40x11xf32> -> vector<40x11xf32>
    %cst_41 = arith.constant 2.000000e+01 : f32
    %112 = vector.broadcast %cst_41 : f32 to vector<40x11xf32>
    %113 = arith.minimumf %111, %112 : vector<40x11xf32>
    %114 = math.exp %113 : vector<40x11xf32>
    %cst_42 = arith.constant 2.000000e+00 : f32
    %115 = vector.broadcast %cst_42 : f32 to vector<40x11xf32>
    %116 = arith.addf %114, %115 : vector<40x11xf32>
    %117 = arith.mulf %114, %116 : vector<40x11xf32>
    %118 = arith.mulf %111, %117 : vector<40x11xf32>
    %cst_43 = arith.constant 2.000000e+00 : f32
    %119 = vector.broadcast %cst_43 : f32 to vector<40x11xf32>
    %120 = arith.addf %117, %119 : vector<40x11xf32>
    %121 = tpu.reciprocal %120 {approx = true} : vector<40x11xf32> -> vector<40x11xf32>
    %122 = arith.mulf %118, %121 : vector<40x11xf32>
    %cst_44 = arith.constant 2.000000e+01 : f32
    %123 = vector.broadcast %cst_44 : f32 to vector<40x11xf32>
    %124 = arith.cmpf ogt, %111, %123 : vector<40x11xf32>
    %125 = arith.select %124, %111, %122 : vector<40x11xi1>, vector<40x11xf32>
    %c2 = arith.constant 2 : index
    %c0_45 = arith.constant 0 : index
    %c0_46 = arith.constant 0 : index
    %126 = vector.load %arg1[%c2, %c0_45, %c0_46] : memref<4x4x64xbf16, #tpu.memory_space<vmem>>, vector<1x4x64xbf16>
    %127 = vector.shape_cast %126 : vector<1x4x64xbf16> to vector<4x64xbf16>
    %128 = vector.extract_strided_slice %127 {offsets = [0, 0], sizes = [4, 61], strides = [1, 1]} : vector<4x64xbf16> to vector<4x61xbf16>
    %129 = vector.extract_strided_slice %127 {offsets = [0, 1], sizes = [4, 61], strides = [1, 1]} : vector<4x64xbf16> to vector<4x61xbf16>
    %130 = vector.extract_strided_slice %127 {offsets = [0, 2], sizes = [4, 61], strides = [1, 1]} : vector<4x64xbf16> to vector<4x61xbf16>
    %131 = vector.extract_strided_slice %127 {offsets = [0, 3], sizes = [4, 61], strides = [1, 1]} : vector<4x64xbf16> to vector<4x61xbf16>
    %132 = tpu.concatenate %128, %129, %130, %131 in 0 : vector<4x61xbf16>, vector<4x61xbf16>, vector<4x61xbf16>, vector<4x61xbf16> -> vector<16x61xbf16>
    %c0_47 = arith.constant 0 : index
    %c0_48 = arith.constant 0 : index
    %133 = vector.load %arg2[%c0_47, %c0_48] : memref<40x16xbf16, #tpu.memory_space<vmem>>, vector<40x16xbf16>
    %cst_49 = arith.constant dense<0.000000e+00> : vector<40x61xf32>
    %134 = tpu.matmul %133, %132, %cst_49 {dimension_numbers = #tpu.dot_dimension_numbers<[1], [0], [0], [1], [0, 0, 1, 1], [], []>} : vector<40x16xbf16>, vector<16x61xbf16>, vector<40x61xf32> -> vector<40x61xf32>
    %c0_50 = arith.constant 0 : index
    %c0_51 = arith.constant 0 : index
    %135 = vector.load %arg3[%c0_50, %c0_51] : memref<40x1xf32, #tpu.memory_space<vmem>>, vector<40x1xf32>
    %136 = vector.broadcast %135 : vector<40x1xf32> to vector<40x61xf32>
    %137 = arith.addf %134, %136 : vector<40x61xf32>
    %cst_52 = arith.constant 2.000000e+01 : f32
    %138 = vector.broadcast %cst_52 : f32 to vector<40x61xf32>
    %139 = arith.minimumf %137, %138 : vector<40x61xf32>
    %140 = math.exp %139 : vector<40x61xf32>
    %cst_53 = arith.constant 2.000000e+00 : f32
    %141 = vector.broadcast %cst_53 : f32 to vector<40x61xf32>
    %142 = arith.addf %140, %141 : vector<40x61xf32>
    %143 = arith.mulf %140, %142 : vector<40x61xf32>
    %144 = arith.mulf %137, %143 : vector<40x61xf32>
    %cst_54 = arith.constant 2.000000e+00 : f32
    %145 = vector.broadcast %cst_54 : f32 to vector<40x61xf32>
    %146 = arith.addf %143, %145 : vector<40x61xf32>
    %147 = tpu.reciprocal %146 {approx = true} : vector<40x61xf32> -> vector<40x61xf32>
    %148 = arith.mulf %144, %147 : vector<40x61xf32>
    %cst_55 = arith.constant 2.000000e+01 : f32
    %149 = vector.broadcast %cst_55 : f32 to vector<40x61xf32>
    %150 = arith.cmpf ogt, %137, %149 : vector<40x61xf32>
    %151 = arith.select %150, %137, %148 : vector<40x61xi1>, vector<40x61xf32>
    %152 = arith.truncf %151 : vector<40x61xf32> to vector<40x61xbf16>
    %153 = vector.extract_strided_slice %152 {offsets = [0, 0], sizes = [40, 58], strides = [1, 1]} : vector<40x61xbf16> to vector<40x58xbf16>
    %154 = vector.extract_strided_slice %152 {offsets = [0, 1], sizes = [40, 58], strides = [1, 1]} : vector<40x61xbf16> to vector<40x58xbf16>
    %155 = vector.extract_strided_slice %152 {offsets = [0, 2], sizes = [40, 58], strides = [1, 1]} : vector<40x61xbf16> to vector<40x58xbf16>
    %156 = vector.extract_strided_slice %152 {offsets = [0, 3], sizes = [40, 58], strides = [1, 1]} : vector<40x61xbf16> to vector<40x58xbf16>
    %157 = tpu.concatenate %153, %154, %155, %156 in 0 : vector<40x58xbf16>, vector<40x58xbf16>, vector<40x58xbf16>, vector<40x58xbf16> -> vector<160x58xbf16>
    %c0_56 = arith.constant 0 : index
    %c0_57 = arith.constant 0 : index
    %158 = vector.load %arg4[%c0_56, %c0_57] : memref<40x160xbf16, #tpu.memory_space<vmem>>, vector<40x160xbf16>
    %cst_58 = arith.constant dense<0.000000e+00> : vector<40x58xf32>
    %159 = tpu.matmul %158, %157, %cst_58 {dimension_numbers = #tpu.dot_dimension_numbers<[1], [0], [0], [1], [0, 0, 1, 1], [], []>} : vector<40x160xbf16>, vector<160x58xbf16>, vector<40x58xf32> -> vector<40x58xf32>
    %c0_59 = arith.constant 0 : index
    %c0_60 = arith.constant 0 : index
    %160 = vector.load %arg5[%c0_59, %c0_60] : memref<40x1xf32, #tpu.memory_space<vmem>>, vector<40x1xf32>
    %161 = vector.broadcast %160 : vector<40x1xf32> to vector<40x58xf32>
    %162 = arith.addf %159, %161 : vector<40x58xf32>
    %163 = vector.extract_strided_slice %162 {offsets = [0, 0], sizes = [40, 51], strides = [1, 1]} : vector<40x58xf32> to vector<40x51xf32>
    %164 = vector.extract_strided_slice %162 {offsets = [0, 1], sizes = [40, 51], strides = [1, 1]} : vector<40x58xf32> to vector<40x51xf32>
    %165 = arith.maximumf %163, %164 : vector<40x51xf32>
    %166 = vector.extract_strided_slice %162 {offsets = [0, 2], sizes = [40, 51], strides = [1, 1]} : vector<40x58xf32> to vector<40x51xf32>
    %167 = arith.maximumf %165, %166 : vector<40x51xf32>
    %168 = vector.extract_strided_slice %162 {offsets = [0, 3], sizes = [40, 51], strides = [1, 1]} : vector<40x58xf32> to vector<40x51xf32>
    %169 = arith.maximumf %167, %168 : vector<40x51xf32>
    %170 = vector.extract_strided_slice %162 {offsets = [0, 4], sizes = [40, 51], strides = [1, 1]} : vector<40x58xf32> to vector<40x51xf32>
    %171 = arith.maximumf %169, %170 : vector<40x51xf32>
    %172 = arith.truncf %171 : vector<40x51xf32> to vector<40x51xbf16>
    %c0_61 = arith.constant 0 : index
    %c0_62 = arith.constant 0 : index
    %173 = vector.load %arg6[%c0_61, %c0_62] : memref<51x11xbf16, #tpu.memory_space<vmem>>, vector<51x11xbf16>
    %cst_63 = arith.constant dense<0.000000e+00> : vector<40x11xf32>
    %174 = tpu.matmul %172, %173, %cst_63 {dimension_numbers = #tpu.dot_dimension_numbers<[1], [0], [0], [1], [0, 0, 1, 1], [], []>} : vector<40x51xbf16>, vector<51x11xbf16>, vector<40x11xf32> -> vector<40x11xf32>
    %cst_64 = arith.constant 2.000000e+01 : f32
    %175 = vector.broadcast %cst_64 : f32 to vector<40x11xf32>
    %176 = arith.minimumf %174, %175 : vector<40x11xf32>
    %177 = math.exp %176 : vector<40x11xf32>
    %cst_65 = arith.constant 2.000000e+00 : f32
    %178 = vector.broadcast %cst_65 : f32 to vector<40x11xf32>
    %179 = arith.addf %177, %178 : vector<40x11xf32>
    %180 = arith.mulf %177, %179 : vector<40x11xf32>
    %181 = arith.mulf %174, %180 : vector<40x11xf32>
    %cst_66 = arith.constant 2.000000e+00 : f32
    %182 = vector.broadcast %cst_66 : f32 to vector<40x11xf32>
    %183 = arith.addf %180, %182 : vector<40x11xf32>
    %184 = tpu.reciprocal %183 {approx = true} : vector<40x11xf32> -> vector<40x11xf32>
    %185 = arith.mulf %181, %184 : vector<40x11xf32>
    %cst_67 = arith.constant 2.000000e+01 : f32
    %186 = vector.broadcast %cst_67 : f32 to vector<40x11xf32>
    %187 = arith.cmpf ogt, %174, %186 : vector<40x11xf32>
    %188 = arith.select %187, %174, %185 : vector<40x11xi1>, vector<40x11xf32>
    %c3 = arith.constant 3 : index
    %c0_68 = arith.constant 0 : index
    %c0_69 = arith.constant 0 : index
    %189 = vector.load %arg1[%c3, %c0_68, %c0_69] : memref<4x4x64xbf16, #tpu.memory_space<vmem>>, vector<1x4x64xbf16>
    %190 = vector.shape_cast %189 : vector<1x4x64xbf16> to vector<4x64xbf16>
    %191 = vector.extract_strided_slice %190 {offsets = [0, 0], sizes = [4, 61], strides = [1, 1]} : vector<4x64xbf16> to vector<4x61xbf16>
    %192 = vector.extract_strided_slice %190 {offsets = [0, 1], sizes = [4, 61], strides = [1, 1]} : vector<4x64xbf16> to vector<4x61xbf16>
    %193 = vector.extract_strided_slice %190 {offsets = [0, 2], sizes = [4, 61], strides = [1, 1]} : vector<4x64xbf16> to vector<4x61xbf16>
    %194 = vector.extract_strided_slice %190 {offsets = [0, 3], sizes = [4, 61], strides = [1, 1]} : vector<4x64xbf16> to vector<4x61xbf16>
    %195 = tpu.concatenate %191, %192, %193, %194 in 0 : vector<4x61xbf16>, vector<4x61xbf16>, vector<4x61xbf16>, vector<4x61xbf16> -> vector<16x61xbf16>
    %c0_70 = arith.constant 0 : index
    %c0_71 = arith.constant 0 : index
    %196 = vector.load %arg2[%c0_70, %c0_71] : memref<40x16xbf16, #tpu.memory_space<vmem>>, vector<40x16xbf16>
    %cst_72 = arith.constant dense<0.000000e+00> : vector<40x61xf32>
    %197 = tpu.matmul %196, %195, %cst_72 {dimension_numbers = #tpu.dot_dimension_numbers<[1], [0], [0], [1], [0, 0, 1, 1], [], []>} : vector<40x16xbf16>, vector<16x61xbf16>, vector<40x61xf32> -> vector<40x61xf32>
    %c0_73 = arith.constant 0 : index
    %c0_74 = arith.constant 0 : index
    %198 = vector.load %arg3[%c0_73, %c0_74] : memref<40x1xf32, #tpu.memory_space<vmem>>, vector<40x1xf32>
    %199 = vector.broadcast %198 : vector<40x1xf32> to vector<40x61xf32>
    %200 = arith.addf %197, %199 : vector<40x61xf32>
    %cst_75 = arith.constant 2.000000e+01 : f32
    %201 = vector.broadcast %cst_75 : f32 to vector<40x61xf32>
    %202 = arith.minimumf %200, %201 : vector<40x61xf32>
    %203 = math.exp %202 : vector<40x61xf32>
    %cst_76 = arith.constant 2.000000e+00 : f32
    %204 = vector.broadcast %cst_76 : f32 to vector<40x61xf32>
    %205 = arith.addf %203, %204 : vector<40x61xf32>
    %206 = arith.mulf %203, %205 : vector<40x61xf32>
    %207 = arith.mulf %200, %206 : vector<40x61xf32>
    %cst_77 = arith.constant 2.000000e+00 : f32
    %208 = vector.broadcast %cst_77 : f32 to vector<40x61xf32>
    %209 = arith.addf %206, %208 : vector<40x61xf32>
    %210 = tpu.reciprocal %209 {approx = true} : vector<40x61xf32> -> vector<40x61xf32>
    %211 = arith.mulf %207, %210 : vector<40x61xf32>
    %cst_78 = arith.constant 2.000000e+01 : f32
    %212 = vector.broadcast %cst_78 : f32 to vector<40x61xf32>
    %213 = arith.cmpf ogt, %200, %212 : vector<40x61xf32>
    %214 = arith.select %213, %200, %211 : vector<40x61xi1>, vector<40x61xf32>
    %215 = arith.truncf %214 : vector<40x61xf32> to vector<40x61xbf16>
    %216 = vector.extract_strided_slice %215 {offsets = [0, 0], sizes = [40, 58], strides = [1, 1]} : vector<40x61xbf16> to vector<40x58xbf16>
    %217 = vector.extract_strided_slice %215 {offsets = [0, 1], sizes = [40, 58], strides = [1, 1]} : vector<40x61xbf16> to vector<40x58xbf16>
    %218 = vector.extract_strided_slice %215 {offsets = [0, 2], sizes = [40, 58], strides = [1, 1]} : vector<40x61xbf16> to vector<40x58xbf16>
    %219 = vector.extract_strided_slice %215 {offsets = [0, 3], sizes = [40, 58], strides = [1, 1]} : vector<40x61xbf16> to vector<40x58xbf16>
    %220 = tpu.concatenate %216, %217, %218, %219 in 0 : vector<40x58xbf16>, vector<40x58xbf16>, vector<40x58xbf16>, vector<40x58xbf16> -> vector<160x58xbf16>
    %c0_79 = arith.constant 0 : index
    %c0_80 = arith.constant 0 : index
    %221 = vector.load %arg4[%c0_79, %c0_80] : memref<40x160xbf16, #tpu.memory_space<vmem>>, vector<40x160xbf16>
    %cst_81 = arith.constant dense<0.000000e+00> : vector<40x58xf32>
    %222 = tpu.matmul %221, %220, %cst_81 {dimension_numbers = #tpu.dot_dimension_numbers<[1], [0], [0], [1], [0, 0, 1, 1], [], []>} : vector<40x160xbf16>, vector<160x58xbf16>, vector<40x58xf32> -> vector<40x58xf32>
    %c0_82 = arith.constant 0 : index
    %c0_83 = arith.constant 0 : index
    %223 = vector.load %arg5[%c0_82, %c0_83] : memref<40x1xf32, #tpu.memory_space<vmem>>, vector<40x1xf32>
    %224 = vector.broadcast %223 : vector<40x1xf32> to vector<40x58xf32>
    %225 = arith.addf %222, %224 : vector<40x58xf32>
    %226 = vector.extract_strided_slice %225 {offsets = [0, 0], sizes = [40, 51], strides = [1, 1]} : vector<40x58xf32> to vector<40x51xf32>
    %227 = vector.extract_strided_slice %225 {offsets = [0, 1], sizes = [40, 51], strides = [1, 1]} : vector<40x58xf32> to vector<40x51xf32>
    %228 = arith.maximumf %226, %227 : vector<40x51xf32>
    %229 = vector.extract_strided_slice %225 {offsets = [0, 2], sizes = [40, 51], strides = [1, 1]} : vector<40x58xf32> to vector<40x51xf32>
    %230 = arith.maximumf %228, %229 : vector<40x51xf32>
    %231 = vector.extract_strided_slice %225 {offsets = [0, 3], sizes = [40, 51], strides = [1, 1]} : vector<40x58xf32> to vector<40x51xf32>
    %232 = arith.maximumf %230, %231 : vector<40x51xf32>
    %233 = vector.extract_strided_slice %225 {offsets = [0, 4], sizes = [40, 51], strides = [1, 1]} : vector<40x58xf32> to vector<40x51xf32>
    %234 = arith.maximumf %232, %233 : vector<40x51xf32>
    %235 = arith.truncf %234 : vector<40x51xf32> to vector<40x51xbf16>
    %c0_84 = arith.constant 0 : index
    %c0_85 = arith.constant 0 : index
    %236 = vector.load %arg6[%c0_84, %c0_85] : memref<51x11xbf16, #tpu.memory_space<vmem>>, vector<51x11xbf16>
    %cst_86 = arith.constant dense<0.000000e+00> : vector<40x11xf32>
    %237 = tpu.matmul %235, %236, %cst_86 {dimension_numbers = #tpu.dot_dimension_numbers<[1], [0], [0], [1], [0, 0, 1, 1], [], []>} : vector<40x51xbf16>, vector<51x11xbf16>, vector<40x11xf32> -> vector<40x11xf32>
    %cst_87 = arith.constant 2.000000e+01 : f32
    %238 = vector.broadcast %cst_87 : f32 to vector<40x11xf32>
    %239 = arith.minimumf %237, %238 : vector<40x11xf32>
    %240 = math.exp %239 : vector<40x11xf32>
    %cst_88 = arith.constant 2.000000e+00 : f32
    %241 = vector.broadcast %cst_88 : f32 to vector<40x11xf32>
    %242 = arith.addf %240, %241 : vector<40x11xf32>
    %243 = arith.mulf %240, %242 : vector<40x11xf32>
    %244 = arith.mulf %237, %243 : vector<40x11xf32>
    %cst_89 = arith.constant 2.000000e+00 : f32
    %245 = vector.broadcast %cst_89 : f32 to vector<40x11xf32>
    %246 = arith.addf %243, %245 : vector<40x11xf32>
    %247 = tpu.reciprocal %246 {approx = true} : vector<40x11xf32> -> vector<40x11xf32>
    %248 = arith.mulf %244, %247 : vector<40x11xf32>
    %cst_90 = arith.constant 2.000000e+01 : f32
    %249 = vector.broadcast %cst_90 : f32 to vector<40x11xf32>
    %250 = arith.cmpf ogt, %237, %249 : vector<40x11xf32>
    %251 = arith.select %250, %237, %248 : vector<40x11xi1>, vector<40x11xf32>
    %cst_91 = arith.constant 0.000000e+00 : f32
    %252 = vector.broadcast %cst_91 : f32 to vector<20x160xf32>
    %253 = vector.extract_strided_slice %62 {offsets = [0, 0], sizes = [5, 11], strides = [1, 1]} : vector<40x11xf32> to vector<5x11xf32>
    %254 = vector.extract_strided_slice %125 {offsets = [0, 0], sizes = [5, 11], strides = [1, 1]} : vector<40x11xf32> to vector<5x11xf32>
    %255 = vector.extract_strided_slice %188 {offsets = [0, 0], sizes = [5, 11], strides = [1, 1]} : vector<40x11xf32> to vector<5x11xf32>
    %256 = vector.extract_strided_slice %251 {offsets = [0, 0], sizes = [5, 11], strides = [1, 1]} : vector<40x11xf32> to vector<5x11xf32>
    %257 = tpu.concatenate %253, %254, %255, %256 in 0 : vector<5x11xf32>, vector<5x11xf32>, vector<5x11xf32>, vector<5x11xf32> -> vector<20x11xf32>
    %258 = arith.truncf %257 : vector<20x11xf32> to vector<20x11xbf16>
    %c0_92 = arith.constant 0 : index
    %c0_93 = arith.constant 0 : index
    %c0_94 = arith.constant 0 : index
    %259 = vector.load %arg7[%c0_92, %c0_93, %c0_94] : memref<8x11x160xbf16, #tpu.memory_space<vmem>>, vector<1x11x160xbf16>
    %260 = vector.shape_cast %259 : vector<1x11x160xbf16> to vector<11x160xbf16>
    %cst_95 = arith.constant dense<0.000000e+00> : vector<20x160xf32>
    %261 = tpu.matmul %258, %260, %cst_95 {dimension_numbers = #tpu.dot_dimension_numbers<[1], [0], [0], [1], [0, 0, 1, 1], [], []>} : vector<20x11xbf16>, vector<11x160xbf16>, vector<20x160xf32> -> vector<20x160xf32>
    %262 = arith.addf %252, %261 : vector<20x160xf32>
    %263 = vector.extract_strided_slice %62 {offsets = [5, 0], sizes = [5, 11], strides = [1, 1]} : vector<40x11xf32> to vector<5x11xf32>
    %264 = vector.extract_strided_slice %125 {offsets = [5, 0], sizes = [5, 11], strides = [1, 1]} : vector<40x11xf32> to vector<5x11xf32>
    %265 = vector.extract_strided_slice %188 {offsets = [5, 0], sizes = [5, 11], strides = [1, 1]} : vector<40x11xf32> to vector<5x11xf32>
    %266 = vector.extract_strided_slice %251 {offsets = [5, 0], sizes = [5, 11], strides = [1, 1]} : vector<40x11xf32> to vector<5x11xf32>
    %267 = tpu.concatenate %263, %264, %265, %266 in 0 : vector<5x11xf32>, vector<5x11xf32>, vector<5x11xf32>, vector<5x11xf32> -> vector<20x11xf32>
    %268 = arith.truncf %267 : vector<20x11xf32> to vector<20x11xbf16>
    %c1_96 = arith.constant 1 : index
    %c0_97 = arith.constant 0 : index
    %c0_98 = arith.constant 0 : index
    %269 = vector.load %arg7[%c1_96, %c0_97, %c0_98] : memref<8x11x160xbf16, #tpu.memory_space<vmem>>, vector<1x11x160xbf16>
    %270 = vector.shape_cast %269 : vector<1x11x160xbf16> to vector<11x160xbf16>
    %cst_99 = arith.constant dense<0.000000e+00> : vector<20x160xf32>
    %271 = tpu.matmul %268, %270, %cst_99 {dimension_numbers = #tpu.dot_dimension_numbers<[1], [0], [0], [1], [0, 0, 1, 1], [], []>} : vector<20x11xbf16>, vector<11x160xbf16>, vector<20x160xf32> -> vector<20x160xf32>
    %272 = arith.addf %262, %271 : vector<20x160xf32>
    %273 = vector.extract_strided_slice %62 {offsets = [10, 0], sizes = [5, 11], strides = [1, 1]} : vector<40x11xf32> to vector<5x11xf32>
    %274 = vector.extract_strided_slice %125 {offsets = [10, 0], sizes = [5, 11], strides = [1, 1]} : vector<40x11xf32> to vector<5x11xf32>
    %275 = vector.extract_strided_slice %188 {offsets = [10, 0], sizes = [5, 11], strides = [1, 1]} : vector<40x11xf32> to vector<5x11xf32>
    %276 = vector.extract_strided_slice %251 {offsets = [10, 0], sizes = [5, 11], strides = [1, 1]} : vector<40x11xf32> to vector<5x11xf32>
    %277 = tpu.concatenate %273, %274, %275, %276 in 0 : vector<5x11xf32>, vector<5x11xf32>, vector<5x11xf32>, vector<5x11xf32> -> vector<20x11xf32>
    %278 = arith.truncf %277 : vector<20x11xf32> to vector<20x11xbf16>
    %c2_100 = arith.constant 2 : index
    %c0_101 = arith.constant 0 : index
    %c0_102 = arith.constant 0 : index
    %279 = vector.load %arg7[%c2_100, %c0_101, %c0_102] : memref<8x11x160xbf16, #tpu.memory_space<vmem>>, vector<1x11x160xbf16>
    %280 = vector.shape_cast %279 : vector<1x11x160xbf16> to vector<11x160xbf16>
    %cst_103 = arith.constant dense<0.000000e+00> : vector<20x160xf32>
    %281 = tpu.matmul %278, %280, %cst_103 {dimension_numbers = #tpu.dot_dimension_numbers<[1], [0], [0], [1], [0, 0, 1, 1], [], []>} : vector<20x11xbf16>, vector<11x160xbf16>, vector<20x160xf32> -> vector<20x160xf32>
    %282 = arith.addf %272, %281 : vector<20x160xf32>
    %283 = vector.extract_strided_slice %62 {offsets = [15, 0], sizes = [5, 11], strides = [1, 1]} : vector<40x11xf32> to vector<5x11xf32>
    %284 = vector.extract_strided_slice %125 {offsets = [15, 0], sizes = [5, 11], strides = [1, 1]} : vector<40x11xf32> to vector<5x11xf32>
    %285 = vector.extract_strided_slice %188 {offsets = [15, 0], sizes = [5, 11], strides = [1, 1]} : vector<40x11xf32> to vector<5x11xf32>
    %286 = vector.extract_strided_slice %251 {offsets = [15, 0], sizes = [5, 11], strides = [1, 1]} : vector<40x11xf32> to vector<5x11xf32>
    %287 = tpu.concatenate %283, %284, %285, %286 in 0 : vector<5x11xf32>, vector<5x11xf32>, vector<5x11xf32>, vector<5x11xf32> -> vector<20x11xf32>
    %288 = arith.truncf %287 : vector<20x11xf32> to vector<20x11xbf16>
    %c3_104 = arith.constant 3 : index
    %c0_105 = arith.constant 0 : index
    %c0_106 = arith.constant 0 : index
    %289 = vector.load %arg7[%c3_104, %c0_105, %c0_106] : memref<8x11x160xbf16, #tpu.memory_space<vmem>>, vector<1x11x160xbf16>
    %290 = vector.shape_cast %289 : vector<1x11x160xbf16> to vector<11x160xbf16>
    %cst_107 = arith.constant dense<0.000000e+00> : vector<20x160xf32>
    %291 = tpu.matmul %288, %290, %cst_107 {dimension_numbers = #tpu.dot_dimension_numbers<[1], [0], [0], [1], [0, 0, 1, 1], [], []>} : vector<20x11xbf16>, vector<11x160xbf16>, vector<20x160xf32> -> vector<20x160xf32>
    %292 = arith.addf %282, %291 : vector<20x160xf32>
    %293 = vector.extract_strided_slice %62 {offsets = [20, 0], sizes = [5, 11], strides = [1, 1]} : vector<40x11xf32> to vector<5x11xf32>
    %294 = vector.extract_strided_slice %125 {offsets = [20, 0], sizes = [5, 11], strides = [1, 1]} : vector<40x11xf32> to vector<5x11xf32>
    %295 = vector.extract_strided_slice %188 {offsets = [20, 0], sizes = [5, 11], strides = [1, 1]} : vector<40x11xf32> to vector<5x11xf32>
    %296 = vector.extract_strided_slice %251 {offsets = [20, 0], sizes = [5, 11], strides = [1, 1]} : vector<40x11xf32> to vector<5x11xf32>
    %297 = tpu.concatenate %293, %294, %295, %296 in 0 : vector<5x11xf32>, vector<5x11xf32>, vector<5x11xf32>, vector<5x11xf32> -> vector<20x11xf32>
    %298 = arith.truncf %297 : vector<20x11xf32> to vector<20x11xbf16>
    %c4 = arith.constant 4 : index
    %c0_108 = arith.constant 0 : index
    %c0_109 = arith.constant 0 : index
    %299 = vector.load %arg7[%c4, %c0_108, %c0_109] : memref<8x11x160xbf16, #tpu.memory_space<vmem>>, vector<1x11x160xbf16>
    %300 = vector.shape_cast %299 : vector<1x11x160xbf16> to vector<11x160xbf16>
    %cst_110 = arith.constant dense<0.000000e+00> : vector<20x160xf32>
    %301 = tpu.matmul %298, %300, %cst_110 {dimension_numbers = #tpu.dot_dimension_numbers<[1], [0], [0], [1], [0, 0, 1, 1], [], []>} : vector<20x11xbf16>, vector<11x160xbf16>, vector<20x160xf32> -> vector<20x160xf32>
    %302 = arith.addf %292, %301 : vector<20x160xf32>
    %303 = vector.extract_strided_slice %62 {offsets = [25, 0], sizes = [5, 11], strides = [1, 1]} : vector<40x11xf32> to vector<5x11xf32>
    %304 = vector.extract_strided_slice %125 {offsets = [25, 0], sizes = [5, 11], strides = [1, 1]} : vector<40x11xf32> to vector<5x11xf32>
    %305 = vector.extract_strided_slice %188 {offsets = [25, 0], sizes = [5, 11], strides = [1, 1]} : vector<40x11xf32> to vector<5x11xf32>
    %306 = vector.extract_strided_slice %251 {offsets = [25, 0], sizes = [5, 11], strides = [1, 1]} : vector<40x11xf32> to vector<5x11xf32>
    %307 = tpu.concatenate %303, %304, %305, %306 in 0 : vector<5x11xf32>, vector<5x11xf32>, vector<5x11xf32>, vector<5x11xf32> -> vector<20x11xf32>
    %308 = arith.truncf %307 : vector<20x11xf32> to vector<20x11xbf16>
    %c5 = arith.constant 5 : index
    %c0_111 = arith.constant 0 : index
    %c0_112 = arith.constant 0 : index
    %309 = vector.load %arg7[%c5, %c0_111, %c0_112] : memref<8x11x160xbf16, #tpu.memory_space<vmem>>, vector<1x11x160xbf16>
    %310 = vector.shape_cast %309 : vector<1x11x160xbf16> to vector<11x160xbf16>
    %cst_113 = arith.constant dense<0.000000e+00> : vector<20x160xf32>
    %311 = tpu.matmul %308, %310, %cst_113 {dimension_numbers = #tpu.dot_dimension_numbers<[1], [0], [0], [1], [0, 0, 1, 1], [], []>} : vector<20x11xbf16>, vector<11x160xbf16>, vector<20x160xf32> -> vector<20x160xf32>
    %312 = arith.addf %302, %311 : vector<20x160xf32>
    %313 = vector.extract_strided_slice %62 {offsets = [30, 0], sizes = [5, 11], strides = [1, 1]} : vector<40x11xf32> to vector<5x11xf32>
    %314 = vector.extract_strided_slice %125 {offsets = [30, 0], sizes = [5, 11], strides = [1, 1]} : vector<40x11xf32> to vector<5x11xf32>
    %315 = vector.extract_strided_slice %188 {offsets = [30, 0], sizes = [5, 11], strides = [1, 1]} : vector<40x11xf32> to vector<5x11xf32>
    %316 = vector.extract_strided_slice %251 {offsets = [30, 0], sizes = [5, 11], strides = [1, 1]} : vector<40x11xf32> to vector<5x11xf32>
    %317 = tpu.concatenate %313, %314, %315, %316 in 0 : vector<5x11xf32>, vector<5x11xf32>, vector<5x11xf32>, vector<5x11xf32> -> vector<20x11xf32>
    %318 = arith.truncf %317 : vector<20x11xf32> to vector<20x11xbf16>
    %c6 = arith.constant 6 : index
    %c0_114 = arith.constant 0 : index
    %c0_115 = arith.constant 0 : index
    %319 = vector.load %arg7[%c6, %c0_114, %c0_115] : memref<8x11x160xbf16, #tpu.memory_space<vmem>>, vector<1x11x160xbf16>
    %320 = vector.shape_cast %319 : vector<1x11x160xbf16> to vector<11x160xbf16>
    %cst_116 = arith.constant dense<0.000000e+00> : vector<20x160xf32>
    %321 = tpu.matmul %318, %320, %cst_116 {dimension_numbers = #tpu.dot_dimension_numbers<[1], [0], [0], [1], [0, 0, 1, 1], [], []>} : vector<20x11xbf16>, vector<11x160xbf16>, vector<20x160xf32> -> vector<20x160xf32>
    %322 = arith.addf %312, %321 : vector<20x160xf32>
    %323 = vector.extract_strided_slice %62 {offsets = [35, 0], sizes = [5, 11], strides = [1, 1]} : vector<40x11xf32> to vector<5x11xf32>
    %324 = vector.extract_strided_slice %125 {offsets = [35, 0], sizes = [5, 11], strides = [1, 1]} : vector<40x11xf32> to vector<5x11xf32>
    %325 = vector.extract_strided_slice %188 {offsets = [35, 0], sizes = [5, 11], strides = [1, 1]} : vector<40x11xf32> to vector<5x11xf32>
    %326 = vector.extract_strided_slice %251 {offsets = [35, 0], sizes = [5, 11], strides = [1, 1]} : vector<40x11xf32> to vector<5x11xf32>
    %327 = tpu.concatenate %323, %324, %325, %326 in 0 : vector<5x11xf32>, vector<5x11xf32>, vector<5x11xf32>, vector<5x11xf32> -> vector<20x11xf32>
    %328 = arith.truncf %327 : vector<20x11xf32> to vector<20x11xbf16>
    %c7 = arith.constant 7 : index
    %c0_117 = arith.constant 0 : index
    %c0_118 = arith.constant 0 : index
    %329 = vector.load %arg7[%c7, %c0_117, %c0_118] : memref<8x11x160xbf16, #tpu.memory_space<vmem>>, vector<1x11x160xbf16>
    %330 = vector.shape_cast %329 : vector<1x11x160xbf16> to vector<11x160xbf16>
    %cst_119 = arith.constant dense<0.000000e+00> : vector<20x160xf32>
    %331 = tpu.matmul %328, %330, %cst_119 {dimension_numbers = #tpu.dot_dimension_numbers<[1], [0], [0], [1], [0, 0, 1, 1], [], []>} : vector<20x11xbf16>, vector<11x160xbf16>, vector<20x160xf32> -> vector<20x160xf32>
    %332 = arith.addf %322, %331 : vector<20x160xf32>
    %c0_120 = arith.constant 0 : index
    %c0_121 = arith.constant 0 : index
    %333 = vector.load %arg8[%c0_120, %c0_121] : memref<1x160xf32, #tpu.memory_space<vmem>>, vector<1x160xf32>
    %334 = vector.broadcast %333 : vector<1x160xf32> to vector<20x160xf32>
    %335 = arith.addf %332, %334 : vector<20x160xf32>
    %cst_122 = arith.constant 2.000000e+01 : f32
    %336 = vector.broadcast %cst_122 : f32 to vector<20x160xf32>
    %337 = arith.minimumf %335, %336 : vector<20x160xf32>
    %338 = math.exp %337 : vector<20x160xf32>
    %cst_123 = arith.constant 2.000000e+00 : f32
    %339 = vector.broadcast %cst_123 : f32 to vector<20x160xf32>
    %340 = arith.addf %338, %339 : vector<20x160xf32>
    %341 = arith.mulf %338, %340 : vector<20x160xf32>
    %342 = arith.mulf %335, %341 : vector<20x160xf32>
    %cst_124 = arith.constant 2.000000e+00 : f32
    %343 = vector.broadcast %cst_124 : f32 to vector<20x160xf32>
    %344 = arith.addf %341, %343 : vector<20x160xf32>
    %345 = tpu.reciprocal %344 {approx = true} : vector<20x160xf32> -> vector<20x160xf32>
    %346 = arith.mulf %342, %345 : vector<20x160xf32>
    %cst_125 = arith.constant 2.000000e+01 : f32
    %347 = vector.broadcast %cst_125 : f32 to vector<20x160xf32>
    %348 = arith.cmpf ogt, %335, %347 : vector<20x160xf32>
    %349 = arith.select %348, %335, %346 : vector<20x160xi1>, vector<20x160xf32>
    %350 = arith.truncf %349 : vector<20x160xf32> to vector<20x160xbf16>
    %c0_126 = arith.constant 0 : index
    %c0_127 = arith.constant 0 : index
    %351 = vector.load %arg9[%c0_126, %c0_127] : memref<160x80xbf16, #tpu.memory_space<vmem>>, vector<160x80xbf16>
    %cst_128 = arith.constant dense<0.000000e+00> : vector<20x80xf32>
    %352 = tpu.matmul %350, %351, %cst_128 {dimension_numbers = #tpu.dot_dimension_numbers<[1], [0], [0], [1], [0, 0, 1, 1], [], []>} : vector<20x160xbf16>, vector<160x80xbf16>, vector<20x80xf32> -> vector<20x80xf32>
    %c0_129 = arith.constant 0 : index
    %c0_130 = arith.constant 0 : index
    %353 = vector.load %arg10[%c0_129, %c0_130] : memref<1x80xf32, #tpu.memory_space<vmem>>, vector<1x80xf32>
    %354 = vector.broadcast %353 : vector<1x80xf32> to vector<20x80xf32>
    %355 = arith.addf %352, %354 : vector<20x80xf32>
    %cst_131 = arith.constant 2.000000e+01 : f32
    %356 = vector.broadcast %cst_131 : f32 to vector<20x80xf32>
    %357 = arith.minimumf %355, %356 : vector<20x80xf32>
    %358 = math.exp %357 : vector<20x80xf32>
    %cst_132 = arith.constant 2.000000e+00 : f32
    %359 = vector.broadcast %cst_132 : f32 to vector<20x80xf32>
    %360 = arith.addf %358, %359 : vector<20x80xf32>
    %361 = arith.mulf %358, %360 : vector<20x80xf32>
    %362 = arith.mulf %355, %361 : vector<20x80xf32>
    %cst_133 = arith.constant 2.000000e+00 : f32
    %363 = vector.broadcast %cst_133 : f32 to vector<20x80xf32>
    %364 = arith.addf %361, %363 : vector<20x80xf32>
    %365 = tpu.reciprocal %364 {approx = true} : vector<20x80xf32> -> vector<20x80xf32>
    %366 = arith.mulf %362, %365 : vector<20x80xf32>
    %cst_134 = arith.constant 2.000000e+01 : f32
    %367 = vector.broadcast %cst_134 : f32 to vector<20x80xf32>
    %368 = arith.cmpf ogt, %355, %367 : vector<20x80xf32>
    %369 = arith.select %368, %355, %366 : vector<20x80xi1>, vector<20x80xf32>
    %370 = arith.truncf %369 : vector<20x80xf32> to vector<20x80xbf16>
    %c0_135 = arith.constant 0 : index
    %c0_136 = arith.constant 0 : index
    %371 = vector.load %arg11[%c0_135, %c0_136] : memref<80x20xbf16, #tpu.memory_space<vmem>>, vector<80x20xbf16>
    %cst_137 = arith.constant dense<0.000000e+00> : vector<20x20xf32>
    %372 = tpu.matmul %370, %371, %cst_137 {dimension_numbers = #tpu.dot_dimension_numbers<[1], [0], [0], [1], [0, 0, 1, 1], [], []>} : vector<20x80xbf16>, vector<80x20xbf16>, vector<20x20xf32> -> vector<20x20xf32>
    %c0_138 = arith.constant 0 : index
    %c0_139 = arith.constant 0 : index
    %373 = vector.load %arg12[%c0_138, %c0_139] : memref<1x20xf32, #tpu.memory_space<vmem>>, vector<1x20xf32>
    %374 = vector.broadcast %373 : vector<1x20xf32> to vector<20x20xf32>
    %375 = arith.addf %372, %374 : vector<20x20xf32>
    %c0_140 = arith.constant 0 : index
    %c0_141 = arith.constant 0 : index
    %376 = vector.load %arg13[%c0_140, %c0_141] : memref<20x20xf32, #tpu.memory_space<vmem>>, vector<20x20xf32>
    %377 = arith.mulf %375, %376 : vector<20x20xf32>
    %378 = vector.extract_strided_slice %377 {offsets = [0, 0], sizes = [20, 4], strides = [1, 1]} : vector<20x20xf32> to vector<20x4xf32>
    %379 = vector.extract_strided_slice %377 {offsets = [0, 4], sizes = [20, 4], strides = [1, 1]} : vector<20x20xf32> to vector<20x4xf32>
    %380 = arith.addf %378, %379 : vector<20x4xf32>
    %381 = vector.extract_strided_slice %377 {offsets = [0, 8], sizes = [20, 4], strides = [1, 1]} : vector<20x20xf32> to vector<20x4xf32>
    %382 = arith.addf %380, %381 : vector<20x4xf32>
    %383 = vector.extract_strided_slice %377 {offsets = [0, 12], sizes = [20, 4], strides = [1, 1]} : vector<20x20xf32> to vector<20x4xf32>
    %384 = arith.addf %382, %383 : vector<20x4xf32>
    %385 = vector.extract_strided_slice %377 {offsets = [0, 16], sizes = [20, 4], strides = [1, 1]} : vector<20x20xf32> to vector<20x4xf32>
    %386 = arith.addf %384, %385 : vector<20x4xf32>
    %cst_142 = arith.constant dense<0xFF800000> : vector<20xf32>
    %387 = vector.multi_reduction <maximumf>, %386, %cst_142 [1] : vector<20x4xf32> to vector<20xf32>
    %388 = vector.shape_cast %387 : vector<20xf32> to vector<20x1xf32>
    %389 = vector.broadcast %388 : vector<20x1xf32> to vector<20x4xf32>
    %390 = arith.subf %386, %389 : vector<20x4xf32>
    %391 = math.exp %390 : vector<20x4xf32>
    %cst_143 = arith.constant dense<0.000000e+00> : vector<20xf32>
    %392 = vector.multi_reduction <add>, %391, %cst_143 [1] : vector<20x4xf32> to vector<20xf32>
    %393 = vector.shape_cast %392 : vector<20xf32> to vector<20x1xf32>
    %394 = vector.broadcast %393 : vector<20x1xf32> to vector<20x4xf32>
    %395 = arith.divf %391, %394 : vector<20x4xf32>
    %c0_144 = arith.constant 0 : index
    %c0_145 = arith.constant 0 : index
    %396 = vector.load %arg14[%c0_144, %c0_145] : memref<4x20xf32, #tpu.memory_space<vmem>>, vector<4x20xf32>
    %cst_146 = arith.constant dense<0.000000e+00> : vector<4x4xf32>
    %397 = tpu.matmul %396, %395, %cst_146 {dimension_numbers = #tpu.dot_dimension_numbers<[1], [0], [0], [1], [0, 0, 1, 1], [], []>} : vector<4x20xf32>, vector<20x4xf32>, vector<4x4xf32> -> vector<4x4xf32>
    %c0_147 = arith.constant 0 : index
    %c0_148 = arith.constant 0 : index
    %c0_149 = arith.constant 0 : index
    %398 = vector.load %arg15[%c0_147, %c0_148, %c0_149] : memref<1x4x4xf32, #tpu.memory_space<vmem>>, vector<1x4x4xf32>
    %399 = vector.shape_cast %398 : vector<1x4x4xf32> to vector<4x4xf32>
    %400 = vector.shape_cast %397 : vector<4x4xf32> to vector<1x4x4xf32>
    tpu.vector_store %arg15[%c0_147, %c0_148, %c0_149], %400 {strides = array<i32>} : memref<1x4x4xf32, #tpu.memory_space<vmem>>, vector<1x4x4xf32>,
    return
  }
  func.func @transform_0(%arg0: i32) -> (i32, i32, i32) {
    %c0_i32 = arith.constant 0 : i32
    %c0_i32_0 = arith.constant 0 : i32
    %c0_i32_1 = arith.constant 0 : i32
    return %arg0, %c0_i32, %c0_i32_0 : i32, i32, i32
  }
  func.func @transform_1(%arg0: i32) -> (i32, i32) {
    %c0_i32 = arith.constant 0 : i32
    %c0_i32_0 = arith.constant 0 : i32
    %c0_i32_1 = arith.constant 0 : i32
    return %c0_i32, %c0_i32_0 : i32, i32
  }
  func.func @transform_2(%arg0: i32) -> (i32, i32) {
    %c0_i32 = arith.constant 0 : i32
    %c0_i32_0 = arith.constant 0 : i32
    %c0_i32_1 = arith.constant 0 : i32
    return %c0_i32, %c0_i32_0 : i32, i32
  }
  func.func @transform_3(%arg0: i32) -> (i32, i32) {
    %c0_i32 = arith.constant 0 : i32
    %c0_i32_0 = arith.constant 0 : i32
    %c0_i32_1 = arith.constant 0 : i32
    return %c0_i32, %c0_i32_0 : i32, i32
  }
  func.func @transform_4(%arg0: i32) -> (i32, i32) {
    %c0_i32 = arith.constant 0 : i32
    %c0_i32_0 = arith.constant 0 : i32
    %c0_i32_1 = arith.constant 0 : i32
    return %c0_i32, %c0_i32_0 : i32, i32
  }
  func.func @transform_5(%arg0: i32) -> (i32, i32) {
    %c0_i32 = arith.constant 0 : i32
    %c0_i32_0 = arith.constant 0 : i32
    %c0_i32_1 = arith.constant 0 : i32
    return %c0_i32, %c0_i32_0 : i32, i32
  }
  func.func @transform_6(%arg0: i32) -> (i32, i32, i32) {
    %c0_i32 = arith.constant 0 : i32
    %c0_i32_0 = arith.constant 0 : i32
    %c0_i32_1 = arith.constant 0 : i32
    %c0_i32_2 = arith.constant 0 : i32
    return %c0_i32, %c0_i32_0, %c0_i32_1 : i32, i32, i32
  }
  func.func @transform_7(%arg0: i32) -> (i32, i32) {
    %c0_i32 = arith.constant 0 : i32
    %c0_i32_0 = arith.constant 0 : i32
    %c0_i32_1 = arith.constant 0 : i32
    return %c0_i32, %c0_i32_0 : i32, i32
  }
  func.func @transform_8(%arg0: i32) -> (i32, i32) {
    %c0_i32 = arith.constant 0 : i32
    %c0_i32_0 = arith.constant 0 : i32
    %c0_i32_1 = arith.constant 0 : i32
    return %c0_i32, %c0_i32_0 : i32, i32
  }
  func.func @transform_9(%arg0: i32) -> (i32, i32) {
    %c0_i32 = arith.constant 0 : i32
    %c0_i32_0 = arith.constant 0 : i32
    %c0_i32_1 = arith.constant 0 : i32
    return %c0_i32, %c0_i32_0 : i32, i32
  }
  func.func @transform_10(%arg0: i32) -> (i32, i32) {
    %c0_i32 = arith.constant 0 : i32
    %c0_i32_0 = arith.constant 0 : i32
    %c0_i32_1 = arith.constant 0 : i32
    return %c0_i32, %c0_i32_0 : i32, i32
  }
  func.func @transform_11(%arg0: i32) -> (i32, i32) {
    %c0_i32 = arith.constant 0 : i32
    %c0_i32_0 = arith.constant 0 : i32
    %c0_i32_1 = arith.constant 0 : i32
    return %c0_i32, %c0_i32_0 : i32, i32
  }
  func.func @transform_12(%arg0: i32) -> (i32, i32) {
    %c0_i32 = arith.constant 0 : i32
    %c0_i32_0 = arith.constant 0 : i32
    %c0_i32_1 = arith.constant 0 : i32
    return %c0_i32, %c0_i32_0 : i32, i32
  }
  func.func @transform_13(%arg0: i32) -> (i32, i32) {
    %c0_i32 = arith.constant 0 : i32
    %c0_i32_0 = arith.constant 0 : i32
    %c0_i32_1 = arith.constant 0 : i32
    return %c0_i32, %c0_i32_0 : i32, i32
  }
  func.func @transform_14(%arg0: i32) -> (i32, i32, i32) {
    %c0_i32 = arith.constant 0 : i32
    %c0_i32_0 = arith.constant 0 : i32
    %c0_i32_1 = arith.constant 0 : i32
    return %arg0, %c0_i32, %c0_i32_0 : i32, i32, i32
  }
}

</mosaic_0001>

<bundles_post_ra>
// kernel: _lambda_.1
= control target key start
LH: loop header
LB: loop body
LE: loop exit
PB: predicated region body
PF: predicated region fallthrough
CT: control target
= control target key end

     0   :  { %s6870_s0 = inlined_call_operand.vmem [shape: bf16[8,4,64], index: 0, kind: input, shape index: {}]   ;;  %s6871_s1 = inlined_call_operand.vmem [shape: bf16[40,16], index: 1, kind: input, shape index: {}]   ;;  %s6872_s2 = inlined_call_operand.hbm [shape: f32[40,1], index: 2, kind: input, shape index: {}]   ;;  %s6873_s3 = inlined_call_operand.hbm [shape: bf16[40,160], index: 3, kind: input, shape index: {}]   ;;  %s6874_s4 = inlined_call_operand.hbm [shape: f32[40,1], index: 4, kind: input, shape index: {}]   ;;  %s6875_s5 = inlined_call_operand.hbm [shape: bf16[51,11], index: 5, kind: input, shape index: {}]   ;;  %s6876_s6 = inlined_call_operand.hbm [shape: bf16[8,11,160], index: 6, kind: input, shape index: {}]   ;;  %s6877_s7 = inlined_call_operand.hbm [shape: f32[1,160], index: 7, kind: input, shape index: {}]   ;;  %s6878_s8 = inlined_call_operand.vmem [shape: bf16[160,80], index: 8, kind: input, shape index: {}]   ;;  %s6879_s9 = inlined_call_operand.hbm [shape: f32[1,80], index: 9, kind: input, shape index: {}]   ;;  %s6880_s10 = inlined_call_operand.hbm [shape: bf16[80,20], index: 10, kind: input, shape index: {}]   ;;  %s6881_s11 = inlined_call_operand.hbm [shape: f32[1,20], index: 11, kind: input, shape index: {}]   ;;  %s6882_s12 = inlined_call_operand.hbm [shape: f32[20,20], index: 12, kind: input, shape index: {}]   ;;  %s6883_s13 = inlined_call_operand.hbm [shape: f32[4,20], index: 13, kind: input, shape index: {}]   ;;  %s6884_s14 = inlined_call_operand.vmem [shape: f32[2,4,4], index: 14, kind: output, shape index: {}]  }
   0x1   :  { %6895 = sst [smem:[#allocation26_spill]] %s6873_s3 }
   0x2   :  { %6896 = sst [smem:[#allocation27_spill]] %s6878_s8 }
   0x3   :  { %6897 = sst [smem:[#allocation28_spill]] %s6884_s14 }
   0x4   :  { %19 = vsyncpa [#allocation3], 0 }
   0x5   :  { %20 = vsyncpa [#allocation5], 0 }
   0x6   :  { %21 = vsyncpa [#allocation8], 0 }
   0x7   :  { %22 = vsyncpa [#allocation11], 0 }
   0x8   :  { %23 = vsyncpa [#allocation14], 0 }
   0x9   :  { %24 = vsyncpa [#allocation17], 0  ;;  %s5475_s29 = smov 0  }
   0xa LB: > { %6898 = sst [smem:[#allocation25_spill]] %s5370_s29  ;;  %s5481_s30 = sadd.s32 4294967295, %s5370_s29   ;;  %s5370_s29 = sphi %s5475_s29, %s30_s29  }
   0xb   : > { %p4076_p0 = scmp.ge.s32.totalorder %s5370_s29, 1  ;;  %p360_p1 = scmp.lt.s32.totalorder %s5370_s29, 3 }
   0xc   : > { %p6891_p2 = scmp.eq.s32.totalorder %s5481_s30, 0  ;;  %s5372_s16 = smov [#allocation4]  }
   0xd   : > { %p5486_p3 = pnand %p4076_p0, %p360_p1  ;;  %s388_s17 = sshll.u32 %s5372_s16, 4  ;;  %s5490_s17 = int_to_ptr.vmem [resolvable:$true] %s388_s17 }
   0xe   : > { %s5373_s18 = smov [#allocation7]   ;;  %s5374_s21 = smov [#allocation10]  }
   0xf   : > { %s6899_s15 = scalar_select %p5486_p3, 1, 0 }
  0x10   : > { %p4502_p4 = pneg %p5486_p3  ;;  %s414_s19 = sshll.u32 %s5373_s18, 4  ;;  %s5494_s19 = int_to_ptr.vmem [resolvable:$true] %s414_s19 }
  0x11   : > { %s5502_s22 = sshll.u32 %s5374_s21, 4  ;;  %s6901_s3 = sld [smem:[#allocation26_spill]]  ;;  %s442_s22 = int_to_ptr.vmem [resolvable:$true] %s5502_s22 }
  0x12   : > { %p5498_p5 = pnand %p6891_p2, %p4502_p4 }
  0x14   : > { %p5512_p7 = pneg %p5498_p5 }
  0x17   : > { %s5032_s25 = scalar_lea.hbm %s6901_s3, 640 }
  0x18   : > { %p5033_p6 = scmp.ne.s32.totalorder %s6901_s3, %s5032_s25  ;;  %p5039_p10 = scmp.lt.u32.totalorder %s5032_s25, %s6901_s3 }
  0x1a   : > { %p5035_p8 = pnand %p5512_p7, %p5033_p6 }
  0x1c   : > { %p5036_p9 = pneg %p5035_p8 }
  0x1e   : > { %p5041_p11 = pnand %p5039_p10, %p5036_p9 }
  0x20   : > { %5044 = shalt.err (!%p5041_p11)
}
  0x21   : > { %s5045_s21 = scalar_lea.vmem %s5490_s17, 640  ;;  %p5053_p1 = scmp.lt.s32.totalorder %s5490_s17, %s5490_s17 }
  0x22   : > { %p5046_p12 = scmp.ne.s32.totalorder %s5490_s17, %s5045_s21  ;;  %p5054_p4 = scmp.lt.s32.totalorder %s5045_s21, %s5045_s21 }
  0x24   : > { %p5048_p13 = pnand %p5046_p12, %p5512_p7  ;;  %p5055_p6 = por %p5054_p4, %p5053_p1 }
  0x26   : > { %p5049_p0 = pneg %p5048_p13 }
  0x28   : > { %p5056_p8 = pnand %p5055_p6, %p5049_p0 }
  0x2a   : > { %5059 = shalt.err (!%p5056_p8)
}
  0x2b   : > { %s6887_s23 = smov 128   ;;  %s6889_s24 = smov 8  }
  0x2c   : > { %4508 = dma.hbm_to_vmem [thread:$0]  (!%p5498_p5), %s6901_s3, 640, %s5490_s17, [#allocation5], %s6887_s23, %s6887_s23, %s6889_s24  }
  0x2d   : > { %s5060_s18 = scalar_lea.hbm %s6875_s5, 448 }
  0x2e   : > { %p5061_p9 = scmp.ne.s32.totalorder %s6875_s5, %s5060_s18  ;;  %p5067_p12 = scmp.lt.u32.totalorder %s5060_s18, %s6875_s5 }
  0x30   : > { %p5063_p10 = pnand %p5061_p9, %p5512_p7 }
  0x32   : > { %p5064_p11 = pneg %p5063_p10 }
  0x34   : > { %p5069_p13 = pnand %p5067_p12, %p5064_p11 }
  0x36   : > { %5072 = shalt.err (!%p5069_p13)
}
  0x37   : > { %s5073_s17 = scalar_lea.vmem %s5494_s19, 448  ;;  %p5081_p6 = scmp.lt.s32.totalorder %s5494_s19, %s5494_s19 }
  0x38   : > { %p5074_p0 = scmp.ne.s32.totalorder %s5494_s19, %s5073_s17  ;;  %p5082_p8 = scmp.lt.s32.totalorder %s5073_s17, %s5073_s17 }
  0x3a   : > { %p5076_p1 = pnand %p5074_p0, %p5512_p7  ;;  %p5083_p9 = por %p5082_p8, %p5081_p6 }
  0x3c   : > { %p5077_p4 = pneg %p5076_p1 }
  0x3e   : > { %p5084_p10 = pnand %p5083_p9, %p5077_p4 }
  0x40   : > { %5087 = shalt.err (!%p5084_p10)
}
  0x41   : > { %s5377_s29 = smov 64   ;;  %s5378_s8 = smov 4  }
  0x42   : > { %4514 = dma.hbm_to_vmem [thread:$0]  (!%p5498_p5), %s6875_s5, 448, %s5494_s19, [#allocation8], %s5377_s29, %s5377_s29, %s5378_s8  }
  0x43   : > { %s5379_s26 = smov [#allocation13]   ;;  %s5088_s21 = scalar_lea.hbm %s6877_s7, 32 }
  0x44   : > { %s465_s27 = sshll.u32 %s5379_s26, 4  ;;  %p5089_p11 = scmp.ne.s32.totalorder %s6877_s7, %s5088_s21  ;;  %s466_s27 = int_to_ptr.vmem [resolvable:$true] %s465_s27 }
  0x45   : > { %p5095_p0 = scmp.lt.u32.totalorder %s5088_s21, %s6877_s7 }
  0x46   : > { %p5091_p12 = pnand %p5089_p11, %p5512_p7 }
  0x48   : > { %p5092_p13 = pneg %p5091_p12 }
  0x4a   : > { %p5097_p1 = pnand %p5095_p0, %p5092_p13 }
  0x4c   : > { %5100 = shalt.err (!%p5097_p1)
}
  0x4d   : > { %s5101_s19 = scalar_lea.vmem %s442_s22, 32  ;;  %p5109_p9 = scmp.lt.s32.totalorder %s442_s22, %s442_s22 }
  0x4e   : > { %p5102_p4 = scmp.ne.s32.totalorder %s442_s22, %s5101_s19  ;;  %p5110_p10 = scmp.lt.s32.totalorder %s5101_s19, %s5101_s19 }
  0x50   : > { %p5104_p6 = pnand %p5102_p4, %p5512_p7  ;;  %p5111_p2 = por %p5110_p10, %p5109_p9 }
  0x52   : > { %p5105_p8 = pneg %p5104_p6 }
  0x54   : > { %p5112_p3 = pnand %p5111_p2, %p5105_p8 }
  0x56   : > { %5115 = shalt.err (!%p5112_p3)
}
  0x57   : > { %4520 = dma.hbm_to_vmem [thread:$0]  (!%p5498_p5), %s6877_s7, 32, %s442_s22, [#allocation11]  }
  0x58   : > { %s5116_s25 = scalar_lea.hbm %s6880_s10, 640 }
  0x59   : > { %p5117_p11 = scmp.ne.s32.totalorder %s6880_s10, %s5116_s25  ;;  %p5123_p3 = scmp.lt.u32.totalorder %s5116_s25, %s6880_s10 }
  0x5b   : > { %p5119_p12 = pnand %p5117_p11, %p5512_p7 }
  0x5d   : > { %p5120_p2 = pneg %p5119_p12 }
  0x5f   : > { %p5125_p13 = pnand %p5123_p3, %p5120_p2 }
  0x61   : > { %5128 = shalt.err (!%p5125_p13)
}
  0x62   : > { %s5129_s17 = scalar_lea.vmem %s466_s27, 640  ;;  %p5137_p6 = scmp.lt.s32.totalorder %s466_s27, %s466_s27 }
  0x63   : > { %p5130_p0 = scmp.ne.s32.totalorder %s466_s27, %s5129_s17  ;;  %p5138_p8 = scmp.lt.s32.totalorder %s5129_s17, %s5129_s17 }
  0x65   : > { %p5132_p1 = pnand %p5130_p0, %p5512_p7  ;;  %p5139_p9 = por %p5138_p8, %p5137_p6 }
  0x67   : > { %p5133_p4 = pneg %p5132_p1 }
  0x69   : > { %p5140_p10 = pnand %p5139_p9, %p5133_p4 }
  0x6b   : > { %5143 = shalt.err (!%p5140_p10)
}
  0x6c   : > { %4526 = dma.hbm_to_vmem [thread:$0]  (!%p5498_p5), %s6880_s10, 640, %s466_s27, [#allocation14], %s5377_s29, %s5377_s29, %s5378_s8  }
  0x6d   : > { %s5380_s23 = smov [#allocation16]   ;;  %s5381_s3 = smov [#allocation2]  }
  0x6e   : > { %s489_s14 = sshll.u32 %s5380_s23, 4  ;;  %s375_s24 = sshll.u32 %s5381_s3, 4  ;;  %s490_s14 = int_to_ptr.vmem [resolvable:$true] %s489_s14  ;;  %s376_s24 = int_to_ptr.vmem [resolvable:$true] %s375_s24 }
  0x6f   : > { %s5144_s16 = scalar_lea.hbm %s6882_s12, 384 }
  0x70   : > { %p5145_p11 = scmp.ne.s32.totalorder %s6882_s12, %s5144_s16  ;;  %p5151_p3 = scmp.lt.u32.totalorder %s5144_s16, %s6882_s12 }
  0x72   : > { %p5147_p12 = pnand %p5145_p11, %p5512_p7 }
  0x74   : > { %p5148_p2 = pneg %p5147_p12 }
  0x76   : > { %p5153_p13 = pnand %p5151_p3, %p5148_p2 }
  0x78   : > { %5156 = shalt.err (!%p5153_p13)
}
  0x79   : > { %s5157_s29 = scalar_lea.vmem %s490_s14, 384  ;;  %p5165_p6 = scmp.lt.s32.totalorder %s490_s14, %s490_s14 }
  0x7a   : > { %p5158_p0 = scmp.ne.s32.totalorder %s490_s14, %s5157_s29  ;;  %p5166_p8 = scmp.lt.s32.totalorder %s5157_s29, %s5157_s29 }
  0x7c   : > { %p5160_p1 = pnand %p5158_p0, %p5512_p7  ;;  %p5167_p9 = por %p5166_p8, %p5165_p6 }
  0x7e   : > { %p5161_p4 = pneg %p5160_p1 }
  0x80   : > { %p5168_p10 = pnand %p5167_p9, %p5161_p4 }
  0x82   : > { %5171 = shalt.err (!%p5168_p10)
}
  0x83   : > { %s6903_s8 = smov 8   ;;  %s6904_s27 = smov 128  }
  0x84   : > { %4532 = dma.hbm_to_vmem [thread:$0]  (!%p5498_p5), %s6882_s12, 384, %s490_s14, [#allocation17], %s6904_s27, %s6904_s27, %s6903_s8  }
  0x85   : > { %s5172_s26 = scalar_lea.hbm %s6872_s2, 640 }
  0x86   : > { %p5173_p11 = scmp.ne.s32.totalorder %s6872_s2, %s5172_s26  ;;  %p5179_p3 = scmp.lt.u32.totalorder %s5172_s26, %s6872_s2 }
  0x88   : > { %p5175_p12 = pnand %p5173_p11, %p5512_p7 }
  0x8a   : > { %p5176_p2 = pneg %p5175_p12 }
  0x8c   : > { %p5181_p13 = pnand %p5179_p3, %p5176_p2 }
  0x8e   : > { %5184 = shalt.err (!%p5181_p13)
}
  0x8f   : > { %s5185_s22 = scalar_lea.vmem %s376_s24, 640  ;;  %p5193_p6 = scmp.lt.s32.totalorder %s376_s24, %s376_s24 }
  0x90   : > { %p5186_p0 = scmp.ne.s32.totalorder %s376_s24, %s5185_s22  ;;  %p5194_p8 = scmp.lt.s32.totalorder %s5185_s22, %s5185_s22 }
  0x92   : > { %p5188_p1 = pnand %p5186_p0, %p5512_p7  ;;  %p5195_p9 = por %p5194_p8, %p5193_p6 }
  0x94   : > { %p5189_p4 = pneg %p5188_p1 }
  0x96   : > { %p5196_p10 = pnand %p5195_p9, %p5189_p4 }
  0x98   : > { %5199 = shalt.err (!%p5196_p10)
}
  0x99   : > { %4505 = dma.hbm_to_vmem [thread:$0]  (!%p5498_p5), %s6872_s2, 640, %s376_s24, [#allocation3], %s6904_s27, %s6904_s27, %s6903_s8  }
  0x9a   : > { %s5382_s19 = smov [#allocation6]   ;;  %s5383_s3 = smov [#allocation9]  }
  0x9b   : > { %s401_s23 = sshll.u32 %s5382_s19, 4  ;;  %s427_s25 = sshll.u32 %s5383_s3, 4  ;;  %s402_s23 = int_to_ptr.vmem [resolvable:$true] %s401_s23  ;;  %s428_s25 = int_to_ptr.vmem [resolvable:$true] %s427_s25 }
  0x9c   : > { %s5200_s18 = scalar_lea.hbm %s6874_s4, 640 }
  0x9d   : > { %p5201_p11 = scmp.ne.s32.totalorder %s6874_s4, %s5200_s18  ;;  %p5207_p3 = scmp.lt.u32.totalorder %s5200_s18, %s6874_s4 }
  0x9f   : > { %p5203_p12 = pnand %p5201_p11, %p5512_p7 }
  0xa1   : > { %p5204_p2 = pneg %p5203_p12 }
  0xa3   : > { %p5209_p13 = pnand %p5207_p3, %p5204_p2 }
  0xa5   : > { %5212 = shalt.err (!%p5209_p13)
}
  0xa6   : > { %s5213_s24 = scalar_lea.vmem %s402_s23, 640  ;;  %p5221_p6 = scmp.lt.s32.totalorder %s402_s23, %s402_s23 }
  0xa7   : > { %p5214_p0 = scmp.ne.s32.totalorder %s402_s23, %s5213_s24  ;;  %p5222_p8 = scmp.lt.s32.totalorder %s5213_s24, %s5213_s24 }
  0xa9   : > { %p5216_p1 = pnand %p5214_p0, %p5512_p7  ;;  %p5223_p9 = por %p5222_p8, %p5221_p6 }
  0xab   : > { %p5217_p4 = pneg %p5216_p1 }
  0xad   : > { %p5224_p10 = pnand %p5223_p9, %p5217_p4 }
  0xaf   : > { %5227 = shalt.err (!%p5224_p10)
}
  0xb0   : > { %4511 = dma.hbm_to_vmem [thread:$0]  (!%p5498_p5), %s6874_s4, 640, %s402_s23, [#allocation5], %s6904_s27, %s6904_s27, %s6903_s8  }
  0xb1   : > { %s5228_s16 = scalar_lea.hbm %s6876_s6, 2048 }
  0xb2   : > { %p5229_p11 = scmp.ne.s32.totalorder %s6876_s6, %s5228_s16  ;;  %p5235_p3 = scmp.lt.u32.totalorder %s5228_s16, %s6876_s6 }
  0xb4   : > { %p5231_p12 = pnand %p5229_p11, %p5512_p7 }
  0xb6   : > { %p5232_p2 = pneg %p5231_p12 }
  0xb8   : > { %p5237_p13 = pnand %p5235_p3, %p5232_p2 }
  0xba   : > { %5240 = shalt.err (!%p5237_p13)
}
  0xbb   : > { %s5241_s14 = scalar_lea.vmem %s428_s25, 2048  ;;  %p5249_p6 = scmp.lt.s32.totalorder %s428_s25, %s428_s25 }
  0xbc   : > { %p5242_p0 = scmp.ne.s32.totalorder %s428_s25, %s5241_s14  ;;  %p5250_p8 = scmp.lt.s32.totalorder %s5241_s14, %s5241_s14 }
  0xbe   : > { %p5244_p1 = pnand %p5242_p0, %p5512_p7  ;;  %p5251_p9 = por %p5250_p8, %p5249_p6 }
  0xc0   : > { %p5245_p4 = pneg %p5244_p1 }
  0xc2   : > { %p5252_p10 = pnand %p5251_p9, %p5245_p4 }
  0xc4   : > { %5255 = shalt.err (!%p5252_p10)
}
  0xc5   : > { %4517 = dma.hbm_to_vmem [thread:$0]  (!%p5498_p5), %s6876_s6, 2048, %s428_s25, [#allocation8], %s6904_s27, %s6904_s27, %s6903_s8  }
  0xc6   : > { %s5384_s29 = smov [#allocation12]   ;;  %s5385_s3 = smov [#allocation15]  }
  0xc7   : > { %s455_s19 = sshll.u32 %s5384_s29, 4  ;;  %s479_s26 = sshll.u32 %s5385_s3, 4  ;;  %s456_s19 = int_to_ptr.vmem [resolvable:$true] %s455_s19  ;;  %s480_s26 = int_to_ptr.vmem [resolvable:$true] %s479_s26 }
  0xc8   : > { %s5256_s21 = scalar_lea.hbm %s6879_s9, 16 }
  0xc9   : > { %p5257_p11 = scmp.ne.s32.totalorder %s6879_s9, %s5256_s21  ;;  %p5263_p3 = scmp.lt.u32.totalorder %s5256_s21, %s6879_s9 }
  0xcb   : > { %p5259_p12 = pnand %p5257_p11, %p5512_p7 }
  0xcd   : > { %p5260_p2 = pneg %p5259_p12 }
  0xcf   : > { %p5265_p13 = pnand %p5263_p3, %p5260_p2 }
  0xd1   : > { %5268 = shalt.err (!%p5265_p13)
}
  0xd2   : > { %s5269_s8 = scalar_lea.vmem %s456_s19, 16  ;;  %s5276_s27 = scalar_lea.vmem %s456_s19, 32 }
  0xd3   : > { %p5270_p0 = scmp.ne.s32.totalorder %s456_s19, %s5269_s8  ;;  %p5277_p6 = scmp.lt.s32.totalorder %s456_s19, %s456_s19 }
  0xd4   : > { %p5278_p8 = scmp.lt.s32.totalorder %s5276_s27, %s5269_s8 }
  0xd5   : > { %p5272_p1 = pnand %p5270_p0, %p5512_p7 }
  0xd6   : > { %p5279_p9 = por %p5278_p8, %p5277_p6 }
  0xd7   : > { %p5273_p4 = pneg %p5272_p1 }
  0xd9   : > { %p5280_p10 = pnand %p5279_p9, %p5273_p4 }
  0xdb   : > { %5283 = shalt.err (!%p5280_p10)
}
  0xdc   : > { %4523 = dma.hbm_to_vmem [thread:$0]  (!%p5498_p5), %s6879_s9, 16, %s456_s19, [#allocation11]  }
  0xdd   : > { %s5284_s16 = scalar_lea.hbm %s6881_s11, 16 }
  0xde   : > { %p5285_p11 = scmp.ne.s32.totalorder %s6881_s11, %s5284_s16  ;;  %p5291_p3 = scmp.lt.u32.totalorder %s5284_s16, %s6881_s11 }
  0xe0   : > { %p5287_p12 = pnand %p5285_p11, %p5512_p7 }
  0xe2   : > { %p5288_p2 = pneg %p5287_p12 }
  0xe4   : > { %p5293_p13 = pnand %p5291_p3, %p5288_p2 }
  0xe6   : > { %5296 = shalt.err (!%p5293_p13)
}
  0xe7   : > { %s5297_s14 = scalar_lea.vmem %s480_s26, 16  ;;  %s5304_s19 = scalar_lea.vmem %s480_s26, 32 }
  0xe8   : > { %p5298_p0 = scmp.ne.s32.totalorder %s480_s26, %s5297_s14  ;;  %p5305_p6 = scmp.lt.s32.totalorder %s480_s26, %s480_s26 }
  0xe9   : > { %p5306_p8 = scmp.lt.s32.totalorder %s5304_s19, %s5297_s14 }
  0xea   : > { %p5300_p1 = pnand %p5298_p0, %p5512_p7 }
  0xeb   : > { %p5307_p9 = por %p5306_p8, %p5305_p6 }
  0xec   : > { %p5301_p4 = pneg %p5300_p1 }
  0xee   : > { %p5308_p10 = pnand %p5307_p9, %p5301_p4 }
  0xf0   : > { %5311 = shalt.err (!%p5308_p10)
}
  0xf1   : > { %4529 = dma.hbm_to_vmem [thread:$0]  (!%p5498_p5), %s6881_s11, 16, %s480_s26, [#allocation14]  }
  0xf2   : > { %s5386_s27 = smov [#allocation18]   ;;  %s5312_s3 = scalar_lea.hbm %s6883_s13, 64 }
  0xf3   : > { %s503_s25 = sshll.u32 %s5386_s27, 4  ;;  %p5313_p11 = scmp.ne.s32.totalorder %s6883_s13, %s5312_s3  ;;  %s504_s25 = int_to_ptr.vmem [resolvable:$true] %s503_s25 }
  0xf4   : > { %p5319_p3 = scmp.lt.u32.totalorder %s5312_s3, %s6883_s13 }
  0xf5   : > { %p5315_p12 = pnand %p5313_p11, %p5512_p7 }
  0xf7   : > { %p5316_p2 = pneg %p5315_p12 }
  0xf9   : > { %p5321_p13 = pnand %p5319_p3, %p5316_p2 }
  0xfb   : > { %5324 = shalt.err (!%p5321_p13)
}
  0xfc   : > { %s5325_s26 = scalar_lea.vmem %s504_s25, 64  ;;  %p5333_p6 = scmp.lt.s32.totalorder %s504_s25, %s504_s25 }
  0xfd   : > { %p5326_p0 = scmp.ne.s32.totalorder %s504_s25, %s5325_s26  ;;  %p5334_p8 = scmp.lt.s32.totalorder %s5325_s26, %s5325_s26 }
  0xff   : > { %p5328_p1 = pnand %p5326_p0, %p5512_p7  ;;  %p5335_p9 = por %p5334_p8, %p5333_p6 }
 0x101   : > { %p5329_p4 = pneg %p5328_p1 }
 0x103   : > { %p5336_p10 = pnand %p5335_p9, %p5329_p4 }
 0x105   : > { %5339 = shalt.err (!%p5336_p10)
}
 0x106   : > { %4535 = dma.hbm_to_vmem [thread:$0]  (!%p5498_p5), %s6883_s13, 64, %s504_s25, [#allocation17]  }
 0x107   : > { %p6905_p11 = scmp.ne.s32.totalorder %s6899_s15, 0 }
 0x108   : > { %p6906_p12 = scmp.eq.s32.totalorder (!%p6905_p11), %s5481_s30, 0 }
 0x109   : > { %525 = sbr.rel (%p6905_p11) target bundleno = 4926 (0x133e), region = 76 }
 0x110   : > { %5345 = dma.done.wait (%p6906_p12), [#allocation3], 640   ;;  %p6907_p7 = pmov %p6906_p12 }
 0x112   : > { %5347 = vsyncadd (%p6907_p7), [#allocation3], 4294966656  ;;  %p6908_p2 = pmov %p6907_p7 }
 0x114   : > { %5349 = dma.done.wait (%p6908_p2), [#allocation5], 1280   ;;  %p6909_p3 = pmov %p6908_p2 }
 0x115   : > { %p6910_p13 = pmov %p6908_p2 }
 0x116   : > { %5351 = vsyncadd (%p6909_p3), [#allocation5], 4294966016 }
 0x117   : > { %5353 = dma.done.wait (%p6910_p13), [#allocation8], 2496   ;;  %p6911_p5 = pmov %p6908_p2 }
 0x118   : > { %p6912_p0 = pmov %p6908_p2 }
 0x119   : > { %5355 = vsyncadd (%p6911_p5), [#allocation8], 4294964800 }
 0x11a   : > { %5357 = dma.done.wait (%p6912_p0), [#allocation11], 48   ;;  %p6913_p1 = pmov %p6912_p0 }
 0x11b   : > { %p6914_p4 = pmov %p6912_p0 }
 0x11c   : > { %5359 = vsyncadd (%p6913_p1), [#allocation11], 4294967248 }
 0x11d   : > { %5361 = dma.done.wait (%p6914_p4), [#allocation14], 656   ;;  %p6915_p6 = pmov %p6912_p0 }
 0x11e   : > { %p6916_p8 = pmov %p6912_p0 }
 0x11f   : > { %5363 = vsyncadd (%p6915_p6), [#allocation14], 4294966640 }
 0x120   : > { %5365 = dma.done.wait (%p6916_p8), [#allocation17], 448   ;;  %p6917_p9 = pmov %p6912_p0 }
 0x121   : > { %s4101_s15 = sshll.u32 %s5481_s30, 2  ;;  %v627_v0 = vlaneseq  ;;  %v5387_v1 = vmov 1983009808   ;;  %v5388_v5 = vmov 0.0   ;;  %vm5389_vm0 = vmmov 0   ;;  %s5390_s8 = smov 127  }
 0x122   : > { %5367 = vsyncadd (%p6917_p9), [#allocation17], 4294966848  ;;  %p611_p10 = scmp.lt.s32.totalorder %s4101_s15, 7  ;;  %v625_v2 = vunpack.c.l.s4 %v5387_v1  ;;  %4268 = vmatprep.subr.bf16.mxu0 %v5388_v5  ;;  %4270 = vmatprep.mubr.msk.bf16.mxu0 %vm5389_vm0, %v5388_v5  ;;  %s5391_s27 = smov 125   ;;  %v662_v13 = vld [vmem:[#allocation2] sm:$0xff]  ;;  %v663_v14 = vld [vmem:[#allocation2 + $0x8] sm:$0xff] }
 0x123   : > { %v5767_v3 = vshrl.u32 %v627_v0, 7  ;;  %s5392_s25 = smov 126   ;;  %v5393_v15 = vmov 0   ;;  %v664_v16 = vld [vmem:[#allocation2 + $0x10] sm:$0xff]  ;;  %v666_v17 = vld [vmem:[#allocation2 + $0x20] sm:$0xff]  ;;  %v665_v18 = vld [vmem:[#allocation2 + $0x18] sm:$0xff] }
 0x124   : > { %s6924_s15 = smov (!%p611_p10, %s4101_s15), 7  ;;  %v626_v4 = vunpack.c.0.s8 %v625_v2  ;;  %4594 = vset.pattern.permute.xlu1 %v5393_v15  ;;  %4595 = vset.pattern.permute.xlu0 %v5393_v15  ;;  %vm646_vm1 = vcmask 1041408   ;;  %vm650_vm2 = vcmask 1043456   ;;  %vm653_vm3 = vcmask 1045504   ;;  %v5795_v25 = vld [vmem:[%s6871_s1] sm:$0xff]   ;;  %v5805_v26 = vld [vmem:[%s6871_s1 + $0x8] sm:$0xff]  }
 0x125   : > { %s4102_s20 = sshll.u32 %s6924_s15, 1  ;;  %939 = vmatprep.subr.bf16.mxu1 %v5393_v15  ;;  %vm705_vm4 = vcmask 130048   ;;  %v5814_v27 = vld [vmem:[%s6871_s1 + $0x10] ss:$0 sps:$4 sm:$0xff]   ;;  %vm929_vm10 = vcmask 261120   ;;  %vm1121_vm11 = vcmask 1040384  }
 0x126   : > { %s5773_s23 = scalar_lea.vmem %s6870_s0, %s4102_s20  ;;  %v5776_v6 = vsub.s32 %v626_v4, %v5767_v3  ;;  %s5395_s17 = smov 124   ;;  %vm1111_vm12 = vcmask 416768   ;;  %vm2614_vm15 = vcmask 1042432  }
 0x127   : > { %v621_v7 = vld [vmem:[%s5773_s23] sm:$0x3]  ;;  %s5396_s24 = smov 112   ;;  %s5397_s29 = smov 120  }
 0x128   : > { %v623_v8 = vcombine.low %v621_v7, %v621_v7  ;;  %v637_v9 = vrot.slane %v621_v7, %v5776_v6  ;;  %s5398_s3 = smov 116   ;;  %p616_p11 = scmp.lt.s32.totalorder %s5481_s30, 1 }
 0x129   : > { %s6921_s21 = sld [smem:[#allocation28_spill]] }
 0x12a   : > { %v630_v10 = vrot.slane %v623_v8, %v5776_v6  ;;  %v640_v11 = vcombine.low %v637_v9, %v637_v9  ;;  %s6926_s30 = smov (!%p616_p11, %s5481_s30), 1 }
 0x12c   : > { %638 = vrot.lane.b32.xlu0 %v630_v10, %s5390_s8  ;;  %v643_v12 = vcombine.low %v630_v10, %v630_v10 }
 0x12e   : > { %644 = vrot.lane.b32.xlu1 %v643_v12, %s5391_s27 }
 0x130   : > { %641 = vrot.lane.b32.xlu0 %v640_v11, %s5392_s25 }
 0x132   : > { %669 = vperm.xlu1 %4594, %v662_v13  }
 0x134   : > { %674 = vperm.xlu0 %4595, %v663_v14  }
 0x136   : > { %679 = vperm.xlu1 %4594, %v664_v16  }
 0x138   : > { %689 = vperm.xlu0 %4595, %v666_v17  }
 0x13a   : > { %684 = vperm.xlu1 %4594, %v665_v18  }
 0x19e   : > { %v639_v19 = vpop.permute.xlu0 %638 }
 0x19f   : > { %v649_v21 = vsel %vm646_vm1, %v621_v7, %v639_v19 }
 0x1a0   : > { %v645_v20 = vpop.permute.xlu1 %644 }
 0x1a2   : > { %v642_v22 = vpop.permute.xlu0 %641 }
 0x1a3   : > { %v652_v23 = vsel %vm650_vm2, %v649_v21, %v642_v22 }
 0x1a4   : > { %v655_v24 = vsel %vm653_vm3, %v652_v23, %v645_v20 }
 0x1a5   : > { %4269 = vmatpush3.bf16.msra.mxu0 %v655_v24 }
 0x1a6   : > { %4282 = vmatprep.subr.bf16.mxu0 %v5388_v5 }
 0x1a8   : > { %4271 = vmatmul.mubr.msk.bf16.vlgmr.msra.gmra.mrb[0].mxu0 %vm705_vm4, %v5795_v25 }
 0x1a9   : > { %4274 = vmatprep.mubr.msk.bf16.mxu0 %vm5389_vm0, %v5388_v5 }
 0x1b0   : > { %4275 = vmatmul.mubr.msk.bf16.gmra.mrb[4].mxu0 %vm705_vm4, %v5805_v26 }
 0x1b1   : > { %4278 = vmatprep.mubr.msk.bf16.mxu0 %vm5389_vm0, %v5388_v5  ;;  %v5820_v28 = vpop.permute.xlu1 %669 }
 0x1b3   : > { %v5822_v30 = vpop.permute.xlu0 %674 }
 0x1b5   : > { %v5831_v37 = vpop.permute.xlu1 %679 }
 0x1b7   : > { %v5844_v52 = vpop.permute.xlu0 %689 }
 0x1b8   : > { %4279 = vmatmul.mubr.msk.bf16.gmra.mrb[8].mxu0 %vm705_vm4, %v5814_v27 }
 0x1b9   : > { %4290 = vmatprep.mubr.msk.bf16.mxu0 %vm5389_vm0, %v5388_v5  ;;  %v5837_v44 = vpop.permute.xlu1 %684 }
 0x27b   : > { %v749_v29 = vpop.f32.mrb[0].mxu0 }
 0x27c   : > { %v5825_v31 = vadd.f32 %v749_v29, %v5820_v28  ;;  %v4272_v32 = vpop.f32.mrb[1].mxu0 }
 0x27d   : > { %v752_v33 = vpop.f32.mrb[2].mxu0 }
 0x27e   : > { %v771_v34 = vmin.f32 %v5825_v31, 20.0  ;;  %v5829_v35 = vadd.f32 %v752_v33, %v5822_v30  ;;  %v4273_v36 = vpop.f32.mrb[3].mxu0  ;;  %vm816_vm5 = vcmp.gt.f32.partialorder %v5825_v31, 20.0 }
 0x280   : > { %v776_v38 = vmul.f32 1.442695, %v771_v34  ;;  %v772_v39 = vmin.f32 %v5829_v35, 20.0  ;;  %vm817_vm6 = vcmp.gt.f32.partialorder %v5829_v35, 20.0 }
 0x282   : > { %4814 = vpow2.f32 %v776_v38  ;;  %v778_v40 = vmul.f32 1.442695, %v772_v39 }
 0x283   : > { %v757_v41 = vpop.f32.mrb[4].mxu0 }
 0x284   : > { %4816 = vpow2.f32 %v778_v40  ;;  %v5835_v42 = vadd.f32 %v757_v41, %v5831_v37  ;;  %v4276_v43 = vpop.f32.mrb[5].mxu0 }
 0x285   : > { %v760_v45 = vpop.f32.mrb[6].mxu0 }
 0x286   : > { %v773_v46 = vmin.f32 %v5835_v42, 20.0  ;;  %v5841_v47 = vadd.f32 %v760_v45, %v5837_v44  ;;  %v4277_v48 = vpop.f32.mrb[7].mxu0  ;;  %vm818_vm7 = vcmp.gt.f32.partialorder %v5835_v42, 20.0 }
 0x288   : > { %v780_v49 = vmul.f32 1.442695, %v773_v46  ;;  %v774_v50 = vmin.f32 %v5841_v47, 20.0  ;;  %vm819_vm8 = vcmp.gt.f32.partialorder %v5841_v47, 20.0 }
 0x28a   : > { %4818 = vpow2.f32 %v780_v49  ;;  %v782_v51 = vmul.f32 1.442695, %v774_v50 }
 0x28b   : > { %v765_v53 = vpop.f32.mrb[8].mxu0 }
 0x28c   : > { %v4815_v54 = vpop.eup %4814  ;;  %4820 = vpow2.f32 %v782_v51  ;;  %v5847_v55 = vadd.f32 %v765_v53, %v5844_v52  ;;  %v4280_v56 = vpop.f32.mrb[9].mxu0 }
 0x28d   : > { %v786_v57 = vadd.f32 2.0, %v4815_v54  ;;  %v768_v58 = vpop.f32.mrb[10].mxu0 }
 0x28e   : > { %v4817_v59 = vpop.eup %4816  ;;  %v775_v60 = vmin.f32 %v5847_v55, 20.0  ;;  %v4281_v61 = vpop.f32.mrb[11].mxu0  ;;  %vm820_vm9 = vcmp.gt.f32.partialorder %v5847_v55, 20.0  ;;  %v5876_v58 = vld [vmem:[#allocation4 + $0x4] ss:$8 sps:$4 sm:$0xff]  }
 0x28f   : > { %v791_v62 = vmul.f32 %v4815_v54, %v786_v57  ;;  %v787_v63 = vadd.f32 2.0, %v4817_v59  ;;  %v875_v57 = vld [vmem:[#allocation6] sm:$0xff]  ;;  %4116 = vmatprep.mubr.msk.bf16.mxu1 %vm929_vm10, %v5876_v58  ;;  %v878_v61 = vld [vmem:[#allocation6 + $0x18] sm:$0xff] }
 0x290   : > { %v784_v0 = vmul.f32 1.442695, %v775_v60  ;;  %v879_v60 = vld [vmem:[#allocation6 + $0x20] sm:$0xff] }
 0x291   : > { %v801_v1 = vadd.f32 2.0, %v791_v62  ;;  %v792_v2 = vmul.f32 %v4817_v59, %v787_v63  ;;  %v796_v17 = vmul.f32 %v791_v62, %v5825_v31  ;;  %v876_v59 = vld [vmem:[#allocation6 + $0x8] sm:$0xff] }
 0x292   : > { %4822 = vpow2.f32 %v784_v0 }
 0x293   : > { %4824 = vrcp.f32 %v801_v1  ;;  %v802_v4 = vadd.f32 2.0, %v792_v2  ;;  %v797_v20 = vmul.f32 %v792_v2, %v5829_v35 }
 0x294   : > { %v4819_v7 = vpop.eup %4818 }
 0x295   : > { %4826 = vrcp.f32 %v802_v4  ;;  %v788_v8 = vadd.f32 2.0, %v4819_v7 }
 0x296   : > { %v4821_v9 = vpop.eup %4820 }
 0x297   : > { %v793_v10 = vmul.f32 %v4819_v7, %v788_v8  ;;  %v789_v11 = vadd.f32 2.0, %v4821_v9 }
 0x299   : > { %v803_v12 = vadd.f32 2.0, %v793_v10  ;;  %v794_v13 = vmul.f32 %v4821_v9, %v789_v11  ;;  %v798_v36 = vmul.f32 %v793_v10, %v5835_v42 }
 0x29b   : > { %4828 = vrcp.f32 %v803_v12  ;;  %v804_v14 = vadd.f32 2.0, %v794_v13  ;;  %v799_v40 = vmul.f32 %v794_v13, %v5841_v47  ;;  %v5891_v12 = vld [vmem:[#allocation4] ss:$8 sps:$4 sm:$0xff]   ;;  %v5893_v13 = vld [vmem:[#allocation4 + $0x14] ss:$8 sps:$4 sm:$0xff]  }
 0x29c   : > { %v4823_v16 = vpop.eup %4822 }
 0x29d   : > { %v4825_v18 = vpop.eup %4824  ;;  %4830 = vrcp.f32 %v804_v14  ;;  %v790_v19 = vadd.f32 2.0, %v4823_v16  ;;  %v874_v14 = vld [vmem:[#allocation4 + $0x20] sm:$0xff] }
 0x29e   : > { %v811_v21 = vmul.f32 %v4825_v18, %v796_v17  ;;  %v5901_v17 = vcombine.high %v874_v14, %v874_v14  ;;  %v5906_v18 = vcombine.low %v874_v14, %v874_v14 }
 0x29f   : > { %v4827_v22 = vpop.eup %4826  ;;  %v795_v23 = vmul.f32 %v4823_v16, %v790_v19  ;;  %v5899_v16 = vld [vmem:[#allocation4 + $0x10] ss:$8 sps:$4 sm:$0xff]  }
 0x2a0   : > { %v812_v24 = vmul.f32 %v4827_v22, %v797_v20  ;;  %v821_v32 = vsel %vm816_vm5, %v5825_v31, %v811_v21  ;;  %v5911_v19 = vld [vmem:[#allocation7] sm:$0xff]   ;;  %v5915_v20 = vld [vmem:[#allocation7 + $0x8] sm:$0xff]   ;;  %v5919_v21 = vld [vmem:[#allocation7 + $0x10] sm:$0xff]  }
 0x2a1   : > { %v805_v29 = vadd.f32 2.0, %v795_v23  ;;  %v800_v48 = vmul.f32 %v795_v23, %v5847_v55  ;;  %4283 = vmatpush3.bf16.msra.mxu0 %v5911_v19  ;;  %v4772_v23 = vld [vmem:[#allocation7 + $0x18] ss:$0 sps:$4 sm:$0x33]  }
 0x2a2   : > { %v822_v33 = vsel %vm817_vm6, %v5829_v35, %v812_v24  ;;  %4284 = vmatprep.subr.bf16.mxu0 %v5388_v5  ;;  %v5394_v24 = vmov 65535  }
 0x2a3   : > { %4832 = vrcp.f32 %v805_v29  ;;  %v826_v34 = vpack.c.bf16 %v822_v33, %v821_v32  ;;  %v1122_v29 = vsel %vm1121_vm11, 4294967295, %v5394_v24 }
 0x2a5   : > { %v4829_v38 = vpop.eup %4828  ;;  %940 = vmatpush1.bf16.msra.mxu1 %v826_v34  ;;  %v833_v39 = vrot.slane %v826_v34, 4  ;;  %4285 = vmatpush3.bf16.msra.mxu0 %v5915_v20 }
 0x2a6   : > { %941 = vmatprep.subr.bf16.mxu1 %v5393_v15  ;;  %v813_v41 = vmul.f32 %v4829_v38, %v798_v36  ;;  %4286 = vmatprep.subr.bf16.mxu0 %v5388_v5 }
 0x2a7   : > { %v4831_v43 = vpop.eup %4830  ;;  %838 = vrot.lane.b32.xlu1 %v833_v39, %s5390_s8 }
 0x2a8   : > { %v814_v45 = vmul.f32 %v4831_v43, %v799_v40  ;;  %v823_v31 = vsel %vm818_vm7, %v5835_v42, %v813_v41 }
 0x2a9   : > { %4287 = vmatpush3.bf16.msra.mxu0 %v5919_v21 }
 0x2aa   : > { %v824_v35 = vsel %vm819_vm8, %v5841_v47, %v814_v45  ;;  %4288 = vmatprep.subr.bf16.mxu0 %v5388_v5 }
 0x2ab   : > { %v827_v46 = vpack.c.bf16 %v824_v35, %v823_v31 }
 0x2ad   : > { %v4833_v49 = vpop.eup %4832  ;;  %942 = vmatpush1.bf16.msra.mxu1 %v827_v46  ;;  %v834_v50 = vrot.slane %v827_v46, 4 }
 0x2ae   : > { %v815_v51 = vmul.f32 %v4833_v49, %v800_v48  ;;  %943 = vmatprep.subr.bf16.mxu1 %v5393_v15 }
 0x2af   : > { %v835_v53 = vsel %vm650_vm2, %v833_v39, %v834_v50 }
 0x2b0   : > { %v825_v54 = vsel %vm820_vm9, %v5847_v55, %v815_v51  ;;  %840 = vrot.lane.b32.xlu0 %v835_v53, %s5390_s8  ;;  %v877_v55 = vld [vmem:[#allocation6 + $0x10] sm:$0xff] }
 0x2b1   : > { %v828_v42 = vpack.c.bf16 %v825_v54, %v825_v54 }
 0x2b3   : > { %v836_v56 = vrot.slane %v828_v42, 4 }
 0x2b4   : > { %846 = vrot.lane.b32.xlu0 %v826_v34, %s5392_s25  ;;  %v1123_v34 = vsel %vm646_vm1, %v1122_v29, 0 }
 0x2b5   : > { %v837_v47 = vsel %vm650_vm2, %v834_v50, %v836_v56 }
 0x2b6   : > { %842 = vrot.lane.b32.xlu1 %v837_v47, %s5390_s8 }
 0x2b8   : > { %850 = vrot.lane.b32.xlu0 %v828_v42, %s5392_s25 }
 0x2ba   : > { %848 = vrot.lane.b32.xlu1 %v827_v46, %s5392_s25 }
 0x2bc   : > { %856 = vrot.lane.b32.xlu0 %v835_v53, %s5391_s27 }
 0x2be   : > { %854 = vrot.lane.b32.xlu1 %v833_v39, %s5391_s27  ;;  %v5930_v39 = vand.u32 %v4772_v23, %v1123_v34 }
 0x2c0   : > { %882 = vperm.xlu0 %4595, %v875_v57   ;;  %4289 = vmatpush3.bf16.msra.mxu0 %v5930_v39 }
 0x2c1   : > { %4302 = vmatprep.subr.bf16.mxu0 %v5388_v5 }
 0x2c2   : > { %858 = vrot.lane.b32.xlu1 %v837_v47, %s5391_s27 }
 0x2c4   : > { %892 = vperm.xlu0 %4595, %v877_v55  }
 0x2c6   : > { %887 = vperm.xlu1 %4594, %v876_v59   ;;  %v5953_v59 = vld [vmem:[%s5773_s23 + $0x2] sm:$0x3] }
 0x2c8   : > { %902 = vperm.xlu0 %4595, %v879_v60  }
 0x2ca   : > { %897 = vperm.xlu1 %4594, %v878_v61   ;;  %v1241_v61 = vcombine.low %v5953_v59, %v5953_v59 }
 0x319   : > { %v839_v62 = vpop.permute.xlu1 %838 }
 0x31a   : > { %v864_v63 = vsel %vm650_vm2, %v828_v42, %v839_v62  ;;  %v1255_v62 = vrot.slane %v5953_v59, %v5776_v6 }
 0x31b   : > { %944 = vmatpush1.bf16.msra.mxu1 %v864_v63  ;;  %v1248_v63 = vrot.slane %v1241_v61, %v5776_v6 }
 0x31c   : > { %945 = vmatprep.subr.bf16.mxu1 %v5393_v15 }
 0x322   : > { %v841_v0 = vpop.permute.xlu0 %840 }
 0x323   : > { %946 = vmatpush1.bf16.msra.mxu1 %v841_v0  ;;  %v1258_v0 = vcombine.low %v1255_v62, %v1255_v62 }
 0x324   : > { %947 = vmatprep.subr.bf16.mxu1 %v5393_v15 }
 0x326   : > { %v847_v2 = vpop.permute.xlu0 %846 }
 0x328   : > { %v843_v1 = vpop.permute.xlu1 %842 }
 0x329   : > { %948 = vmatpush1.bf16.msra.mxu1 %v843_v1  ;;  %v1261_v1 = vcombine.low %v1248_v63, %v1248_v63 }
 0x32a   : > { %949 = vmatprep.subr.bf16.mxu1 %v5393_v15  ;;  %v851_v8 = vpop.permute.xlu0 %850 }
 0x32c   : > { %v849_v4 = vpop.permute.xlu1 %848 }
 0x32d   : > { %950 = vmatpush1.bf16.msra.mxu1 %v847_v2 }
 0x32e   : > { %951 = vmatprep.subr.bf16.mxu1 %v5393_v15  ;;  %v857_v10 = vpop.permute.xlu0 %856 }
 0x330   : > { %v855_v7 = vpop.permute.xlu1 %854 }
 0x331   : > { %952 = vmatpush1.bf16.msra.mxu1 %v849_v4  ;;  %v868_v9 = vsel %vm650_vm2, %v851_v8, %v855_v7 }
 0x332   : > { %953 = vmatprep.subr.bf16.mxu1 %v5393_v15 }
 0x334   : > { %v859_v11 = vpop.permute.xlu1 %858 }
 0x335   : > { %954 = vmatpush1.bf16.msra.mxu1 %v868_v9 }
 0x336   : > { %955 = vmatprep.subr.bf16.mxu1 %v5393_v15 }
 0x339   : > { %956 = vmatpush1.bf16.msra.mxu1 %v857_v10 }
 0x33a   : > { %957 = vmatprep.subr.bf16.mxu1 %v5393_v15 }
 0x33d   : > { %958 = vmatpush1.bf16.msra.mxu1 %v859_v11 }
 0x33e   : > { %1426 = vmatprep.subr.bf16.mxu1 %v5393_v15 }
 0x33f   : > { %v5924_v32 = vpop.permute.xlu0 %882 }
 0x340   : > { %972 = vmatmul.mubr.bf16.vlgmr.msra.gmra.mrb[0].mxu1 %v5891_v12 }
 0x341   : > { %4117 = vmatprep.mubr.msk.bf16.mxu1 %vm929_vm10, %v5893_v13 }
 0x343   : > { %v5938_v35 = vpop.permute.xlu0 %892 }
 0x345   : > { %v5928_v36 = vpop.permute.xlu1 %887 }
 0x347   : > { %v5950_v55 = vpop.permute.xlu0 %902 }
 0x348   : > { %980 = vmatmul.mubr.bf16.gmra.mrb[4].mxu1 %v5899_v16 }
 0x349   : > { %4118 = vmatprep.mubr.msk.bf16.mxu1 %vm929_vm10, %v5901_v17  ;;  %v5940_v48 = vpop.permute.xlu1 %897 }
 0x350   : > { %988 = vmatmul.mubr.bf16.gmra.mrb[8].mxu1 %v5906_v18 }
 0x351   : > { %4130 = vmatprep.mubr.msk.bf16.mxu1 %vm929_vm10, %v5876_v58 }
 0x413   : > { %v973_v22 = vpop.f32.mrb[0].mxu1 }
 0x414   : > { %v975_v33 = vpop.f32.mrb[1].mxu1  ;;  %v974_v40 = vadd.f32 %v973_v22, %v5924_v32 }
 0x415   : > { %v976_v38 = vpop.f32.mrb[2].mxu1 }
 0x416   : > { %v977_v41 = vadd.f32 %v976_v38, %v5928_v36  ;;  %v978_v43 = vpop.f32.mrb[3].mxu1 }
 0x418   : > { %v4601_v45 = vpack.i.bf16 %v977_v41, %v974_v40 }
 0x41a   : > { %4602 = vrot.lane.b32.xlu0 %v4601_v45, %s5392_s25  ;;  %4597 = vrot.lane.b32.xlu1 %v4601_v45, %s5390_s8 }
 0x41b   : > { %v981_v31 = vpop.f32.mrb[4].mxu1 }
 0x41c   : > { %v983_v46 = vpop.f32.mrb[5].mxu1  ;;  %v982_v50 = vadd.f32 %v981_v31, %v5938_v35 }
 0x41d   : > { %v984_v49 = vpop.f32.mrb[6].mxu1 }
 0x41e   : > { %v985_v51 = vadd.f32 %v984_v49, %v5940_v48  ;;  %v986_v53 = vpop.f32.mrb[7].mxu1  ;;  %4612 = vrot.lane.b32.xlu0 %v4601_v45, %s5395_s17  ;;  %4607 = vrot.lane.b32.xlu1 %v4601_v45, %s5391_s27 }
 0x420   : > { %v4621_v54 = vpack.i.bf16 %v985_v51, %v982_v50 }
 0x422   : > { %4622 = vrot.lane.b32.xlu0 %v4621_v54, %s5392_s25  ;;  %4617 = vrot.lane.b32.xlu1 %v4621_v54, %s5390_s8 }
 0x423   : > { %v989_v42 = vpop.f32.mrb[8].mxu1 }
 0x424   : > { %v991_v56 = vpop.f32.mrb[9].mxu1  ;;  %v990_v60 = vadd.f32 %v989_v42, %v5950_v55 }
 0x425   : > { %v992_v47 = vpop.f32.mrb[10].mxu1 }
 0x426   : > { %4632 = vrot.lane.b32.xlu0 %v4621_v54, %s5395_s17  ;;  %4627 = vrot.lane.b32.xlu1 %v4621_v54, %s5391_s27  ;;  %v993_v57 = vpop.f32.mrb[11].mxu1 }
 0x42a   : > { %1028 = vrot.lane.b32.xlu0 %v990_v60, %s5392_s25  ;;  %1008 = vrot.lane.b32.xlu1 %v990_v60, %s5390_s8 }
 0x42e   : > { %1068 = vrot.lane.b32.xlu0 %v990_v60, %s5395_s17  ;;  %1048 = vrot.lane.b32.xlu1 %v990_v60, %s5391_s27 }
 0x432   : > { %1256 = vrot.lane.b32.xlu1 %v1248_v63, %s5390_s8  ;;  %1259 = vrot.lane.b32.xlu0 %v1258_v0, %s5392_s25 }
 0x436   : > { %1262 = vrot.lane.b32.xlu1 %v1261_v1, %s5391_s27 }
 0x48c   : > { %v4603_v2 = vpop.permute.xlu0 %4602  ;;  %v4598_v4 = vpop.permute.xlu1 %4597 }
 0x48d   : > { %v4600_v7 = vunpack.i.h.bf16 %v4598_v4  ;;  %v4599_v8 = vunpack.i.l.bf16 %v4598_v4  ;;  %v4605_v11 = vunpack.i.h.bf16 %v4603_v2  ;;  %v4604_v14 = vunpack.i.l.bf16 %v4603_v2 }
 0x48f   : > { %v1016_v9 = vmax.f32 %v977_v41, %v4600_v7  ;;  %v1015_v10 = vmax.f32 %v974_v40, %v4599_v8 }
 0x490   : > { %v4613_v22 = vpop.permute.xlu0 %4612  ;;  %v4608_v23 = vpop.permute.xlu1 %4607 }
 0x491   : > { %v4610_v29 = vunpack.i.h.bf16 %v4608_v23  ;;  %v4609_v33 = vunpack.i.l.bf16 %v4608_v23  ;;  %v1035_v34 = vmax.f32 %v1015_v10, %v4604_v14  ;;  %v1036_v38 = vmax.f32 %v1016_v9, %v4605_v11 }
 0x492   : > { %v4615_v43 = vunpack.i.h.bf16 %v4613_v22  ;;  %v4614_v45 = vunpack.i.l.bf16 %v4613_v22 }
 0x493   : > { %v1055_v31 = vmax.f32 %v1035_v34, %v4609_v33  ;;  %v1056_v46 = vmax.f32 %v1036_v38, %v4610_v29 }
 0x494   : > { %v4623_v49 = vpop.permute.xlu0 %4622  ;;  %v4618_v53 = vpop.permute.xlu1 %4617 }
 0x495   : > { %v4620_v54 = vunpack.i.h.bf16 %v4618_v53  ;;  %v4619_v42 = vunpack.i.l.bf16 %v4618_v53  ;;  %v1075_v56 = vmax.f32 %v1055_v31, %v4614_v45  ;;  %v1076_v47 = vmax.f32 %v1056_v46, %v4615_v43 }
 0x496   : > { %v4625_v61 = vunpack.i.h.bf16 %v4623_v49  ;;  %v4624_v62 = vunpack.i.l.bf16 %v4623_v49 }
 0x497   : > { %v1018_v41 = vmax.f32 %v985_v51, %v4620_v54  ;;  %v1017_v40 = vmax.f32 %v982_v50, %v4619_v42  ;;  %v1080_v57 = vpack.c.bf16 %v1076_v47, %v1075_v56 }
 0x498   : > { %v4633_v63 = vpop.permute.xlu0 %4632  ;;  %v4628_v0 = vpop.permute.xlu1 %4627 }
 0x499   : > { %v4630_v1 = vunpack.i.h.bf16 %v4628_v0  ;;  %v4629_v2 = vunpack.i.l.bf16 %v4628_v0  ;;  %v1037_v4 = vmax.f32 %v1017_v40, %v4624_v62  ;;  %v1038_v7 = vmax.f32 %v1018_v41, %v4625_v61  ;;  %4291 = vmatmul.mubr.msk.bf16.vlgmr.msra.gmra.mrb[12].mxu0 %vm1111_vm12, %v1080_v57 }
 0x49a   : > { %4294 = vmatprep.mubr.msk.bf16.mxu0 %vm5389_vm0, %v5388_v5  ;;  %v4635_v8 = vunpack.i.h.bf16 %v4633_v63  ;;  %v4634_v9 = vunpack.i.l.bf16 %v4633_v63 }
 0x49b   : > { %v1057_v10 = vmax.f32 %v1037_v4, %v4629_v2  ;;  %v1058_v51 = vmax.f32 %v1038_v7, %v4630_v1 }
 0x49c   : > { %v1029_v50 = vpop.permute.xlu0 %1028  ;;  %v1009_v11 = vpop.permute.xlu1 %1008 }
 0x49d   : > { %v1019_v14 = vmax.f32 %v990_v60, %v1009_v11  ;;  %v1077_v22 = vmax.f32 %v1057_v10, %v4634_v9  ;;  %v1078_v23 = vmax.f32 %v1058_v51, %v4635_v8 }
 0x49f   : > { %v1039_v29 = vmax.f32 %v1019_v14, %v1029_v50  ;;  %v1081_v38 = vpack.c.bf16 %v1078_v23, %v1077_v22 }
 0x4a0   : > { %v1069_v33 = vpop.permute.xlu0 %1068  ;;  %v1049_v34 = vpop.permute.xlu1 %1048 }
 0x4a1   : > { %v1059_v43 = vmax.f32 %v1039_v29, %v1049_v34  ;;  %4295 = vmatmul.mubr.msk.bf16.gmra.mrb[16].mxu0 %vm1111_vm12, %v1081_v38 }
 0x4a2   : > { %4298 = vmatprep.mubr.msk.bf16.mxu0 %vm5389_vm0, %v5388_v5 }
 0x4a3   : > { %v1079_v45 = vmax.f32 %v1059_v43, %v1069_v33 }
 0x4a4   : > { %v1257_v31 = vpop.permute.xlu1 %1256  ;;  %v1260_v46 = vpop.permute.xlu0 %1259 }
 0x4a5   : > { %v1266_v49 = vsel %vm646_vm1, %v5953_v59, %v1257_v31  ;;  %v1082_v53 = vpack.c.bf16 %v1079_v45, %v1079_v45 }
 0x4a6   : > { %v1268_v60 = vsel %vm650_vm2, %v1266_v49, %v1260_v46 }
 0x4a8   : > { %v1263_v54 = vpop.permute.xlu1 %1262 }
 0x4a9   : > { %v1270_v42 = vsel %vm653_vm3, %v1268_v60, %v1263_v54  ;;  %4299 = vmatmul.mubr.msk.bf16.gmra.mrb[20].mxu0 %vm1111_vm12, %v1082_v53 }
 0x4aa   : > { %4303 = vmatpush3.bf16.msra.mxu0 %v1270_v42  ;;  %4304 = vmatprep.mubr.msk.bf16.mxu0 %vm5389_vm0, %v5388_v5 }
 0x4ab   : > { %4316 = vmatprep.subr.bf16.mxu0 %v5388_v5 }
 0x4b1   : > { %4305 = vmatmul.mubr.msk.bf16.vlgmr.msra.gmra.mrb[24].mxu0 %vm705_vm4, %v5795_v25 }
 0x4b2   : > { %4308 = vmatprep.mubr.msk.bf16.mxu0 %vm5389_vm0, %v5388_v5  ;;  %4317 = vmatpush3.bf16.msra.mxu0 %v5911_v19 }
 0x4b3   : > { %4318 = vmatprep.subr.bf16.mxu0 %v5388_v5 }
 0x4b6   : > { %4319 = vmatpush3.bf16.msra.mxu0 %v5915_v20 }
 0x4b7   : > { %4320 = vmatprep.subr.bf16.mxu0 %v5388_v5 }
 0x4b9   : > { %4309 = vmatmul.mubr.msk.bf16.gmra.mrb[28].mxu0 %vm705_vm4, %v5805_v26 }
 0x4ba   : > { %4312 = vmatprep.mubr.msk.bf16.mxu0 %vm5389_vm0, %v5388_v5  ;;  %4321 = vmatpush3.bf16.msra.mxu0 %v5919_v21 }
 0x4bb   : > { %4322 = vmatprep.subr.bf16.mxu0 %v5388_v5 }
 0x4be   : > { %4323 = vmatpush3.bf16.msra.mxu0 %v5930_v39 }
 0x4bf   : > { %4336 = vmatprep.subr.bf16.mxu0 %v5388_v5 }
 0x4c1   : > { %4313 = vmatmul.mubr.msk.bf16.gmra.mrb[32].mxu0 %vm705_vm4, %v5814_v27 }
 0x4c2   : > { %4324 = vmatprep.mubr.msk.bf16.mxu0 %vm5389_vm0, %v5388_v5 }
 0x56c   : > { %v6002_v25 = vpop.f32.mrb[12].mxu0 }
 0x56d   : > { %v1183_v26 = vmin.f32 %v6002_v25, 20.0  ;;  %v4292_v59 = vpop.f32.mrb[13].mxu0  ;;  %vm1228_vm13 = vcmp.gt.f32.partialorder %v6002_v25, 20.0 }
 0x56e   : > { %v6005_v56 = vpop.f32.mrb[14].mxu0 }
 0x56f   : > { %v1188_v47 = vmul.f32 1.442695, %v1183_v26  ;;  %v1184_v41 = vmin.f32 %v6005_v56, 20.0  ;;  %v4293_v40 = vpop.f32.mrb[15].mxu0  ;;  %vm1229_vm14 = vcmp.gt.f32.partialorder %v6005_v56, 20.0 }
 0x571   : > { %4834 = vpow2.f32 %v1188_v47  ;;  %v1190_v57 = vmul.f32 1.442695, %v1184_v41 }
 0x573   : > { %4836 = vpow2.f32 %v1190_v57 }
 0x574   : > { %v6008_v61 = vpop.f32.mrb[16].mxu0 }
 0x575   : > { %v1185_v27 = vmin.f32 %v6008_v61, 20.0  ;;  %v4296_v62 = vpop.f32.mrb[17].mxu0  ;;  %vm1230_vm5 = vcmp.gt.f32.partialorder %v6008_v61, 20.0 }
 0x576   : > { %v6011_v63 = vpop.f32.mrb[18].mxu0 }
 0x577   : > { %v1192_v0 = vmul.f32 1.442695, %v1185_v27  ;;  %v1186_v1 = vmin.f32 %v6011_v63, 20.0  ;;  %v4297_v2 = vpop.f32.mrb[19].mxu0  ;;  %vm1231_vm6 = vcmp.gt.f32.partialorder %v6011_v63, 20.0 }
 0x579   : > { %4838 = vpow2.f32 %v1192_v0  ;;  %v1194_v4 = vmul.f32 1.442695, %v1186_v1 }
 0x57b   : > { %v4835_v7 = vpop.eup %4834  ;;  %4840 = vpow2.f32 %v1194_v4 }
 0x57c   : > { %v1198_v8 = vadd.f32 2.0, %v4835_v7  ;;  %v6014_v9 = vpop.f32.mrb[20].mxu0 }
 0x57d   : > { %v4837_v10 = vpop.eup %4836  ;;  %v1187_v51 = vmin.f32 %v6014_v9, 20.0  ;;  %v4300_v50 = vpop.f32.mrb[21].mxu0  ;;  %vm1232_vm7 = vcmp.gt.f32.partialorder %v6014_v9, 20.0 }
 0x57e   : > { %v1203_v11 = vmul.f32 %v4835_v7, %v1198_v8  ;;  %v1199_v14 = vadd.f32 2.0, %v4837_v10  ;;  %v1180_v22 = vpop.f32.mrb[22].mxu0 }
 0x57f   : > { %v1196_v23 = vmul.f32 1.442695, %v1187_v51  ;;  %v4301_v29 = vpop.f32.mrb[23].mxu0 }
 0x580   : > { %v1213_v33 = vadd.f32 2.0, %v1203_v11  ;;  %v1204_v34 = vmul.f32 %v4837_v10, %v1199_v14  ;;  %v1208_v1 = vmul.f32 %v1203_v11, %v6002_v25 }
 0x581   : > { %4842 = vpow2.f32 %v1196_v23 }
 0x582   : > { %4844 = vrcp.f32 %v1213_v33  ;;  %v1214_v38 = vadd.f32 2.0, %v1204_v34  ;;  %v1209_v51 = vmul.f32 %v1204_v34, %v6005_v56 }
 0x583   : > { %v4839_v43 = vpop.eup %4838 }
 0x584   : > { %4846 = vrcp.f32 %v1214_v38  ;;  %v1200_v45 = vadd.f32 2.0, %v4839_v43  ;;  %v1306_v31 = vpop.f32.mrb[24].mxu0 }
 0x585   : > { %v4841_v46 = vpop.eup %4840  ;;  %v6018_v49 = vadd.f32 %v1306_v31, %v5820_v28  ;;  %v4306_v60 = vpop.f32.mrb[25].mxu0 }
 0x586   : > { %v1205_v53 = vmul.f32 %v4839_v43, %v1200_v45  ;;  %v1201_v54 = vadd.f32 2.0, %v4841_v46  ;;  %v1309_v42 = vpop.f32.mrb[26].mxu0 }
 0x587   : > { %v1328_v26 = vmin.f32 %v6018_v49, 20.0  ;;  %v6022_v59 = vadd.f32 %v1309_v42, %v5822_v30  ;;  %v4307_v47 = vpop.f32.mrb[27].mxu0  ;;  %vm1373_vm8 = vcmp.gt.f32.partialorder %v6018_v49, 20.0 }
 0x588   : > { %v1215_v41 = vadd.f32 2.0, %v1205_v53  ;;  %v1206_v40 = vmul.f32 %v4841_v46, %v1201_v54  ;;  %v1210_v54 = vmul.f32 %v1205_v53, %v6008_v61 }
 0x589   : > { %v1333_v57 = vmul.f32 1.442695, %v1328_v26  ;;  %v1329_v27 = vmin.f32 %v6022_v59, 20.0  ;;  %vm1374_vm9 = vcmp.gt.f32.partialorder %v6022_v59, 20.0 }
 0x58a   : > { %4848 = vrcp.f32 %v1215_v41  ;;  %v1216_v62 = vadd.f32 2.0, %v1206_v40 }
 0x58b   : > { %v4843_v0 = vpop.eup %4842  ;;  %4850 = vpow2.f32 %v1333_v57  ;;  %v1335_v2 = vmul.f32 1.442695, %v1329_v27  ;;  %v1211_v27 = vmul.f32 %v1206_v40, %v6011_v63 }
 0x58c   : > { %v4845_v4 = vpop.eup %4844  ;;  %4852 = vrcp.f32 %v1216_v62  ;;  %v1202_v7 = vadd.f32 2.0, %v4843_v0  ;;  %v1314_v8 = vpop.f32.mrb[28].mxu0 }
 0x58d   : > { %v1223_v10 = vmul.f32 %v4845_v4, %v1208_v1  ;;  %4854 = vpow2.f32 %v1335_v2  ;;  %v6028_v50 = vadd.f32 %v1314_v8, %v5831_v37  ;;  %v4310_v14 = vpop.f32.mrb[29].mxu0 }
 0x58e   : > { %v4847_v22 = vpop.eup %4846  ;;  %v1207_v23 = vmul.f32 %v4843_v0, %v1202_v7  ;;  %v1317_v29 = vpop.f32.mrb[30].mxu0 }
 0x58f   : > { %v6032_v11 = vsel %vm1228_vm13, %v6002_v25, %v1223_v10  ;;  %v1224_v33 = vmul.f32 %v4847_v22, %v1209_v51  ;;  %v1330_v38 = vmin.f32 %v6028_v50, 20.0  ;;  %v4311_v43 = vpop.f32.mrb[31].mxu0  ;;  %v6037_v45 = vadd.f32 %v1317_v29, %v5837_v44 }
 0x590   : > { %v1217_v34 = vadd.f32 2.0, %v1207_v23  ;;  %v2615_v60 = vrot.slane %v6032_v11, 5  ;;  %vm1375_vm13 = vcmp.gt.f32.partialorder %v6028_v50, 20.0 }
 0x591   : > { %v6040_v31 = vsel %vm1229_vm14, %v6005_v56, %v1224_v33  ;;  %v1337_v46 = vmul.f32 1.442695, %v1330_v38  ;;  %v1331_v42 = vmin.f32 %v6037_v45, 20.0  ;;  %vm1376_vm14 = vcmp.gt.f32.partialorder %v6037_v45, 20.0 }
 0x592   : > { %v2616_v25 = vrot.slane %v6040_v31, 5  ;;  %4856 = vrcp.f32 %v1217_v34  ;;  %v2876_v14 = vrot.slane %v6040_v31, 7 }
 0x593   : > { %4858 = vpow2.f32 %v1337_v46  ;;  %v1339_v62 = vmul.f32 1.442695, %v1331_v42 }
 0x594   : > { %v4849_v26 = vpop.eup %4848  ;;  %v1322_v47 = vpop.f32.mrb[32].mxu0  ;;  %v6047_v41 = vsel %vm2614_vm15, %v2615_v60, %v2616_v25  ;;  %v1212_v60 = vmul.f32 %v1207_v23, %v6014_v9 }
 0x595   : > { %v4851_v57 = vpop.eup %4850  ;;  %v1225_v56 = vmul.f32 %v4849_v26, %v1210_v54  ;;  %v6051_v0 = vadd.f32 %v1322_v47, %v5844_v52  ;;  %v4314_v1 = vpop.f32.mrb[33].mxu0  ;;  %4860 = vpow2.f32 %v1339_v62 }
 0x596   : > { %v4853_v2 = vpop.eup %4852  ;;  %v1343_v53 = vadd.f32 2.0, %v4851_v57  ;;  %v1325_v4 = vpop.f32.mrb[34].mxu0 }
 0x597   : > { %v4855_v7 = vpop.eup %4854  ;;  %v1235_v8 = vsel %vm1230_vm5, %v6008_v61, %v1225_v56  ;;  %v1226_v10 = vmul.f32 %v4853_v2, %v1211_v27  ;;  %v1332_v51 = vmin.f32 %v6051_v0, 20.0  ;;  %v4315_v40 = vpop.f32.mrb[35].mxu0  ;;  %vm1377_vm5 = vcmp.gt.f32.partialorder %v6051_v0, 20.0 }
 0x598   : > { %v2877_v22 = vrot.slane %v1235_v8, 7  ;;  %v1348_v29 = vmul.f32 %v4851_v57, %v1343_v53  ;;  %v1344_v33 = vadd.f32 2.0, %v4855_v7  ;;  %v2977_v46 = vrot.slane %v1235_v8, 4 }
 0x599   : > { %v6059_v38 = vsel %vm1231_vm6, %v6011_v63, %v1226_v10  ;;  %v1341_v43 = vmul.f32 1.442695, %v1332_v51  ;;  %vm2603_vm6 = vcmask 1044480  }
 0x59a   : > { %v6062_v34 = vsel %vm1121_vm11, %v2876_v14, %v2877_v22  ;;  %v2978_v61 = vrot.slane %v6059_v38, 4  ;;  %v1358_v25 = vadd.f32 2.0, %v1348_v29  ;;  %v1349_v54 = vmul.f32 %v4855_v7, %v1344_v33 }
 0x59b   : > { %4862 = vpow2.f32 %v1341_v43  ;;  %v3178_v23 = vrot.slane %v6059_v38, 6  ;;  %v1353_v51 = vmul.f32 %v1348_v29, %v6018_v49 }
 0x59c   : > { %v4857_v42 = vpop.eup %4856  ;;  %v6067_v26 = vsel %vm650_vm2, %v2977_v46, %v2978_v61  ;;  %4864 = vrcp.f32 %v1358_v25  ;;  %v1359_v63 = vadd.f32 2.0, %v1349_v54  ;;  %v1354_v33 = vmul.f32 %v1349_v54, %v6022_v59 }
 0x59d   : > { %v4859_v47 = vpop.eup %4858  ;;  %v1227_v57 = vmul.f32 %v4857_v42, %v1212_v60 }
 0x59e   : > { %v1345_v56 = vadd.f32 2.0, %v4859_v47  ;;  %4866 = vrcp.f32 %v1359_v63 }
 0x59f   : > { %v6071_v27 = vsel %vm1232_vm7, %v6014_v9, %v1227_v57  ;;  %v4861_v2 = vpop.eup %4860 }
 0x5a0   : > { %v3179_v62 = vrot.slane %v6071_v27, 6  ;;  %v1350_v1 = vmul.f32 %v4859_v47, %v1345_v56  ;;  %v1346_v7 = vadd.f32 2.0, %v4861_v2 }
 0x5a2   : > { %v6076_v53 = vsel %vm646_vm1, %v3178_v23, %v3179_v62  ;;  %v1360_v4 = vadd.f32 2.0, %v1350_v1  ;;  %v1351_v8 = vmul.f32 %v4861_v2, %v1346_v7  ;;  %v1355_v57 = vmul.f32 %v1350_v1, %v6028_v50 }
 0x5a4   : > { %4868 = vrcp.f32 %v1360_v4  ;;  %v1361_v40 = vadd.f32 2.0, %v1351_v8  ;;  %v1356_v56 = vmul.f32 %v1351_v8, %v6037_v45 }
 0x5a5   : > { %v4863_v10 = vpop.eup %4862 }
 0x5a6   : > { %v1347_v9 = vadd.f32 2.0, %v4863_v10  ;;  %v4865_v14 = vpop.eup %4864  ;;  %4870 = vrcp.f32 %v1361_v40 }
 0x5a7   : > { %v1368_v22 = vmul.f32 %v4865_v14, %v1353_v51 }
 0x5a8   : > { %v1352_v43 = vmul.f32 %v4863_v10, %v1347_v9  ;;  %v4867_v46 = vpop.eup %4866 }
 0x5a9   : > { %v1369_v61 = vmul.f32 %v4867_v46, %v1354_v33  ;;  %v1378_v25 = vsel %vm1373_vm8, %v6018_v49, %v1368_v22 }
 0x5aa   : > { %v1362_v60 = vadd.f32 2.0, %v1352_v43  ;;  %v1357_v49 = vmul.f32 %v1352_v43, %v6051_v0 }
 0x5ab   : > { %v1379_v29 = vsel %vm1374_vm9, %v6022_v59, %v1369_v61 }
 0x5ac   : > { %4872 = vrcp.f32 %v1362_v60  ;;  %v1383_v42 = vpack.c.bf16 %v1379_v29, %v1378_v25 }
 0x5ae   : > { %v4869_v47 = vpop.eup %4868  ;;  %1427 = vmatpush1.bf16.msra.mxu1 %v1383_v42  ;;  %v1389_v54 = vrot.slane %v1383_v42, 4 }
 0x5af   : > { %1428 = vmatprep.subr.bf16.mxu1 %v5393_v15  ;;  %v1370_v63 = vmul.f32 %v4869_v47, %v1355_v57 }
 0x5b0   : > { %1394 = vrot.lane.b32.xlu0 %v1389_v54, %s5390_s8  ;;  %v4871_v23 = vpop.eup %4870 }
 0x5b1   : > { %v1371_v62 = vmul.f32 %v4871_v23, %v1356_v56  ;;  %v1380_v59 = vsel %vm1375_vm13, %v6028_v50, %v1370_v63 }
 0x5b3   : > { %v1381_v1 = vsel %vm1376_vm14, %v6037_v45, %v1371_v62 }
 0x5b4   : > { %v1384_v4 = vpack.c.bf16 %v1381_v1, %v1380_v59 }
 0x5b6   : > { %v4873_v2 = vpop.eup %4872  ;;  %1429 = vmatpush1.bf16.msra.mxu1 %v1384_v4  ;;  %v1390_v8 = vrot.slane %v1384_v4, 4 }
 0x5b7   : > { %v1372_v7 = vmul.f32 %v4873_v2, %v1357_v49  ;;  %1430 = vmatprep.subr.bf16.mxu1 %v5393_v15 }
 0x5b8   : > { %v1391_v40 = vsel %vm650_vm2, %v1389_v54, %v1390_v8 }
 0x5b9   : > { %v1382_v10 = vsel %vm1377_vm5, %v6051_v0, %v1372_v7  ;;  %1396 = vrot.lane.b32.xlu1 %v1391_v40, %s5390_s8  ;;  %vm2606_vm5 = vcmask 1046528  }
 0x5ba   : > { %v1385_v51 = vpack.c.bf16 %v1382_v10, %v1382_v10 }
 0x5bc   : > { %v1392_v9 = vrot.slane %v1385_v51, 4 }
 0x5bd   : > { %1402 = vrot.lane.b32.xlu1 %v1383_v42, %s5392_s25 }
 0x5be   : > { %v1393_v50 = vsel %vm650_vm2, %v1390_v8, %v1392_v9  ;;  %v6138_v8 = vld [vmem:[%s5773_s23 + $0x4] sm:$0x3] }
 0x5bf   : > { %1398 = vrot.lane.b32.xlu0 %v1393_v50, %s5390_s8 }
 0x5c1   : > { %1406 = vrot.lane.b32.xlu1 %v1385_v51, %s5392_s25 }
 0x5c3   : > { %1404 = vrot.lane.b32.xlu0 %v1384_v4, %s5392_s25 }
 0x5c5   : > { %1412 = vrot.lane.b32.xlu1 %v1391_v40, %s5391_s27  ;;  %v1707_v40 = vrot.slane %v6138_v8, %v5776_v6 }
 0x5c7   : > { %1410 = vrot.lane.b32.xlu0 %v1389_v54, %s5391_s27 }
 0x5cb   : > { %1414 = vrot.lane.b32.xlu0 %v1393_v50, %s5391_s27  ;;  %v1710_v50 = vcombine.low %v1707_v40, %v1707_v40 }
 0x622   : > { %v1395_v45 = vpop.permute.xlu0 %1394 }
 0x623   : > { %v1420_v0 = vsel %vm650_vm2, %v1385_v51, %v1395_v45  ;;  %v1693_v51 = vcombine.low %v6138_v8, %v6138_v8 }
 0x624   : > { %1431 = vmatpush1.bf16.msra.mxu1 %v1420_v0 }
 0x625   : > { %1432 = vmatprep.subr.bf16.mxu1 %v5393_v15  ;;  %v1700_v9 = vrot.slane %v1693_v51, %v5776_v6 }
 0x627   : > { %v1713_v45 = vcombine.low %v1700_v9, %v1700_v9 }
 0x62b   : > { %v1397_v14 = vpop.permute.xlu1 %1396 }
 0x62c   : > { %1433 = vmatpush1.bf16.msra.mxu1 %v1397_v14 }
 0x62d   : > { %1434 = vmatprep.subr.bf16.mxu1 %v5393_v15 }
 0x62f   : > { %v1403_v33 = vpop.permute.xlu1 %1402 }
 0x631   : > { %v1399_v22 = vpop.permute.xlu0 %1398 }
 0x632   : > { %1435 = vmatpush1.bf16.msra.mxu1 %v1399_v22 }
 0x633   : > { %1436 = vmatprep.subr.bf16.mxu1 %v5393_v15  ;;  %v1407_v61 = vpop.permute.xlu1 %1406 }
 0x635   : > { %v1405_v43 = vpop.permute.xlu0 %1404 }
 0x636   : > { %1437 = vmatpush1.bf16.msra.mxu1 %v1403_v33 }
 0x637   : > { %1438 = vmatprep.subr.bf16.mxu1 %v5393_v15  ;;  %v1413_v25 = vpop.permute.xlu1 %1412 }
 0x639   : > { %v1411_v46 = vpop.permute.xlu0 %1410 }
 0x63a   : > { %1439 = vmatpush1.bf16.msra.mxu1 %v1405_v43  ;;  %v1424_v60 = vsel %vm650_vm2, %v1407_v61, %v1411_v46 }
 0x63b   : > { %1440 = vmatprep.subr.bf16.mxu1 %v5393_v15 }
 0x63d   : > { %v1415_v29 = vpop.permute.xlu0 %1414 }
 0x63e   : > { %1441 = vmatpush1.bf16.msra.mxu1 %v1424_v60 }
 0x63f   : > { %1442 = vmatprep.subr.bf16.mxu1 %v5393_v15 }
 0x642   : > { %1443 = vmatpush1.bf16.msra.mxu1 %v1413_v25 }
 0x643   : > { %1444 = vmatprep.subr.bf16.mxu1 %v5393_v15 }
 0x646   : > { %1445 = vmatpush1.bf16.msra.mxu1 %v1415_v29 }
 0x647   : > { %1878 = vmatprep.subr.bf16.mxu1 %v5393_v15 }
 0x649   : > { %1459 = vmatmul.mubr.bf16.vlgmr.msra.gmra.mrb[12].mxu1 %v5891_v12 }
 0x64a   : > { %4131 = vmatprep.mubr.msk.bf16.mxu1 %vm929_vm10, %v5893_v13 }
 0x651   : > { %1467 = vmatmul.mubr.bf16.gmra.mrb[16].mxu1 %v5899_v16 }
 0x652   : > { %4132 = vmatprep.mubr.msk.bf16.mxu1 %vm929_vm10, %v5901_v17 }
 0x659   : > { %1475 = vmatmul.mubr.bf16.gmra.mrb[20].mxu1 %v5906_v18 }
 0x65a   : > { %4140 = vmatprep.mubr.msk.bf16.mxu1 %vm929_vm10, %v5876_v58 }
 0x71c   : > { %v1460_v42 = vpop.f32.mrb[12].mxu1 }
 0x71d   : > { %v1462_v47 = vpop.f32.mrb[13].mxu1  ;;  %v1461_v54 = vadd.f32 %v1460_v42, %v5924_v32 }
 0x71e   : > { %v1463_v57 = vpop.f32.mrb[14].mxu1 }
 0x71f   : > { %v1464_v12 = vadd.f32 %v1463_v57, %v5928_v36  ;;  %v1465_v63 = vpop.f32.mrb[15].mxu1 }
 0x721   : > { %v4641_v56 = vpack.i.bf16 %v1464_v12, %v1461_v54 }
 0x723   : > { %4642 = vrot.lane.b32.xlu0 %v4641_v56, %s5392_s25  ;;  %4637 = vrot.lane.b32.xlu1 %v4641_v56, %s5390_s8 }
 0x724   : > { %v1468_v13 = vpop.f32.mrb[16].mxu1 }
 0x725   : > { %v1470_v16 = vpop.f32.mrb[17].mxu1  ;;  %v1469_v62 = vadd.f32 %v1468_v13, %v5938_v35 }
 0x726   : > { %v1471_v23 = vpop.f32.mrb[18].mxu1 }
 0x727   : > { %v1472_v58 = vadd.f32 %v1471_v23, %v5940_v48  ;;  %v1473_v49 = vpop.f32.mrb[19].mxu1  ;;  %4652 = vrot.lane.b32.xlu0 %v4641_v56, %s5395_s17  ;;  %4647 = vrot.lane.b32.xlu1 %v4641_v56, %s5391_s27 }
 0x729   : > { %v4661_v59 = vpack.i.bf16 %v1472_v58, %v1469_v62 }
 0x72b   : > { %4662 = vrot.lane.b32.xlu0 %v4661_v59, %s5392_s25  ;;  %4657 = vrot.lane.b32.xlu1 %v4661_v59, %s5390_s8 }
 0x72c   : > { %v1476_v1 = vpop.f32.mrb[20].mxu1 }
 0x72d   : > { %v1478_v2 = vpop.f32.mrb[21].mxu1  ;;  %v1477_v10 = vadd.f32 %v1476_v1, %v5950_v55 }
 0x72e   : > { %v1479_v4 = vpop.f32.mrb[22].mxu1 }
 0x72f   : > { %4672 = vrot.lane.b32.xlu0 %v4661_v59, %s5395_s17  ;;  %4667 = vrot.lane.b32.xlu1 %v4661_v59, %s5391_s27  ;;  %v1480_v7 = vpop.f32.mrb[23].mxu1 }
 0x733   : > { %1515 = vrot.lane.b32.xlu0 %v1477_v10, %s5392_s25  ;;  %1495 = vrot.lane.b32.xlu1 %v1477_v10, %s5390_s8 }
 0x737   : > { %1555 = vrot.lane.b32.xlu0 %v1477_v10, %s5395_s17  ;;  %1535 = vrot.lane.b32.xlu1 %v1477_v10, %s5391_s27 }
 0x73b   : > { %1708 = vrot.lane.b32.xlu1 %v1700_v9, %s5390_s8  ;;  %1711 = vrot.lane.b32.xlu0 %v1710_v50, %s5392_s25 }
 0x73f   : > { %1714 = vrot.lane.b32.xlu1 %v1713_v45, %s5391_s27 }
 0x795   : > { %v4643_v0 = vpop.permute.xlu0 %4642  ;;  %v4638_v14 = vpop.permute.xlu1 %4637 }
 0x796   : > { %v4640_v22 = vunpack.i.h.bf16 %v4638_v14  ;;  %v4639_v33 = vunpack.i.l.bf16 %v4638_v14  ;;  %v4645_v61 = vunpack.i.h.bf16 %v4643_v0  ;;  %v4644_v60 = vunpack.i.l.bf16 %v4643_v0 }
 0x798   : > { %v1503_v43 = vmax.f32 %v1464_v12, %v4640_v22  ;;  %v1502_v46 = vmax.f32 %v1461_v54, %v4639_v33 }
 0x799   : > { %v4653_v25 = vpop.permute.xlu0 %4652  ;;  %v4648_v29 = vpop.permute.xlu1 %4647 }
 0x79a   : > { %v4650_v42 = vunpack.i.h.bf16 %v4648_v29  ;;  %v4649_v47 = vunpack.i.l.bf16 %v4648_v29  ;;  %v1522_v57 = vmax.f32 %v1502_v46, %v4644_v60  ;;  %v1523_v63 = vmax.f32 %v1503_v43, %v4645_v61 }
 0x79b   : > { %v4655_v56 = vunpack.i.h.bf16 %v4653_v25  ;;  %v4654_v13 = vunpack.i.l.bf16 %v4653_v25 }
 0x79c   : > { %v1542_v16 = vmax.f32 %v1522_v57, %v4649_v47  ;;  %v1543_v23 = vmax.f32 %v1523_v63, %v4650_v42 }
 0x79d   : > { %v4663_v49 = vpop.permute.xlu0 %4662  ;;  %v4658_v59 = vpop.permute.xlu1 %4657 }
 0x79e   : > { %v4660_v1 = vunpack.i.h.bf16 %v4658_v59  ;;  %v4659_v2 = vunpack.i.l.bf16 %v4658_v59  ;;  %v1562_v4 = vmax.f32 %v1542_v16, %v4654_v13  ;;  %v1563_v7 = vmax.f32 %v1543_v23, %v4655_v56 }
 0x79f   : > { %v4665_v40 = vunpack.i.h.bf16 %v4663_v49  ;;  %v4664_v9 = vunpack.i.l.bf16 %v4663_v49 }
 0x7a0   : > { %v1505_v12 = vmax.f32 %v1472_v58, %v4660_v1  ;;  %v1504_v54 = vmax.f32 %v1469_v62, %v4659_v2  ;;  %v1567_v51 = vpack.c.bf16 %v1563_v7, %v1562_v4  ;;  %v6170_v7 = vld [vmem:[%s6871_s1] sm:$0xff]  }
 0x7a1   : > { %v4673_v50 = vpop.permute.xlu0 %4672  ;;  %v4668_v45 = vpop.permute.xlu1 %4667 }
 0x7a2   : > { %v4670_v0 = vunpack.i.h.bf16 %v4668_v45  ;;  %v4669_v14 = vunpack.i.l.bf16 %v4668_v45  ;;  %v1524_v22 = vmax.f32 %v1504_v54, %v4664_v9  ;;  %v1525_v33 = vmax.f32 %v1505_v12, %v4665_v40  ;;  %4325 = vmatmul.mubr.msk.bf16.vlgmr.msra.gmra.mrb[36].mxu0 %vm1111_vm12, %v1567_v51 }
 0x7a3   : > { %4328 = vmatprep.mubr.msk.bf16.mxu0 %vm5389_vm0, %v5388_v5  ;;  %v4675_v43 = vunpack.i.h.bf16 %v4673_v50  ;;  %v4674_v46 = vunpack.i.l.bf16 %v4673_v50 }
 0x7a4   : > { %v1544_v61 = vmax.f32 %v1524_v22, %v4669_v14  ;;  %v1545_v60 = vmax.f32 %v1525_v33, %v4670_v0 }
 0x7a5   : > { %v1516_v58 = vpop.permute.xlu0 %1515  ;;  %v1496_v62 = vpop.permute.xlu1 %1495 }
 0x7a6   : > { %v1506_v25 = vmax.f32 %v1477_v10, %v1496_v62  ;;  %v1564_v29 = vmax.f32 %v1544_v61, %v4674_v46  ;;  %v1565_v42 = vmax.f32 %v1545_v60, %v4675_v43 }
 0x7a8   : > { %v1526_v47 = vmax.f32 %v1506_v25, %v1516_v58  ;;  %v1568_v56 = vpack.c.bf16 %v1565_v42, %v1564_v29 }
 0x7a9   : > { %v1556_v57 = vpop.permute.xlu0 %1555  ;;  %v1536_v63 = vpop.permute.xlu1 %1535 }
 0x7aa   : > { %v1546_v13 = vmax.f32 %v1526_v47, %v1536_v63  ;;  %4329 = vmatmul.mubr.msk.bf16.gmra.mrb[40].mxu0 %vm1111_vm12, %v1568_v56 }
 0x7ab   : > { %4332 = vmatprep.mubr.msk.bf16.mxu0 %vm5389_vm0, %v5388_v5 }
 0x7ac   : > { %v1566_v16 = vmax.f32 %v1546_v13, %v1556_v57 }
 0x7ad   : > { %v1709_v23 = vpop.permute.xlu1 %1708  ;;  %v1712_v49 = vpop.permute.xlu0 %1711 }
 0x7ae   : > { %v1718_v59 = vsel %vm646_vm1, %v6138_v8, %v1709_v23  ;;  %v1569_v1 = vpack.c.bf16 %v1566_v16, %v1566_v16  ;;  %v6183_v8 = vld [vmem:[%s6871_s1 + $0x8] sm:$0xff]  }
 0x7af   : > { %v1720_v10 = vsel %vm650_vm2, %v1718_v59, %v1712_v49 }
 0x7b1   : > { %v1715_v2 = vpop.permute.xlu1 %1714 }
 0x7b2   : > { %v1722_v4 = vsel %vm653_vm3, %v1720_v10, %v1715_v2  ;;  %4333 = vmatmul.mubr.msk.bf16.gmra.mrb[44].mxu0 %vm1111_vm12, %v1569_v1 }
 0x7b3   : > { %4337 = vmatpush3.bf16.msra.mxu0 %v1722_v4  ;;  %4338 = vmatprep.mubr.msk.bf16.mxu0 %vm5389_vm0, %v5388_v5 }
 0x7b4   : > { %4350 = vmatprep.subr.bf16.mxu0 %v5388_v5 }
 0x7ba   : > { %4339 = vmatmul.mubr.msk.bf16.vlgmr.msra.gmra.mrb[48].mxu0 %vm705_vm4, %v6170_v7 }
 0x7bb   : > { %4342 = vmatprep.mubr.msk.bf16.mxu0 %vm5389_vm0, %v5388_v5  ;;  %4351 = vmatpush3.bf16.msra.mxu0 %v5911_v19  ;;  %v6195_v19 = vld [vmem:[%s6871_s1 + $0x10] ss:$0 sps:$4 sm:$0xff]  }
 0x7bc   : > { %4352 = vmatprep.subr.bf16.mxu0 %v5388_v5 }
 0x7bf   : > { %4353 = vmatpush3.bf16.msra.mxu0 %v5915_v20 }
 0x7c0   : > { %4354 = vmatprep.subr.bf16.mxu0 %v5388_v5 }
 0x7c2   : > { %4343 = vmatmul.mubr.msk.bf16.gmra.mrb[52].mxu0 %vm705_vm4, %v6183_v8 }
 0x7c3   : > { %4346 = vmatprep.mubr.msk.bf16.mxu0 %vm5389_vm0, %v5388_v5  ;;  %4355 = vmatpush3.bf16.msra.mxu0 %v5919_v21 }
 0x7c4   : > { %4356 = vmatprep.subr.bf16.mxu0 %v5388_v5 }
 0x7c7   : > { %4357 = vmatpush3.bf16.msra.mxu0 %v5930_v39 }
 0x7ca   : > { %4347 = vmatmul.mubr.msk.bf16.gmra.mrb[56].mxu0 %vm705_vm4, %v6195_v19 }
 0x7cb   : > { %4358 = vmatprep.mubr.msk.bf16.mxu0 %vm5389_vm0, %v5388_v5 }
 0x875   : > { %v6201_v20 = vpop.f32.mrb[36].mxu0 }
 0x876   : > { %v1635_v12 = vmin.f32 %v6201_v20, 20.0  ;;  %v4326_v21 = vpop.f32.mrb[37].mxu0  ;;  %vm1680_vm7 = vcmp.gt.f32.partialorder %v6201_v20, 20.0 }
 0x877   : > { %v6204_v54 = vpop.f32.mrb[38].mxu0 }
 0x878   : > { %v1640_v51 = vmul.f32 1.442695, %v1635_v12  ;;  %v1636_v40 = vmin.f32 %v6204_v54, 20.0  ;;  %v4327_v9 = vpop.f32.mrb[39].mxu0  ;;  %vm1681_vm8 = vcmp.gt.f32.partialorder %v6204_v54, 20.0 }
 0x87a   : > { %4874 = vpow2.f32 %v1640_v51  ;;  %v1642_v50 = vmul.f32 1.442695, %v1636_v40 }
 0x87c   : > { %4876 = vpow2.f32 %v1642_v50 }
 0x87d   : > { %v6207_v45 = vpop.f32.mrb[40].mxu0 }
 0x87e   : > { %v1637_v0 = vmin.f32 %v6207_v45, 20.0  ;;  %v4330_v14 = vpop.f32.mrb[41].mxu0  ;;  %vm1682_vm9 = vcmp.gt.f32.partialorder %v6207_v45, 20.0 }
 0x87f   : > { %v6210_v22 = vpop.f32.mrb[42].mxu0 }
 0x880   : > { %v1644_v33 = vmul.f32 1.442695, %v1637_v0  ;;  %v1638_v43 = vmin.f32 %v6210_v22, 20.0  ;;  %v4331_v46 = vpop.f32.mrb[43].mxu0  ;;  %vm1683_vm13 = vcmp.gt.f32.partialorder %v6210_v22, 20.0 }
 0x882   : > { %4878 = vpow2.f32 %v1644_v33  ;;  %v1646_v61 = vmul.f32 1.442695, %v1638_v43 }
 0x884   : > { %v4875_v60 = vpop.eup %4874  ;;  %4880 = vpow2.f32 %v1646_v61 }
 0x885   : > { %v1650_v58 = vadd.f32 2.0, %v4875_v60  ;;  %v6213_v62 = vpop.f32.mrb[44].mxu0 }
 0x886   : > { %v4877_v25 = vpop.eup %4876  ;;  %v1639_v29 = vmin.f32 %v6213_v62, 20.0  ;;  %v4334_v42 = vpop.f32.mrb[45].mxu0  ;;  %vm1684_vm14 = vcmp.gt.f32.partialorder %v6213_v62, 20.0 }
 0x887   : > { %v1655_v47 = vmul.f32 %v4875_v60, %v1650_v58  ;;  %v1651_v57 = vadd.f32 2.0, %v4877_v25  ;;  %v1632_v63 = vpop.f32.mrb[46].mxu0 }
 0x888   : > { %v1648_v56 = vmul.f32 1.442695, %v1639_v29  ;;  %v4335_v13 = vpop.f32.mrb[47].mxu0 }
 0x889   : > { %v1665_v16 = vadd.f32 2.0, %v1655_v47  ;;  %v1656_v23 = vmul.f32 %v4877_v25, %v1651_v57  ;;  %v1660_v58 = vmul.f32 %v1655_v47, %v6201_v20 }
 0x88a   : > { %4882 = vpow2.f32 %v1648_v56 }
 0x88b   : > { %4884 = vrcp.f32 %v1665_v16  ;;  %v1666_v49 = vadd.f32 2.0, %v1656_v23  ;;  %v1661_v56 = vmul.f32 %v1656_v23, %v6204_v54 }
 0x88c   : > { %v4879_v59 = vpop.eup %4878 }
 0x88d   : > { %4886 = vrcp.f32 %v1666_v49  ;;  %v1652_v10 = vadd.f32 2.0, %v4879_v59  ;;  %v1758_v1 = vpop.f32.mrb[48].mxu0 }
 0x88e   : > { %v4881_v2 = vpop.eup %4880  ;;  %v6217_v4 = vadd.f32 %v1758_v1, %v5820_v28  ;;  %v4340_v12 = vpop.f32.mrb[49].mxu0 }
 0x88f   : > { %v1657_v21 = vmul.f32 %v4879_v59, %v1652_v10  ;;  %v1653_v51 = vadd.f32 2.0, %v4881_v2  ;;  %v1761_v40 = vpop.f32.mrb[50].mxu0 }
 0x890   : > { %v1780_v9 = vmin.f32 %v6217_v4, 20.0  ;;  %v6221_v50 = vadd.f32 %v1761_v40, %v5822_v30  ;;  %v4341_v0 = vpop.f32.mrb[51].mxu0 }
 0x891   : > { %v1667_v14 = vadd.f32 2.0, %v1657_v21  ;;  %v1658_v33 = vmul.f32 %v4881_v2, %v1653_v51 }
 0x892   : > { %v1785_v43 = vmul.f32 1.442695, %v1780_v9  ;;  %v1781_v46 = vmin.f32 %v6221_v50, 20.0 }
 0x893   : > { %4888 = vrcp.f32 %v1667_v14  ;;  %v1668_v61 = vadd.f32 2.0, %v1658_v33  ;;  %v2783_v14 = vrot.slane %v6040_v31, 2 }
 0x894   : > { %v4883_v60 = vpop.eup %4882  ;;  %4890 = vpow2.f32 %v1785_v43  ;;  %v1787_v25 = vmul.f32 1.442695, %v1781_v46  ;;  %v1662_v46 = vmul.f32 %v1657_v21, %v6207_v45 }
 0x895   : > { %v4885_v29 = vpop.eup %4884  ;;  %4892 = vrcp.f32 %v1668_v61  ;;  %v1654_v42 = vadd.f32 2.0, %v4883_v60  ;;  %v1766_v57 = vpop.f32.mrb[52].mxu0 }
 0x896   : > { %v1675_v63 = vmul.f32 %v4885_v29, %v1660_v58  ;;  %4894 = vpow2.f32 %v1787_v25  ;;  %v6227_v13 = vadd.f32 %v1766_v57, %v5831_v37  ;;  %v4344_v16 = vpop.f32.mrb[53].mxu0 }
 0x897   : > { %v4887_v49 = vpop.eup %4886  ;;  %v1659_v59 = vmul.f32 %v4883_v60, %v1654_v42  ;;  %v1769_v47 = vpop.f32.mrb[54].mxu0 }
 0x898   : > { %v6231_v10 = vsel %vm1680_vm7, %v6201_v20, %v1675_v63  ;;  %v1676_v1 = vmul.f32 %v4887_v49, %v1661_v56  ;;  %v1782_v2 = vmin.f32 %v6227_v13, 20.0  ;;  %v4345_v12 = vpop.f32.mrb[55].mxu0  ;;  %v6245_v20 = vadd.f32 %v1769_v47, %v5837_v44 }
 0x899   : > { %v2595_v51 = vrot.slane %v6231_v10, 3  ;;  %v6238_v23 = vsel %vm2603_vm6, %v6047_v41, %v6231_v10  ;;  %v1669_v40 = vadd.f32 2.0, %v1659_v59  ;;  %vm1825_vm7 = vcmp.gt.f32.partialorder %v6217_v4, 20.0 }
 0x89a   : > { %v6242_v9 = vsel %vm1681_vm8, %v6204_v54, %v1676_v1  ;;  %v1789_v0 = vmul.f32 1.442695, %v1782_v2  ;;  %v1783_v54 = vmin.f32 %v6245_v20, 20.0  ;;  %vm1826_vm8 = vcmp.gt.f32.partialorder %v6221_v50, 20.0 }
 0x89b   : > { %v6252_v43 = vsel %vm2603_vm6, %v6032_v11, %v2595_v51  ;;  %v2786_v41 = vrot.slane %v6242_v9, 5  ;;  %4896 = vrcp.f32 %v1669_v40  ;;  %v1663_v11 = vmul.f32 %v1658_v33, %v6210_v22 }
 0x89c   : > { %4898 = vpow2.f32 %v1789_v0  ;;  %v1791_v29 = vmul.f32 1.442695, %v1783_v54  ;;  %v2881_v63 = vrot.slane %v6242_v9, 2 }
 0x89d   : > { %v4889_v61 = vpop.eup %4888  ;;  %v6260_v60 = vsel %vm2603_vm6, %v2783_v14, %v2786_v41  ;;  %v1774_v31 = vpop.f32.mrb[56].mxu0 }
 0x89e   : > { %v4891_v58 = vpop.eup %4890  ;;  %v1677_v25 = vmul.f32 %v4889_v61, %v1662_v46  ;;  %v6264_v42 = vadd.f32 %v1774_v31, %v5844_v52  ;;  %v4348_v57 = vpop.f32.mrb[57].mxu0  ;;  %4900 = vpow2.f32 %v1791_v29  ;;  %v3084_v46 = vrot.slane %v6059_v38, 1 }
 0x89f   : > { %v4893_v21 = vpop.eup %4892  ;;  %v1795_v56 = vadd.f32 2.0, %v4891_v58  ;;  %v1777_v16 = vpop.f32.mrb[58].mxu0  ;;  %v1664_v38 = vmul.f32 %v1659_v59, %v6213_v62  ;;  %v3284_v59 = vrot.slane %v6071_v27, 3 }
 0x8a0   : > { %v4895_v49 = vpop.eup %4894  ;;  %v6270_v47 = vsel %vm1682_vm9, %v6207_v45, %v1677_v25  ;;  %v1678_v1 = vmul.f32 %v4893_v21, %v1663_v11  ;;  %v1784_v33 = vmin.f32 %v6264_v42, 20.0  ;;  %v4349_v2 = vpop.f32.mrb[59].mxu0  ;;  %vm1827_vm9 = vcmp.gt.f32.partialorder %v6227_v13, 20.0 }
 0x8a1   : > { %v2882_v12 = vrot.slane %v6270_v47, 2  ;;  %v2982_v40 = vrot.slane %v6270_v47, 7  ;;  %v1800_v0 = vmul.f32 %v4891_v58, %v1795_v56  ;;  %v1796_v14 = vadd.f32 2.0, %v4895_v49 }
 0x8a2   : > { %v6277_v54 = vsel %vm1683_vm13, %v6210_v22, %v1678_v1  ;;  %v1793_v61 = vmul.f32 1.442695, %v1784_v33  ;;  %vm1828_vm13 = vcmp.gt.f32.partialorder %v6245_v20, 20.0 }
 0x8a3   : > { %v2883_v45 = vsel %vm653_vm3, %v2881_v63, %v2882_v12  ;;  %v6284_v31 = vsel %vm2603_vm6, %v6067_v26, %v2982_v40  ;;  %v2983_v25 = vrot.slane %v6277_v54, 7  ;;  %v3086_v11 = vrot.slane %v6277_v54, 4 }
 0x8a4   : > { %v6290_v58 = vsel %vm2603_vm6, %v6062_v34, %v2883_v45  ;;  %v1810_v22 = vadd.f32 2.0, %v1800_v0  ;;  %v1801_v21 = vmul.f32 %v4895_v49, %v1796_v14  ;;  %4902 = vpow2.f32 %v1793_v61 }
 0x8a5   : > { %v4897_v29 = vpop.eup %4896  ;;  %v6294_v57 = vsel %vm1121_vm11, %v2982_v40, %v2983_v25  ;;  %v6299_v26 = vsel %vm2603_vm6, %v3084_v46, %v3086_v11  ;;  %v3183_v1 = vrot.slane %v6277_v54, 1  ;;  %v4781_v54 = vld [vmem:[#allocation9 + $0x20] ss:$8 sps:$4 sm:$0x3f]  }
 0x8a6   : > { %v4899_v63 = vpop.eup %4898  ;;  %v1679_v56 = vmul.f32 %v4897_v29, %v1664_v38  ;;  %4904 = vrcp.f32 %v1810_v22  ;;  %v1811_v34 = vadd.f32 2.0, %v1801_v21  ;;  %v1805_v29 = vmul.f32 %v1800_v0, %v6217_v4 }
 0x8a7   : > { %v1797_v16 = vadd.f32 2.0, %v4899_v63 }
 0x8a8   : > { %v6305_v33 = vsel %vm1684_vm14, %v6213_v62, %v1679_v56  ;;  %4906 = vrcp.f32 %v1811_v34  ;;  %v4901_v14 = vpop.eup %4900  ;;  %vm1829_vm14 = vcmp.gt.f32.partialorder %v6264_v42, 20.0 }
 0x8a9   : > { %v6893_v2 = vrot.slane %v6305_v33, 1  ;;  %v6894_v49 = vrot.slane %v6305_v33, 6  ;;  %v1802_v40 = vmul.f32 %v4899_v63, %v1797_v16  ;;  %v1798_v45 = vadd.f32 2.0, %v4901_v14 }
 0x8aa   : > { %v1806_v16 = vmul.f32 %v1801_v21, %v6221_v50 }
 0x8ab   : > { %v3185_v46 = vsel %vm2606_vm5, %v3183_v1, %v6893_v2  ;;  %v6315_v27 = vsel %vm2603_vm6, %v3284_v59, %v6894_v49  ;;  %v1812_v61 = vadd.f32 2.0, %v1802_v40  ;;  %v1803_v25 = vmul.f32 %v4901_v14, %v1798_v45 }
 0x8ac   : > { %v6319_v62 = vsel %vm2603_vm6, %v6076_v53, %v3185_v46 }
 0x8ad   : > { %4908 = vrcp.f32 %v1812_v61  ;;  %v1813_v63 = vadd.f32 2.0, %v1803_v25  ;;  %v1807_v61 = vmul.f32 %v1802_v40, %v6227_v13 }
 0x8ae   : > { %v4903_v38 = vpop.eup %4902 }
 0x8af   : > { %v1799_v56 = vadd.f32 2.0, %v4903_v38  ;;  %4910 = vrcp.f32 %v1813_v63 }
 0x8b0   : > { %v4905_v22 = vpop.eup %4904 }
 0x8b1   : > { %v1820_v34 = vmul.f32 %v4905_v22, %v1805_v29  ;;  %v1804_v59 = vmul.f32 %v4903_v38, %v1799_v56  ;;  %v1808_v38 = vmul.f32 %v1803_v25, %v6245_v20 }
 0x8b2   : > { %v4907_v1 = vpop.eup %4906 }
 0x8b3   : > { %v1821_v2 = vmul.f32 %v4907_v1, %v1806_v16  ;;  %v1814_v49 = vadd.f32 2.0, %v1804_v59  ;;  %v1830_v53 = vsel %vm1825_vm7, %v6217_v4, %v1820_v34  ;;  %v1809_v4 = vmul.f32 %v1804_v59, %v6264_v42  ;;  %v4146_v59 = vld [vmem:[%s5773_s23 + $0x6] sm:$0x3] }
 0x8b5   : > { %4912 = vrcp.f32 %v1814_v49  ;;  %v1831_v14 = vsel %vm1826_vm8, %v6221_v50, %v1821_v2 }
 0x8b6   : > { %v1835_v0 = vpack.c.bf16 %v1831_v14, %v1830_v53  ;;  %v2159_v53 = vrot.slane %v4146_v59, %v5776_v6 }
 0x8b7   : > { %v4909_v46 = vpop.eup %4908 }
 0x8b8   : > { %1879 = vmatpush1.bf16.msra.mxu1 %v1835_v0  ;;  %v1841_v21 = vrot.slane %v1835_v0, 4  ;;  %v1822_v45 = vmul.f32 %v4909_v46, %v1807_v61  ;;  %v2162_v14 = vcombine.low %v2159_v53, %v2159_v53 }
 0x8b9   : > { %1880 = vmatprep.subr.bf16.mxu1 %v5393_v15  ;;  %v4911_v22 = vpop.eup %4910 }
 0x8ba   : > { %1846 = vrot.lane.b32.xlu0 %v1841_v21, %s5390_s8  ;;  %v1823_v29 = vmul.f32 %v4911_v22, %v1808_v38  ;;  %v1832_v50 = vsel %vm1827_vm9, %v6227_v13, %v1822_v45 }
 0x8bc   : > { %v1833_v2 = vsel %vm1828_vm13, %v6245_v20, %v1823_v29 }
 0x8bd   : > { %v1836_v40 = vpack.c.bf16 %v1833_v2, %v1832_v50 }
 0x8bf   : > { %v4913_v49 = vpop.eup %4912  ;;  %1881 = vmatpush1.bf16.msra.mxu1 %v1836_v40  ;;  %v1842_v25 = vrot.slane %v1836_v40, 4 }
 0x8c0   : > { %v1824_v63 = vmul.f32 %v4913_v49, %v1809_v4  ;;  %1882 = vmatprep.subr.bf16.mxu1 %v5393_v15 }
 0x8c1   : > { %v1843_v16 = vsel %vm650_vm2, %v1841_v21, %v1842_v25 }
 0x8c2   : > { %v1834_v56 = vsel %vm1829_vm14, %v6264_v42, %v1824_v63  ;;  %1848 = vrot.lane.b32.xlu1 %v1843_v16, %s5390_s8  ;;  %v2145_v42 = vcombine.low %v4146_v59, %v4146_v59 }
 0x8c3   : > { %v1837_v34 = vpack.c.bf16 %v1834_v56, %v1834_v56 }
 0x8c4   : > { %v2152_v1 = vrot.slane %v2145_v42, %v5776_v6 }
 0x8c5   : > { %v1844_v13 = vrot.slane %v1837_v34, 4 }
 0x8c6   : > { %1854 = vrot.lane.b32.xlu1 %v1835_v0, %s5392_s25  ;;  %v2165_v0 = vcombine.low %v2152_v1, %v2152_v1 }
 0x8c7   : > { %v1845_v20 = vsel %vm650_vm2, %v1842_v25, %v1844_v13  ;;  %v6371_v13 = vld [vmem:[#allocation4 + $0x14] ss:$8 sps:$4 sm:$0xff]  }
 0x8c8   : > { %1850 = vrot.lane.b32.xlu0 %v1845_v20, %s5390_s8 }
 0x8ca   : > { %1858 = vrot.lane.b32.xlu1 %v1837_v34, %s5392_s25 }
 0x8cc   : > { %1856 = vrot.lane.b32.xlu0 %v1836_v40, %s5392_s25 }
 0x8ce   : > { %1864 = vrot.lane.b32.xlu1 %v1843_v16, %s5391_s27  ;;  %v6368_v16 = vld [vmem:[#allocation4] ss:$8 sps:$4 sm:$0xff]  }
 0x8d0   : > { %1862 = vrot.lane.b32.xlu0 %v1841_v21, %s5391_s27 }
 0x8d2   : > { %2160 = vrot.lane.b32.xlu1 %v2152_v1, %s5390_s8 }
 0x8d4   : > { %1866 = vrot.lane.b32.xlu0 %v1845_v20, %s5391_s27  ;;  %v6376_v20 = vld [vmem:[#allocation4 + $0x10] ss:$8 sps:$4 sm:$0xff]  }
 0x8d6   : > { %2166 = vrot.lane.b32.xlu1 %v2165_v0, %s5391_s27 }
 0x8d8   : > { %2163 = vrot.lane.b32.xlu0 %v2162_v14, %s5392_s25 }
 0x92c   : > { %v1847_v46 = vpop.permute.xlu0 %1846 }
 0x92d   : > { %v1872_v61 = vsel %vm650_vm2, %v1837_v34, %v1847_v46 }
 0x92e   : > { %1883 = vmatpush1.bf16.msra.mxu1 %v1872_v61 }
 0x92f   : > { %1884 = vmatprep.subr.bf16.mxu1 %v5393_v15 }
 0x934   : > { %v1849_v21 = vpop.permute.xlu1 %1848 }
 0x935   : > { %1885 = vmatpush1.bf16.msra.mxu1 %v1849_v21 }
 0x936   : > { %1886 = vmatprep.subr.bf16.mxu1 %v5393_v15 }
 0x938   : > { %v1855_v6 = vpop.permute.xlu1 %1854 }
 0x93a   : > { %v1851_v45 = vpop.permute.xlu0 %1850 }
 0x93b   : > { %1887 = vmatpush1.bf16.msra.mxu1 %v1851_v45 }
 0x93c   : > { %1888 = vmatprep.subr.bf16.mxu1 %v5393_v15  ;;  %v1859_v38 = vpop.permute.xlu1 %1858 }
 0x93e   : > { %v1857_v22 = vpop.permute.xlu0 %1856 }
 0x93f   : > { %1889 = vmatpush1.bf16.msra.mxu1 %v1855_v6 }
 0x940   : > { %1890 = vmatprep.subr.bf16.mxu1 %v5393_v15  ;;  %v1865_v4 = vpop.permute.xlu1 %1864 }
 0x942   : > { %v1863_v29 = vpop.permute.xlu0 %1862 }
 0x943   : > { %1891 = vmatpush1.bf16.msra.mxu1 %v1857_v22  ;;  %v1876_v50 = vsel %vm650_vm2, %v1859_v38, %v1863_v29 }
 0x944   : > { %1892 = vmatprep.subr.bf16.mxu1 %v5393_v15  ;;  %v2161_v49 = vpop.permute.xlu1 %2160 }
 0x945   : > { %v2170_v40 = vsel %vm646_vm1, %v4146_v59, %v2161_v49  ;;  %v5028_v59 = vld [vmem:[#allocation4 + $0x4] ss:$8 sps:$4 sm:$0xff]  }
 0x946   : > { %v1867_v2 = vpop.permute.xlu0 %1866 }
 0x947   : > { %1893 = vmatpush1.bf16.msra.mxu1 %v1876_v50 }
 0x948   : > { %1894 = vmatprep.subr.bf16.mxu1 %v5393_v15  ;;  %v2167_v56 = vpop.permute.xlu1 %2166 }
 0x94a   : > { %v2164_v63 = vpop.permute.xlu0 %2163 }
 0x94b   : > { %1895 = vmatpush1.bf16.msra.mxu1 %v1865_v4  ;;  %v2172_v25 = vsel %vm650_vm2, %v2170_v40, %v2164_v63 }
 0x94c   : > { %1896 = vmatprep.subr.bf16.mxu1 %v5393_v15  ;;  %v2174_v34 = vsel %vm653_vm3, %v2172_v25, %v2167_v56 }
 0x94f   : > { %1897 = vmatpush1.bf16.msra.mxu1 %v1867_v2 }
 0x950   : > { %4370 = vmatprep.subr.bf16.mxu1 %v5388_v5 }
 0x952   : > { %1911 = vmatmul.mubr.bf16.vlgmr.msra.gmra.mrb[24].mxu1 %v6368_v16 }
 0x953   : > { %4141 = vmatprep.mubr.msk.bf16.mxu1 %vm929_vm10, %v6371_v13  ;;  %4371 = vmatpush3.bf16.msra.mxu1 %v2174_v34 }
 0x954   : > { %2330 = vmatprep.subr.bf16.mxu1 %v5393_v15 }
 0x95a   : > { %1919 = vmatmul.mubr.bf16.gmra.mrb[28].mxu1 %v6376_v20 }
 0x95b   : > { %4142 = vmatprep.mubr.msk.bf16.mxu1 %vm929_vm10, %v5901_v17 }
 0x962   : > { %1927 = vmatmul.mubr.bf16.gmra.mrb[32].mxu1 %v5906_v18 }
 0x963   : > { %4372 = vmatprep.mubr.msk.bf16.mxu1 %vm5389_vm0, %v5388_v5 }
 0x96a   : > { %4373 = vmatmul.mubr.msk.bf16.vlgmr.msra.gmra.mrb[36].mxu1 %vm705_vm4, %v6170_v7 }
 0x96b   : > { %4376 = vmatprep.mubr.msk.bf16.mxu1 %vm5389_vm0, %v5388_v5 }
 0x972   : > { %4377 = vmatmul.mubr.msk.bf16.gmra.mrb[40].mxu1 %vm705_vm4, %v6183_v8 }
 0x973   : > { %4380 = vmatprep.mubr.msk.bf16.mxu1 %vm5389_vm0, %v5388_v5 }
 0x97a   : > { %4381 = vmatmul.mubr.msk.bf16.gmra.mrb[44].mxu1 %vm705_vm4, %v6195_v19 }
 0x97b   : > { %4150 = vmatprep.mubr.msk.bf16.mxu1 %vm929_vm10, %v5028_v59 }
 0xa25   : > { %v6395_v42 = vpop.f32.mrb[24].mxu1 }
 0xa26   : > { %v1914_v1 = vpop.f32.mrb[25].mxu1 }
 0xa27   : > { %v6397_v53 = vpop.f32.mrb[26].mxu1 }
 0xa28   : > { %v1917_v7 = vpop.f32.mrb[27].mxu1 }
 0xa2d   : > { %v6399_v14 = vpop.f32.mrb[28].mxu1 }
 0xa2e   : > { %v1922_v0 = vpop.f32.mrb[29].mxu1 }
 0xa2f   : > { %v6401_v46 = vpop.f32.mrb[30].mxu1 }
 0xa30   : > { %v1925_v8 = vpop.f32.mrb[31].mxu1 }
 0xa35   : > { %v6403_v61 = vpop.f32.mrb[32].mxu1 }
 0xa36   : > { %v1930_v21 = vpop.f32.mrb[33].mxu1 }
 0xa37   : > { %v1931_v6 = vpop.f32.mrb[34].mxu1 }
 0xa38   : > { %v1932_v19 = vpop.f32.mrb[35].mxu1 }
 0xa3d   : > { %v2210_v45 = vpop.f32.mrb[36].mxu1 }
 0xa3e   : > { %v6406_v38 = vadd.f32 %v2210_v45, %v5820_v28  ;;  %v4374_v22 = vpop.f32.mrb[37].mxu1 }
 0xa3f   : > { %v2213_v29 = vpop.f32.mrb[38].mxu1 }
 0xa40   : > { %v2232_v4 = vmin.f32 %v6406_v38, 20.0  ;;  %v2214_v50 = vadd.f32 %v2213_v29, %v5822_v30  ;;  %v4375_v2 = vpop.f32.mrb[39].mxu1  ;;  %vm2277_vm4 = vcmp.gt.f32.partialorder %v6406_v38, 20.0 }
 0xa42   : > { %v2237_v49 = vmul.f32 1.442695, %v2232_v4  ;;  %v2233_v40 = vmin.f32 %v2214_v50, 20.0  ;;  %vm2278_vm7 = vcmp.gt.f32.partialorder %v2214_v50, 20.0 }
 0xa44   : > { %4914 = vpow2.f32 %v2237_v49  ;;  %v2239_v63 = vmul.f32 1.442695, %v2233_v40 }
 0xa45   : > { %v2218_v25 = vpop.f32.mrb[40].mxu1 }
 0xa46   : > { %4916 = vpow2.f32 %v2239_v63  ;;  %v6411_v56 = vadd.f32 %v2218_v25, %v5831_v37  ;;  %v4378_v34 = vpop.f32.mrb[41].mxu1 }
 0xa47   : > { %v2221_v59 = vpop.f32.mrb[42].mxu1 }
 0xa48   : > { %v2234_v28 = vmin.f32 %v6411_v56, 20.0  ;;  %v6415_v1 = vadd.f32 %v2221_v59, %v5837_v44  ;;  %v4379_v7 = vpop.f32.mrb[43].mxu1  ;;  %vm2279_vm8 = vcmp.gt.f32.partialorder %v6411_v56, 20.0 }
 0xa4a   : > { %v2241_v0 = vmul.f32 1.442695, %v2234_v28  ;;  %v2235_v30 = vmin.f32 %v6415_v1, 20.0  ;;  %vm2280_vm9 = vcmp.gt.f32.partialorder %v6415_v1, 20.0 }
 0xa4c   : > { %4918 = vpow2.f32 %v2241_v0  ;;  %v2243_v8 = vmul.f32 1.442695, %v2235_v30 }
 0xa4d   : > { %v2226_v21 = vpop.f32.mrb[44].mxu1 }
 0xa4e   : > { %v4915_v6 = vpop.eup %4914  ;;  %4920 = vpow2.f32 %v2243_v8  ;;  %v6419_v19 = vadd.f32 %v2226_v21, %v5844_v52  ;;  %v4382_v37 = vpop.f32.mrb[45].mxu1 }
 0xa4f   : > { %v2247_v45 = vadd.f32 2.0, %v4915_v6  ;;  %v2229_v22 = vpop.f32.mrb[46].mxu1 }
 0xa50   : > { %v4917_v29 = vpop.eup %4916  ;;  %v2236_v4 = vmin.f32 %v6419_v19, 20.0  ;;  %v4383_v44 = vpop.f32.mrb[47].mxu1  ;;  %vm2281_vm13 = vcmp.gt.f32.partialorder %v6419_v19, 20.0 }
 0xa51   : > { %v2252_v2 = vmul.f32 %v4915_v6, %v2247_v45  ;;  %v2248_v49 = vadd.f32 2.0, %v4917_v29 }
 0xa52   : > { %v2245_v40 = vmul.f32 1.442695, %v2236_v4 }
 0xa53   : > { %v2262_v63 = vadd.f32 2.0, %v2252_v2  ;;  %v2253_v25 = vmul.f32 %v4917_v29, %v2248_v49  ;;  %v2257_v6 = vmul.f32 %v2252_v2, %v6406_v38 }
 0xa54   : > { %4922 = vpow2.f32 %v2245_v40 }
 0xa55   : > { %4924 = vrcp.f32 %v2262_v63  ;;  %v2263_v34 = vadd.f32 2.0, %v2253_v25  ;;  %v2258_v4 = vmul.f32 %v2253_v25, %v2214_v50 }
 0xa56   : > { %v4919_v59 = vpop.eup %4918 }
 0xa57   : > { %4926 = vrcp.f32 %v2263_v34  ;;  %v2249_v28 = vadd.f32 2.0, %v4919_v59 }
 0xa58   : > { %v4921_v52 = vpop.eup %4920 }
 0xa59   : > { %v2254_v7 = vmul.f32 %v4919_v59, %v2249_v28  ;;  %v2250_v0 = vadd.f32 2.0, %v4921_v52 }
 0xa5b   : > { %v2264_v30 = vadd.f32 2.0, %v2254_v7  ;;  %v2255_v8 = vmul.f32 %v4921_v52, %v2250_v0  ;;  %v2259_v52 = vmul.f32 %v2254_v7, %v6411_v56 }
 0xa5d   : > { %4928 = vrcp.f32 %v2264_v30  ;;  %v2265_v21 = vadd.f32 2.0, %v2255_v8  ;;  %v2260_v25 = vmul.f32 %v2255_v8, %v6415_v1 }
 0xa5e   : > { %v4923_v37 = vpop.eup %4922 }
 0xa5f   : > { %v4925_v45 = vpop.eup %4924  ;;  %4930 = vrcp.f32 %v2265_v21  ;;  %v2251_v22 = vadd.f32 2.0, %v4923_v37 }
 0xa60   : > { %v2272_v29 = vmul.f32 %v4925_v45, %v2257_v6 }
 0xa61   : > { %v4927_v44 = vpop.eup %4926  ;;  %v2256_v49 = vmul.f32 %v4923_v37, %v2251_v22 }
 0xa62   : > { %v2273_v40 = vmul.f32 %v4927_v44, %v2258_v4  ;;  %v2282_v34 = vsel %vm2277_vm4, %v6406_v38, %v2272_v29 }
 0xa63   : > { %v2266_v63 = vadd.f32 2.0, %v2256_v49  ;;  %v2261_v6 = vmul.f32 %v2256_v49, %v6419_v19  ;;  %v1916_v49 = vadd.f32 %v6397_v53, %v5928_v36 }
 0xa64   : > { %v2283_v59 = vsel %vm2278_vm7, %v2214_v50, %v2273_v40 }
 0xa65   : > { %4932 = vrcp.f32 %v2266_v63  ;;  %v2287_v28 = vpack.c.bf16 %v2283_v59, %v2282_v34 }
 0xa67   : > { %v4929_v2 = vpop.eup %4928  ;;  %2331 = vmatpush1.bf16.msra.mxu1 %v2287_v28  ;;  %v2293_v0 = vrot.slane %v2287_v28, 4 }
 0xa68   : > { %v2274_v30 = vmul.f32 %v4929_v2, %v2259_v52  ;;  %2332 = vmatprep.subr.bf16.mxu1 %v5393_v15 }
 0xa69   : > { %v4931_v21 = vpop.eup %4930  ;;  %2298 = vrot.lane.b32.xlu0 %v2293_v0, %s5390_s8 }
 0xa6a   : > { %v2275_v37 = vmul.f32 %v4931_v21, %v2260_v25  ;;  %v2284_v38 = vsel %vm2279_vm8, %v6411_v56, %v2274_v30 }
 0xa6c   : > { %v2285_v50 = vsel %vm2280_vm9, %v6415_v1, %v2275_v37 }
 0xa6d   : > { %v2288_v7 = vpack.c.bf16 %v2285_v50, %v2284_v38 }
 0xa6f   : > { %v4933_v45 = vpop.eup %4932  ;;  %2333 = vmatpush1.bf16.msra.mxu1 %v2288_v7  ;;  %v2294_v8 = vrot.slane %v2288_v7, 4 }
 0xa70   : > { %v2276_v22 = vmul.f32 %v4933_v45, %v2261_v6  ;;  %2334 = vmatprep.subr.bf16.mxu1 %v5393_v15 }
 0xa71   : > { %v2295_v29 = vsel %vm650_vm2, %v2293_v0, %v2294_v8 }
 0xa72   : > { %v2286_v4 = vsel %vm2281_vm13, %v6419_v19, %v2276_v22  ;;  %2300 = vrot.lane.b32.xlu1 %v2295_v29, %s5390_s8  ;;  %v1913_v19 = vadd.f32 %v6395_v42, %v5924_v32 }
 0xa73   : > { %v2289_v56 = vpack.c.bf16 %v2286_v4, %v2286_v4 }
 0xa74   : > { %v4676_v40 = vpack.i.bf16 %v1916_v49, %v1913_v19 }
 0xa75   : > { %v2296_v44 = vrot.slane %v2289_v56, 4 }
 0xa76   : > { %2306 = vrot.lane.b32.xlu1 %v2287_v28, %s5392_s25 }
 0xa77   : > { %v2297_v1 = vsel %vm650_vm2, %v2294_v8, %v2296_v44 }
 0xa78   : > { %2302 = vrot.lane.b32.xlu0 %v2297_v1, %s5390_s8 }
 0xa7a   : > { %2310 = vrot.lane.b32.xlu1 %v2289_v56, %s5392_s25 }
 0xa7c   : > { %2308 = vrot.lane.b32.xlu0 %v2288_v7, %s5392_s25 }
 0xa7e   : > { %2316 = vrot.lane.b32.xlu1 %v2295_v29, %s5391_s27 }
 0xa80   : > { %2314 = vrot.lane.b32.xlu0 %v2293_v0, %s5391_s27 }
 0xa82   : > { %4677 = vrot.lane.b32.xlu1 %v4676_v40, %s5390_s8 }
 0xa84   : > { %2318 = vrot.lane.b32.xlu0 %v2297_v1, %s5391_s27 }
 0xa86   : > { %4687 = vrot.lane.b32.xlu1 %v4676_v40, %s5391_s27 }
 0xa88   : > { %4682 = vrot.lane.b32.xlu0 %v4676_v40, %s5392_s25 }
 0xa8a   : > { %4692 = vrot.lane.b32.xlu1 %v4676_v40, %s5395_s17 }
 0xadb   : > { %v2299_v53 = vpop.permute.xlu0 %2298 }
 0xadc   : > { %v2324_v63 = vsel %vm650_vm2, %v2289_v56, %v2299_v53 }
 0xadd   : > { %2335 = vmatpush1.bf16.msra.mxu1 %v2324_v63 }
 0xade   : > { %2336 = vmatprep.subr.bf16.mxu1 %v5393_v15 }
 0xae4   : > { %v2301_v42 = vpop.permute.xlu1 %2300 }
 0xae5   : > { %2337 = vmatpush1.bf16.msra.mxu1 %v2301_v42 }
 0xae6   : > { %2338 = vmatprep.subr.bf16.mxu1 %v5393_v15 }
 0xae8   : > { %v2307_v34 = vpop.permute.xlu1 %2306 }
 0xaea   : > { %v2303_v59 = vpop.permute.xlu0 %2302 }
 0xaeb   : > { %2339 = vmatpush1.bf16.msra.mxu1 %v2303_v59  ;;  %v5029_v59 = vld [vmem:[#allocation7] sm:$0xff]  }
 0xaec   : > { %v2311_v28 = vpop.permute.xlu1 %2310  ;;  %2340 = vmatprep.subr.bf16.mxu1 %v5393_v15 }
 0xaee   : > { %v2309_v52 = vpop.permute.xlu0 %2308 }
 0xaef   : > { %2341 = vmatpush1.bf16.msra.mxu1 %v2307_v34 }
 0xaf0   : > { %v2317_v2 = vpop.permute.xlu1 %2316  ;;  %2342 = vmatprep.subr.bf16.mxu1 %v5393_v15 }
 0xaf2   : > { %v2315_v0 = vpop.permute.xlu0 %2314 }
 0xaf3   : > { %2343 = vmatpush1.bf16.msra.mxu1 %v2309_v52  ;;  %v2328_v25 = vsel %vm650_vm2, %v2311_v28, %v2315_v0  ;;  %v5030_v28 = vld [vmem:[#allocation7 + $0x8] sm:$0xff]  }
 0xaf4   : > { %v4678_v30 = vpop.permute.xlu1 %4677  ;;  %2344 = vmatprep.subr.bf16.mxu1 %v5393_v15 }
 0xaf5   : > { %v4680_v37 = vunpack.i.h.bf16 %v4678_v30  ;;  %v4679_v38 = vunpack.i.l.bf16 %v4678_v30 }
 0xaf6   : > { %v2319_v21 = vpop.permute.xlu0 %2318 }
 0xaf7   : > { %2345 = vmatpush1.bf16.msra.mxu1 %v2328_v25  ;;  %v1955_v6 = vmax.f32 %v1916_v49, %v4680_v37  ;;  %v1954_v45 = vmax.f32 %v1913_v19, %v4679_v38 }
 0xaf8   : > { %v4688_v50 = vpop.permute.xlu1 %4687  ;;  %2346 = vmatprep.subr.bf16.mxu1 %v5393_v15 }
 0xaf9   : > { %v4690_v4 = vunpack.i.h.bf16 %v4688_v50  ;;  %v4689_v56 = vunpack.i.l.bf16 %v4688_v50 }
 0xafa   : > { %v4683_v7 = vpop.permute.xlu0 %4682 }
 0xafb   : > { %v4685_v8 = vunpack.i.h.bf16 %v4683_v7  ;;  %v4684_v22 = vunpack.i.l.bf16 %v4683_v7  ;;  %2347 = vmatpush1.bf16.msra.mxu1 %v2317_v2 }
 0xafc   : > { %v4693_v29 = vpop.permute.xlu1 %4692  ;;  %2348 = vmatprep.subr.bf16.mxu1 %v5393_v15 }
 0xafd   : > { %v1975_v44 = vmax.f32 %v1955_v6, %v4685_v8  ;;  %v1974_v1 = vmax.f32 %v1954_v45, %v4684_v22  ;;  %v4695_v40 = vunpack.i.h.bf16 %v4693_v29  ;;  %v4694_v53 = vunpack.i.l.bf16 %v4693_v29 }
 0xaff   : > { %v1994_v63 = vmax.f32 %v1974_v1, %v4689_v56  ;;  %v1995_v42 = vmax.f32 %v1975_v44, %v4690_v4  ;;  %2349 = vmatpush1.bf16.msra.mxu1 %v2319_v21  ;;  %v6490_v21 = vadd.f32 %v6401_v46, %v5940_v48 }
 0xb00   : > { %4384 = vmatprep.subr.bf16.mxu1 %v5388_v5 }
 0xb01   : > { %v2014_v34 = vmax.f32 %v1994_v63, %v4694_v53  ;;  %v2015_v49 = vmax.f32 %v1995_v42, %v4695_v40 }
 0xb02   : > { %2363 = vmatmul.mubr.bf16.vlgmr.msra.gmra.mrb[48].mxu1 %v6368_v16  ;;  %v5031_v16 = vld [vmem:[#allocation7 + $0x10] sm:$0xff]  }
 0xb03   : > { %v2019_v19 = vpack.c.bf16 %v2015_v49, %v2014_v34  ;;  %4151 = vmatprep.mubr.msk.bf16.mxu1 %vm929_vm10, %v6371_v13  ;;  %4385 = vmatpush3.bf16.msra.mxu1 %v5029_v59 }
 0xb04   : > { %4386 = vmatprep.subr.bf16.mxu1 %v5388_v5 }
 0xb05   : > { %4359 = vmatmul.mubr.msk.bf16.vlgmr.msra.gmra.mrb[60].mxu0 %vm1111_vm12, %v2019_v19  ;;  %v6520_v19 = vadd.f32 %v6403_v61, %v5950_v55 }
 0xb06   : > { %4362 = vmatprep.mubr.msk.bf16.mxu0 %vm5389_vm0, %v5388_v5 }
 0xb07   : > { %4387 = vmatpush3.bf16.msra.mxu1 %v5030_v28 }
 0xb08   : > { %4388 = vmatprep.subr.bf16.mxu1 %v5388_v5 }
 0xb0a   : > { %2371 = vmatmul.mubr.bf16.gmra.mrb[52].mxu1 %v6376_v20 }
 0xb0b   : > { %4152 = vmatprep.mubr.msk.bf16.mxu1 %vm929_vm10, %v5901_v17  ;;  %4389 = vmatpush3.bf16.msra.mxu1 %v5031_v16 }
 0xb0c   : > { %4390 = vmatprep.subr.bf16.mxu1 %v5388_v5 }
 0xb0f   : > { %4391 = vmatpush3.bf16.msra.mxu1 %v5930_v39 }
 0xb10   : > { %3558 = vmatprep.subr.bf16.mxu1 %v5393_v15 }
 0xb12   : > { %2379 = vmatmul.mubr.bf16.gmra.mrb[56].mxu1 %v5906_v18 }
 0xb13   : > { %4392 = vmatprep.mubr.msk.bf16.mxu1 %vm5389_vm0, %v5388_v5 }
 0xbd5   : > { %v2364_v13 = vpop.f32.mrb[48].mxu1 }
 0xbd6   : > { %v2366_v52 = vpop.f32.mrb[49].mxu1  ;;  %v6483_v20 = vadd.f32 %v2364_v13, %v5924_v32  ;;  %v6496_v32 = vadd.f32 %v6399_v14, %v5938_v35 }
 0xbd7   : > { %v2367_v2 = vpop.f32.mrb[50].mxu1 }
 0xbd8   : > { %v6486_v17 = vadd.f32 %v2367_v2, %v5928_v36  ;;  %v2065_v0 = vpop.f32.mrb[60].mxu0  ;;  %v2369_v30 = vpop.f32.mrb[51].mxu1  ;;  %v4716_v45 = vpack.i.bf16 %v6490_v21, %v6496_v32 }
 0xbd9   : > { %v2087_v25 = vmin.f32 %v2065_v0, 20.0  ;;  %v4360_v39 = vpop.f32.mrb[61].mxu0  ;;  %vm2132_vm14 = vcmp.gt.f32.partialorder %v2065_v0, 20.0 }
 0xbda   : > { %v2068_v18 = vpop.f32.mrb[62].mxu0  ;;  %v4706_v37 = vpack.i.bf16 %v6486_v17, %v6483_v20 }
 0xbdb   : > { %v2092_v38 = vmul.f32 1.442695, %v2087_v25  ;;  %v2088_v50 = vmin.f32 %v2068_v18, 20.0  ;;  %v4361_v7 = vpop.f32.mrb[63].mxu0  ;;  %vm2133_vm4 = vcmp.gt.f32.partialorder %v2068_v18, 20.0 }
 0xbdc   : > { %4707 = vrot.lane.b32.xlu1 %v4706_v37, %s5391_s27  ;;  %4697 = vrot.lane.b32.xlu0 %v4706_v37, %s5390_s8 }
 0xbdd   : > { %4934 = vpow2.f32 %v2092_v38  ;;  %v2094_v36 = vmul.f32 1.442695, %v2088_v50  ;;  %v2372_v6 = vpop.f32.mrb[52].mxu1 }
 0xbde   : > { %v2374_v46 = vpop.f32.mrb[53].mxu1  ;;  %v6508_v29 = vadd.f32 %v2372_v6, %v5938_v35 }
 0xbdf   : > { %4936 = vpow2.f32 %v2094_v36  ;;  %v2375_v8 = vpop.f32.mrb[54].mxu1 }
 0xbe0   : > { %4717 = vrot.lane.b32.xlu1 %v4716_v45, %s5390_s8  ;;  %4702 = vrot.lane.b32.xlu0 %v4706_v37, %s5392_s25  ;;  %v2377_v22 = vpop.f32.mrb[55].mxu1  ;;  %v6505_v14 = vadd.f32 %v2375_v8, %v5940_v48 }
 0xbe2   : > { %v4736_v56 = vpack.i.bf16 %v6505_v14, %v6508_v29 }
 0xbe4   : > { %4727 = vrot.lane.b32.xlu1 %v4716_v45, %s5391_s27  ;;  %4712 = vrot.lane.b32.xlu0 %v4706_v37, %s5395_s17 }
 0xbe5   : > { %v2380_v4 = vpop.f32.mrb[56].mxu1 }
 0xbe6   : > { %v2382_v44 = vpop.f32.mrb[57].mxu1  ;;  %v6529_v28 = vadd.f32 %v2380_v4, %v5950_v55 }
 0xbe7   : > { %v4935_v1 = vpop.eup %4934  ;;  %v2383_v40 = vpop.f32.mrb[58].mxu1 }
 0xbe8   : > { %v2102_v53 = vadd.f32 2.0, %v4935_v1  ;;  %4737 = vrot.lane.b32.xlu1 %v4736_v56, %s5390_s8  ;;  %4722 = vrot.lane.b32.xlu0 %v4716_v45, %s5392_s25  ;;  %v2384_v48 = vpop.f32.mrb[59].mxu1 }
 0xbe9   : > { %v4937_v63 = vpop.eup %4936 }
 0xbea   : > { %v2107_v35 = vmul.f32 %v4935_v1, %v2102_v53  ;;  %v2103_v42 = vadd.f32 2.0, %v4937_v63 }
 0xbec   : > { %v2117_v34 = vadd.f32 2.0, %v2107_v35  ;;  %v2108_v49 = vmul.f32 %v4937_v63, %v2103_v42  ;;  %4747 = vrot.lane.b32.xlu1 %v4736_v56, %s5391_s27  ;;  %4732 = vrot.lane.b32.xlu0 %v4716_v45, %s5395_s17  ;;  %v2112_v16 = vmul.f32 %v2107_v35, %v2065_v0 }
 0xbee   : > { %4938 = vrcp.f32 %v2117_v34  ;;  %v2118_v59 = vadd.f32 2.0, %v2108_v49  ;;  %v2113_v52 = vmul.f32 %v2108_v49, %v2068_v18 }
 0xbf0   : > { %4940 = vrcp.f32 %v2118_v59  ;;  %1947 = vrot.lane.b32.xlu1 %v6520_v19, %s5390_s8  ;;  %4742 = vrot.lane.b32.xlu0 %v4736_v56, %s5392_s25 }
 0xbf4   : > { %1987 = vrot.lane.b32.xlu1 %v6520_v19, %s5391_s27  ;;  %4752 = vrot.lane.b32.xlu0 %v4736_v56, %s5395_s17 }
 0xbf8   : > { %v4939_v13 = vpop.eup %4938  ;;  %2399 = vrot.lane.b32.xlu1 %v6529_v28, %s5390_s8  ;;  %1967 = vrot.lane.b32.xlu0 %v6520_v19, %s5392_s25  ;;  %s6920_s8 = sld [smem:[#allocation27_spill]] }
 0xbf9   : > { %v2127_v61 = vmul.f32 %v4939_v13, %v2112_v16 }
 0xbfa   : > { %v4941_v2 = vpop.eup %4940 }
 0xbfb   : > { %v2137_v30 = vsel %vm2132_vm14, %v2065_v0, %v2127_v61  ;;  %v2128_v25 = vmul.f32 %v4941_v2, %v2113_v52 }
 0xbfc   : > { %v2598_v39 = vrot.slane %v2137_v30, 6  ;;  %2439 = vrot.lane.b32.xlu1 %v6529_v28, %s5391_s27  ;;  %2007 = vrot.lane.b32.xlu0 %v6520_v19, %s5395_s17  ;;  %v2620_v38 = vrot.slane %v2137_v30, 3 }
 0xbfd   : > { %v6539_v55 = vsel %vm2133_vm4, %v2068_v18, %v2128_v25 }
 0xbfe   : > { %v6544_v37 = vsel %vm646_vm1, %v2595_v51, %v2598_v39  ;;  %v2621_v50 = vrot.slane %v6539_v55, 3  ;;  %v6551_v0 = vsel %vm646_vm1, %v2786_v41, %v6539_v55 }
 0xc00   : > { %v2622_v7 = vsel %vm2603_vm6, %v2620_v38, %v2621_v50  ;;  %2419 = vrot.lane.b32.xlu0 %v6529_v28, %s5392_s25 }
 0xc01   : > { %v6558_v10 = vsel %vm646_vm1, %v6242_v9, %v2622_v7 }
 0xc04   : > { %2459 = vrot.lane.b32.xlu0 %v6529_v28, %s5395_s17 }
 0xc4e   : > { %v4708_v51 = vpop.permute.xlu1 %4707  ;;  %v4698_v18 = vpop.permute.xlu0 %4697 }
 0xc4f   : > { %v4700_v36 = vunpack.i.h.bf16 %v4698_v18  ;;  %v4699_v6 = vunpack.i.l.bf16 %v4698_v18  ;;  %v4710_v1 = vunpack.i.h.bf16 %v4708_v51  ;;  %v4709_v9 = vunpack.i.l.bf16 %v4708_v51 }
 0xc51   : > { %v2407_v41 = vmax.f32 %v6486_v17, %v4700_v36  ;;  %v2406_v8 = vmax.f32 %v6483_v20, %v4699_v6 }
 0xc52   : > { %v4718_v46 = vpop.permute.xlu1 %4717  ;;  %v4703_v45 = vpop.permute.xlu0 %4702 }
 0xc53   : > { %v4705_v22 = vunpack.i.h.bf16 %v4703_v45  ;;  %v4704_v4 = vunpack.i.l.bf16 %v4703_v45  ;;  %v4720_v48 = vunpack.i.h.bf16 %v4718_v46  ;;  %v4719_v63 = vunpack.i.l.bf16 %v4718_v46 }
 0xc55   : > { %v2426_v56 = vmax.f32 %v2406_v8, %v4704_v4  ;;  %v2427_v44 = vmax.f32 %v2407_v41, %v4705_v22  ;;  %v1957_v20 = vmax.f32 %v6490_v21, %v4720_v48  ;;  %v1956_v61 = vmax.f32 %v6496_v32, %v4719_v63 }
 0xc56   : > { %v4728_v40 = vpop.permute.xlu1 %4727  ;;  %v4713_v53 = vpop.permute.xlu0 %4712 }
 0xc57   : > { %v4715_v35 = vunpack.i.h.bf16 %v4713_v53  ;;  %v4714_v42 = vunpack.i.l.bf16 %v4713_v53  ;;  %v2446_v34 = vmax.f32 %v2426_v56, %v4709_v9  ;;  %v2447_v49 = vmax.f32 %v2427_v44, %v4710_v1 }
 0xc58   : > { %v4730_v38 = vunpack.i.h.bf16 %v4728_v40  ;;  %v4729_v50 = vunpack.i.l.bf16 %v4728_v40 }
 0xc59   : > { %v2466_v59 = vmax.f32 %v2446_v34, %v4714_v42  ;;  %v2467_v16 = vmax.f32 %v2447_v49, %v4715_v35 }
 0xc5a   : > { %v4738_v13 = vpop.permute.xlu1 %4737  ;;  %v4723_v17 = vpop.permute.xlu0 %4722 }
 0xc5b   : > { %v4725_v52 = vunpack.i.h.bf16 %v4723_v17  ;;  %v4724_v2 = vunpack.i.l.bf16 %v4723_v17  ;;  %v2471_v30 = vpack.c.bf16 %v2467_v16, %v2466_v59  ;;  %v4740_v18 = vunpack.i.h.bf16 %v4738_v13 }
 0xc5c   : > { %v4739_v36 = vunpack.i.l.bf16 %v4738_v13 }
 0xc5d   : > { %v1977_v25 = vmax.f32 %v1957_v20, %v4725_v52  ;;  %v1976_v39 = vmax.f32 %v1956_v61, %v4724_v2  ;;  %4393 = vmatmul.mubr.msk.bf16.vlgmr.msra.gmra.mrb[60].mxu1 %vm1111_vm12, %v2471_v30  ;;  %v2409_v4 = vmax.f32 %v6505_v14, %v4740_v18 }
 0xc5e   : > { %v4748_v7 = vpop.permute.xlu1 %4747  ;;  %v4733_v51 = vpop.permute.xlu0 %4732  ;;  %4396 = vmatprep.mubr.msk.bf16.mxu1 %vm5389_vm0, %v5388_v5  ;;  %v2408_v56 = vmax.f32 %v6508_v29, %v4739_v36 }
 0xc5f   : > { %v4735_v6 = vunpack.i.h.bf16 %v4733_v51  ;;  %v4734_v46 = vunpack.i.l.bf16 %v4733_v51  ;;  %v1996_v21 = vmax.f32 %v1976_v39, %v4729_v50  ;;  %v1997_v32 = vmax.f32 %v1977_v25, %v4730_v38 }
 0xc60   : > { %v4750_v40 = vunpack.i.h.bf16 %v4748_v7  ;;  %v4749_v53 = vunpack.i.l.bf16 %v4748_v7 }
 0xc61   : > { %v2016_v45 = vmax.f32 %v1996_v21, %v4734_v46  ;;  %v2017_v41 = vmax.f32 %v1997_v32, %v4735_v6  ;;  %v2653_v46 = vsel %vm2603_vm6, 4294967295, %v5394_v24  ;;  %v4775_v32 = vld [vmem:[#allocation9 + $0x10] ss:$8 sps:$4 sm:$0x3f]   ;;  %vm2646_vm6 = vcmask 89088  }
 0xc62   : > { %v1948_v8 = vpop.permute.xlu1 %1947  ;;  %v4743_v22 = vpop.permute.xlu0 %4742  ;;  %v6585_v21 = vsel %vm653_vm3, %v2653_v46, 0 }
 0xc63   : > { %v4745_v44 = vunpack.i.h.bf16 %v4743_v22  ;;  %v4744_v1 = vunpack.i.l.bf16 %v4743_v22  ;;  %v2020_v9 = vpack.c.bf16 %v2017_v41, %v2016_v45  ;;  %v1958_v29 = vmax.f32 %v6520_v19, %v1948_v8  ;;  %v4780_v8 = vld [vmem:[#allocation9 + $0x4] ss:$8 sps:$4 sm:$0x3f]  }
 0xc64   : > { %v2656_v41 = vand.u32 %v4775_v32, %v6585_v21  ;;  %v2730_v22 = vand.u32 %v4780_v8, %v6585_v21 }
 0xc65   : > { %v2429_v48 = vmax.f32 %v2409_v4, %v4745_v44  ;;  %v2428_v63 = vmax.f32 %v2408_v56, %v4744_v1  ;;  %4363 = vmatmul.mubr.msk.bf16.gmra.mrb[64].mxu0 %vm1111_vm12, %v2020_v9 }
 0xc66   : > { %v4753_v35 = vpop.permute.xlu0 %4752  ;;  %4366 = vmatprep.mubr.msk.bf16.mxu0 %vm5389_vm0, %v5388_v5  ;;  %v1988_v14 = vpop.permute.xlu1 %1987 }
 0xc67   : > { %v4755_v42 = vunpack.i.h.bf16 %v4753_v35  ;;  %v4754_v34 = vunpack.i.l.bf16 %v4753_v35  ;;  %v2448_v49 = vmax.f32 %v2428_v63, %v4749_v53  ;;  %v2449_v59 = vmax.f32 %v2429_v48, %v4750_v40 }
 0xc69   : > { %v2468_v16 = vmax.f32 %v2448_v49, %v4754_v34  ;;  %v2469_v13 = vmax.f32 %v2449_v59, %v4755_v42 }
 0xc6a   : > { %v1968_v17 = vpop.permute.xlu0 %1967  ;;  %v2400_v2 = vpop.permute.xlu1 %2399 }
 0xc6b   : > { %v2472_v20 = vpack.c.bf16 %v2469_v13, %v2468_v16  ;;  %v1978_v61 = vmax.f32 %v1958_v29, %v1968_v17  ;;  %v2410_v39 = vmax.f32 %v6529_v28, %v2400_v2  ;;  %v4777_v28 = vld [vmem:[#allocation9 + $0x14] ss:$8 sps:$4 sm:$0x3f]  }
 0xc6c   : > { %v2659_v45 = vand.u32 %v4777_v28, %v6585_v21 }
 0xc6d   : > { %4397 = vmatmul.mubr.msk.bf16.gmra.mrb[64].mxu1 %vm1111_vm12, %v2472_v20  ;;  %v1998_v52 = vmax.f32 %v1978_v61, %v1988_v14 }
 0xc6e   : > { %v2008_v30 = vpop.permute.xlu0 %2007  ;;  %4400 = vmatprep.mubr.msk.bf16.mxu1 %vm5389_vm0, %v5388_v5  ;;  %v2440_v19 = vpop.permute.xlu1 %2439  ;;  %2661 = vmatprep.subr.bf16.mxu0 %v2659_v45 }
 0xc6f   : > { %v2018_v25 = vmax.f32 %v1998_v52, %v2008_v30  ;;  %2662 = vmatpush1.bf16.msra.mxu0 %v2656_v41 }
 0xc70   : > { %2732 = vmatprep.subr.bf16.mxu0 %v2730_v22 }
 0xc71   : > { %v2021_v38 = vpack.c.bf16 %v2018_v25, %v2018_v25 }
 0xc72   : > { %v2420_v50 = vpop.permute.xlu0 %2419 }
 0xc73   : > { %v2430_v7 = vmax.f32 %v2410_v39, %v2420_v50  ;;  %4367 = vmatmul.mubr.msk.bf16.gmra.mrb[68].mxu0 %vm1111_vm12, %v2021_v38 }
 0xc74   : > { %2693 = vmatprep.mubr.bf16.mxu0 %v5393_v15 }
 0xc75   : > { %v2450_v51 = vmax.f32 %v2430_v7, %v2440_v19 }
 0xc76   : > { %v2460_v18 = vpop.permute.xlu0 %2459 }
 0xc77   : > { %v2470_v36 = vmax.f32 %v2450_v51, %v2460_v18 }
 0xc79   : > { %v2473_v6 = vpack.c.bf16 %v2470_v36, %v2470_v36 }
 0xc7b   : > { %4401 = vmatmul.mubr.msk.bf16.gmra.mrb[68].mxu1 %vm1111_vm12, %v2473_v6 }
 0xd30   : > { %v6590_v4 = vpop.f32.mrb[60].mxu1 }
 0xd31   : > { %v2539_v56 = vmin.f32 %v6590_v4, 20.0  ;;  %v4394_v24 = vpop.f32.mrb[61].mxu1  ;;  %vm2584_vm12 = vcmp.gt.f32.partialorder %v6590_v4, 20.0 }
 0xd32   : > { %v6593_v44 = vpop.f32.mrb[62].mxu1 }
 0xd33   : > { %v2544_v1 = vmul.f32 1.442695, %v2539_v56  ;;  %v2540_v9 = vmin.f32 %v6593_v44, 20.0  ;;  %v4395_v40 = vpop.f32.mrb[63].mxu1  ;;  %vm2585_vm7 = vcmp.gt.f32.partialorder %v6593_v44, 20.0 }
 0xd35   : > { %4942 = vpow2.f32 %v2544_v1  ;;  %v2546_v53 = vmul.f32 1.442695, %v2540_v9 }
 0xd37   : > { %4944 = vpow2.f32 %v2546_v53 }
 0xd38   : > { %v6596_v48 = vpop.f32.mrb[64].mxu0 }
 0xd39   : > { %v2089_v63 = vmin.f32 %v6596_v48, 20.0  ;;  %v4364_v35 = vpop.f32.mrb[65].mxu0  ;;  %vm2134_vm8 = vcmp.gt.f32.partialorder %v6596_v48, 20.0 }
 0xd3a   : > { %v6599_v42 = vpop.f32.mrb[66].mxu0 }
 0xd3b   : > { %v2096_v34 = vmul.f32 1.442695, %v2089_v63  ;;  %v2090_v49 = vmin.f32 %v6599_v42, 20.0  ;;  %v4365_v59 = vpop.f32.mrb[67].mxu0  ;;  %vm2135_vm9 = vcmp.gt.f32.partialorder %v6599_v42, 20.0 }
 0xd3d   : > { %4946 = vpow2.f32 %v2096_v34  ;;  %v2098_v14 = vmul.f32 1.442695, %v2090_v49 }
 0xd3f   : > { %v4943_v29 = vpop.eup %4942  ;;  %4948 = vpow2.f32 %v2098_v14  ;;  %v4778_v14 = vld [vmem:[#allocation9] ss:$8 sps:$4 sm:$0x3f]  }
 0xd40   : > { %v6602_v16 = vpop.f32.mrb[64].mxu1  ;;  %v2554_v13 = vadd.f32 2.0, %v4943_v29 }
 0xd41   : > { %v2541_v17 = vmin.f32 %v6602_v16, 20.0  ;;  %v4398_v20 = vpop.f32.mrb[65].mxu1  ;;  %v4945_v61 = vpop.eup %4944  ;;  %vm2586_vm13 = vcmp.gt.f32.partialorder %v6602_v16, 20.0 }
 0xd42   : > { %v6605_v52 = vpop.f32.mrb[66].mxu1  ;;  %v2559_v2 = vmul.f32 %v4943_v29, %v2554_v13  ;;  %v2555_v30 = vadd.f32 2.0, %v4945_v61 }
 0xd43   : > { %v2548_v25 = vmul.f32 1.442695, %v2541_v17  ;;  %v2542_v39 = vmin.f32 %v6605_v52, 20.0  ;;  %v4399_v38 = vpop.f32.mrb[67].mxu1 }
 0xd44   : > { %v2569_v50 = vadd.f32 2.0, %v2559_v2  ;;  %v2560_v7 = vmul.f32 %v4945_v61, %v2555_v30  ;;  %v2564_v34 = vmul.f32 %v2559_v2, %v6590_v4 }
 0xd45   : > { %4950 = vpow2.f32 %v2548_v25  ;;  %v2550_v19 = vmul.f32 1.442695, %v2542_v39  ;;  %v4783_v39 = vld [vmem:[#allocation9 + $0x24] ss:$8 sps:$4 sm:$0x3f]  }
 0xd46   : > { %v6608_v51 = vpop.f32.mrb[68].mxu0  ;;  %4952 = vrcp.f32 %v2569_v50  ;;  %v2570_v18 = vadd.f32 2.0, %v2560_v7  ;;  %v2565_v30 = vmul.f32 %v2560_v7, %v6593_v44 }
 0xd47   : > { %v2091_v36 = vmin.f32 %v6608_v51, 20.0  ;;  %v4368_v6 = vpop.f32.mrb[69].mxu0  ;;  %v4947_v46 = vpop.eup %4946  ;;  %4954 = vpow2.f32 %v2550_v19  ;;  %vm2136_vm14 = vcmp.gt.f32.partialorder %v6608_v51, 20.0 }
 0xd48   : > { %v2084_v28 = vpop.f32.mrb[70].mxu0  ;;  %4956 = vrcp.f32 %v2570_v18  ;;  %v2104_v32 = vadd.f32 2.0, %v4947_v46 }
 0xd49   : > { %v2100_v45 = vmul.f32 1.442695, %v2091_v36  ;;  %v4369_v41 = vpop.f32.mrb[71].mxu0  ;;  %v4949_v8 = vpop.eup %4948  ;;  %v2727_v36 = vand.u32 %v4778_v14, %v6585_v21 }
 0xd4a   : > { %v2109_v22 = vmul.f32 %v4947_v46, %v2104_v32  ;;  %v2105_v56 = vadd.f32 2.0, %v4949_v8  ;;  %v2816_v41 = vand.u32 %v4783_v39, %v6585_v21 }
 0xd4b   : > { %4958 = vpow2.f32 %v2100_v45 }
 0xd4c   : > { %v2119_v24 = vadd.f32 2.0, %v2109_v22  ;;  %v2110_v1 = vmul.f32 %v4949_v8, %v2105_v56 }
 0xd4e   : > { %v6611_v9 = vpop.f32.mrb[68].mxu1  ;;  %4960 = vrcp.f32 %v2119_v24  ;;  %v2120_v53 = vadd.f32 2.0, %v2110_v1  ;;  %v2115_v14 = vmul.f32 %v2110_v1, %v6599_v42 }
 0xd4f   : > { %v4951_v40 = vpop.eup %4950  ;;  %v2543_v63 = vmin.f32 %v6611_v9, 20.0  ;;  %v4402_v35 = vpop.f32.mrb[69].mxu1 }
 0xd50   : > { %v2556_v49 = vadd.f32 2.0, %v4951_v40  ;;  %v2536_v59 = vpop.f32.mrb[70].mxu1  ;;  %v4953_v29 = vpop.eup %4952  ;;  %4962 = vrcp.f32 %v2120_v53  ;;  %v2114_v53 = vmul.f32 %v2109_v22, %v6596_v48 }
 0xd51   : > { %v2552_v13 = vmul.f32 1.442695, %v2543_v63  ;;  %v4403_v17 = vpop.f32.mrb[71].mxu1  ;;  %v4955_v20 = vpop.eup %4954  ;;  %v2579_v61 = vmul.f32 %v4953_v29, %v2564_v34 }
 0xd52   : > { %v2561_v25 = vmul.f32 %v4951_v40, %v2556_v49  ;;  %v4957_v38 = vpop.eup %4956  ;;  %v2557_v50 = vadd.f32 2.0, %v4955_v20  ;;  %v2887_v17 = vrot.slane %v6539_v55, 5 }
 0xd53   : > { %4964 = vpow2.f32 %v2552_v13  ;;  %v2589_v2 = vsel %vm2584_vm12, %v6590_v4, %v2579_v61  ;;  %v2580_v19 = vmul.f32 %v4957_v38, %v2565_v30 }
 0xd54   : > { %v2571_v18 = vadd.f32 2.0, %v2561_v25  ;;  %v6619_v46 = vrot.slane %v2589_v2, 1  ;;  %v2625_v28 = vrot.slane %v2589_v2, 6  ;;  %v2562_v7 = vmul.f32 %v4955_v20, %v2557_v50 }
 0xd55   : > { %v4959_v6 = vpop.eup %4958  ;;  %v2590_v32 = vsel %vm2585_vm7, %v6593_v44, %v2580_v19  ;;  %v2566_v61 = vmul.f32 %v2561_v25, %v6602_v16 }
 0xd56   : > { %4966 = vrcp.f32 %v2571_v18  ;;  %v2106_v45 = vadd.f32 2.0, %v4959_v6  ;;  %v6627_v4 = vsel %vm2606_vm5, %v6544_v37, %v6619_v46  ;;  %v2632_v8 = vsel %vm2606_vm5, %v6558_v10, %v2625_v28 }
 0xd57   : > { %v2626_v56 = vrot.slane %v2590_v32, 6  ;;  %v6631_v24 = vrot.slane %v2590_v32, 3  ;;  %v2608_v40 = vpack.c.bf16 %v6627_v4, %v6252_v43  ;;  %v2633_v44 = vpack.c.bf16 %v2632_v8, %v6238_v23  ;;  %v4786_v8 = vld [vmem:[#allocation9 + $0x34] ss:$8 sps:$4 sm:$0x3f]  }
 0xd58   : > { %v2572_v63 = vadd.f32 2.0, %v2562_v7  ;;  %v4961_v35 = vpop.eup %4960  ;;  %v2111_v34 = vmul.f32 %v4959_v6, %v2106_v45  ;;  %v2567_v45 = vmul.f32 %v2562_v7, %v6605_v52 }
 0xd59   : > { %v6640_v37 = vsel %vm2606_vm5, %v6551_v0, %v6631_v24  ;;  %v2627_v10 = vsel %vm646_vm1, %v2625_v28, %v2626_v56  ;;  %v2129_v59 = vmul.f32 %v4961_v35, %v2114_v53  ;;  %4158 = vmatmul.mubr.msk.bf16.vlgmr.msra.gmra.mrb[72].mxu0 %vm2646_vm6, %v2633_v44 }
 0xd5a   : > { %v2793_v49 = vpack.c.bf16 %v6640_v37, %v6260_v60  ;;  %4968 = vrcp.f32 %v2572_v63  ;;  %v4963_v23 = vpop.eup %4962  ;;  %v2121_v22 = vadd.f32 2.0, %v2111_v34  ;;  %2703 = vmatprep.mubr.bf16.mxu0 %v5393_v15  ;;  %2733 = vmatpush1.bf16.msra.mxu0 %v2727_v36  ;;  %v2634_v18 = vpack.c.bf16 %v2627_v10, %v2627_v10  ;;  %v4795_v37 = vld [vmem:[#allocation9 + $0x64] ss:$8 sps:$4 sm:$0x3f]  }
 0xd5b   : > { %v2139_v0 = vsel %vm2134_vm8, %v6596_v48, %v2129_v59  ;;  %v2130_v29 = vmul.f32 %v4963_v23, %v2115_v14  ;;  %2818 = vmatprep.subr.bf16.mxu0 %v2816_v41  ;;  %v2813_v63 = vand.u32 %v4781_v54, %v6585_v21  ;;  %v2917_v14 = vand.u32 %v4786_v8, %v6585_v21  ;;  %v4796_v54 = vld [vmem:[#allocation9 + $0x70] ss:$8 sps:$4 sm:$0x3f]  }
 0xd5c   : > { %v2888_v20 = vrot.slane %v2139_v0, 5  ;;  %4970 = vrcp.f32 %v2121_v22  ;;  %v2988_v38 = vrot.slane %v2139_v0, 2  ;;  %vm3688_vm8 = vcmask 654336  }
 0xd5d   : > { %v4965_v13 = vpop.eup %4964  ;;  %v2140_v1 = vsel %vm2135_vm9, %v6599_v42, %v2130_v29 }
 0xd5e   : > { %v2558_v30 = vadd.f32 2.0, %v4965_v13  ;;  %v2889_v39 = vsel %vm2614_vm15, %v2887_v17, %v2888_v20  ;;  %v2989_v50 = vrot.slane %v2140_v1, 2  ;;  %v3088_v2 = vrot.slane %v2140_v1, 7 }
 0xd5f   : > { %v2892_v19 = vsel %vm646_vm1, %v2882_v12, %v2889_v39  ;;  %v3189_v22 = vrot.slane %v2140_v1, 4  ;;  %v6918_v20 = vrot.slane %v6305_v33, 6  ;;  %v6919_v1 = vrot.slane %v6305_v33, 1  ;;  %v4784_v33 = vld [vmem:[#allocation9 + $0x30] ss:$8 sps:$4 sm:$0x3f]  }
 0xd60   : > { %v4967_v48 = vpop.eup %4966  ;;  %v2563_v55 = vmul.f32 %v4965_v13, %v2558_v30  ;;  %v6659_v36 = vsel %vm2606_vm5, %v2892_v19, %v2590_v32  ;;  %v2990_v42 = vsel %vm653_vm3, %v2988_v38, %v2989_v50  ;;  %v3093_v25 = vsel %vm646_vm1, %v3086_v11, %v3088_v2 }
 0xd61   : > { %v2581_v6 = vmul.f32 %v4967_v48, %v2566_v61  ;;  %v2894_v28 = vpack.c.bf16 %v6659_v36, %v6290_v58  ;;  %v3000_v47 = vsel %vm646_vm1, %v6294_v57, %v2990_v42  ;;  %4159 = vmatmul.mubr.msk.bf16.gmra.mrb[76].mxu0 %vm2646_vm6, %v2634_v18  ;;  %vm2587_vm3 = vcmp.gt.f32.partialorder %v6605_v52, 20.0  ;;  %v4793_v36 = vld [vmem:[#allocation9 + $0x60] ss:$8 sps:$4 sm:$0x3f]  }
 0xd62   : > { %v2573_v12 = vadd.f32 2.0, %v2563_v55  ;;  %2764 = vmatprep.mubr.bf16.mxu0 %v5393_v15  ;;  %v2116_v57 = vmul.f32 %v2111_v34, %v6608_v51  ;;  %v2568_v4 = vmul.f32 %v2563_v55, %v6611_v9  ;;  %v2609_v38 = vpack.c.bf16 %v6619_v46, %v6619_v46  ;;  %v4789_v55 = vld [vmem:[#allocation9 + $0x44] ss:$8 sps:$4 sm:$0x3f]  }
 0xd63   : > { %v6672_v32 = vsel %vm2586_vm13, %v6602_v16, %v2581_v6  ;;  %v2914_v42 = vand.u32 %v4784_v33, %v6585_v21  ;;  %v3025_v46 = vand.u32 %v4789_v55, %v6585_v21  ;;  %vm3807_vm13 = vcmask 27648  }
 0xd64   : > { %v4969_v11 = vpop.eup %4968  ;;  %v2994_v41 = vrot.slane %v6672_v32, 5  ;;  %4972 = vrcp.f32 %v2573_v12  ;;  %v2895_v60 = vpack.c.bf16 %v6672_v32, %v6672_v32  ;;  %v3225_v12 = vand.u32 %v4795_v37, %v6585_v21 }
 0xd65   : > { %v2582_v56 = vmul.f32 %v4969_v11, %v2567_v45  ;;  %v3222_v32 = vand.u32 %v4793_v36, %v6585_v21  ;;  %v3315_v11 = vand.u32 %v4796_v54, %v6585_v21 }
 0xd66   : > { %v6678_v44 = vsel %vm2606_vm5, %v3000_v47, %v2994_v41  ;;  %v4971_v16 = vpop.eup %4970 }
 0xd67   : > { %v3002_v7 = vpack.c.bf16 %v6678_v44, %v6284_v31  ;;  %v2592_v53 = vsel %vm2587_vm3, %v6605_v52, %v2582_v56  ;;  %v2131_v59 = vmul.f32 %v4971_v16, %v2116_v57  ;;  %v4800_v56 = vld [vmem:[%s6920_s8 + $0x8] sm:$0xff]   ;;  %v4801_v44 = vld [vmem:[%s6920_s8 + $0x10] sm:$0xff]   ;;  %v4802_v57 = vld [vmem:[%s6920_s8 + $0x18] sm:$0xff]   ;;  %vm3836_vm3 = vcmask 162816  }
 0xd68   : > { %v2995_v35 = vrot.slane %v2592_v53, 5  ;;  %v6686_v10 = vrot.slane %v2592_v53, 2  ;;  %v3194_v17 = vrot.slane %v2592_v53, 7  ;;  %v4803_v16 = vld [vmem:[%s6920_s8 + $0x20] sm:$0xff]  }
 0xd69   : > { %v2141_v34 = vsel %vm2136_vm14, %v6608_v51, %v2131_v59  ;;  %4162 = vmatmul.mubr.msk.bf16.vlgmr.msra.gmra.mrb[72].mxu0 %vm2646_vm6, %v2608_v40  ;;  %v4805_v59 = vld [vmem:[%s6920_s8 + $0x30] sm:$0xff]  }
 0xd6a   : > { %v6692_v23 = vsel %vm2606_vm5, %v3093_v25, %v6686_v10  ;;  %v2996_v52 = vsel %vm2614_vm15, %v2994_v41, %v2995_v35  ;;  %v3190_v29 = vrot.slane %v2141_v34, 4  ;;  %v3288_v13 = vrot.slane %v2141_v34, 1  ;;  %2774 = vmatprep.mubr.bf16.mxu0 %v5393_v15  ;;  %2819 = vmatpush1.bf16.msra.mxu0 %v2813_v63  ;;  %v4792_v25 = vld [vmem:[#allocation9 + $0x54] ss:$8 sps:$4 sm:$0x3f]  }
 0xd6b   : > { %v3095_v0 = vpack.c.bf16 %v6692_v23, %v6299_v26  ;;  %2919 = vmatprep.subr.bf16.mxu0 %v2917_v14  ;;  %vm2588_vm15 = vcmp.gt.f32.partialorder %v6611_v9, 20.0  ;;  %v3118_v47 = vand.u32 %v4792_v25, %v6585_v21  ;;  %v3003_v58 = vpack.c.bf16 %v2996_v52, %v2996_v52  ;;  %v4804_v63 = vld [vmem:[%s6920_s8 + $0x28] sm:$0xff]   ;;  %v4806_v14 = vld [vmem:[%s6920_s8 + $0x38] sm:$0xff]   ;;  %v4807_v23 = vld [vmem:[%s6920_s8 + $0x40] sm:$0xff]  }
 0xd6c   : > { %v3191_v51 = vsel %vm650_vm2, %v3189_v22, %v3190_v29  ;;  %v3293_v43 = vsel %vm646_vm1, %v6918_v20, %v3288_v13  ;;  %v3096_v31 = vpack.c.bf16 %v6686_v10, %v6686_v10  ;;  %v4808_v52 = vld [vmem:[%s6920_s8 + $0x48] sm:$0xff]  }
 0xd6d   : > { %v3200_v26 = vsel %vm646_vm1, %v6919_v1, %v3191_v51 }
 0xd6e   : > { %v4973_v40 = vpop.eup %4972  ;;  %v3201_v61 = vsel %vm2606_vm5, %v3200_v26, %v3194_v17 }
 0xd6f   : > { %v2583_v30 = vmul.f32 %v4973_v40, %v2568_v4  ;;  %v3202_v39 = vpack.c.bf16 %v3201_v61, %v6319_v62 }
 0xd71   : > { %v2593_v50 = vsel %vm2588_vm15, %v6611_v9, %v2583_v30  ;;  %4163 = vmatmul.mubr.msk.bf16.gmra.mrb[80].mxu0 %vm2646_vm6, %v2609_v38  ;;  %v2794_v9 = vpack.c.bf16 %v6631_v24, %v6631_v24  ;;  %v4790_v24 = vld [vmem:[#allocation9 + $0x50] ss:$8 sps:$4 sm:$0x3f]  }
 0xd72   : > { %v3195_v2 = vrot.slane %v2593_v50, 7  ;;  %v3290_v48 = vrot.slane %v2593_v50, 4  ;;  %2850 = vmatprep.mubr.bf16.mxu0 %v5393_v15 }
 0xd74   : > { %v3294_v19 = vsel %vm2606_vm5, %v3293_v43, %v3290_v48  ;;  %v3196_v18 = vsel %vm1121_vm11, %v3194_v17, %v3195_v2  ;;  %v3296_v8 = vpack.c.bf16 %v3290_v48, %v3290_v48 }
 0xd75   : > { %v3295_v62 = vpack.c.bf16 %v3294_v19, %v6315_v27  ;;  %v4787_v27 = vld [vmem:[#allocation9 + $0x40] ss:$8 sps:$4 sm:$0x3f]   ;;  %v3203_v41 = vpack.c.bf16 %v3196_v18, %v3196_v18 }
 0xd76   : > { %v3022_v6 = vand.u32 %v4787_v27, %v6585_v21 }
 0xd79   : > { %4166 = vmatmul.mubr.msk.bf16.vlgmr.msra.gmra.mrb[72].mxu0 %vm2646_vm6, %v2793_v49  ;;  %v3115_v49 = vand.u32 %v4790_v24, %v6585_v21 }
 0xd7a   : > { %2860 = vmatprep.mubr.bf16.mxu0 %v5393_v15  ;;  %2920 = vmatpush1.bf16.msra.mxu0 %v2914_v42 }
 0xd7b   : > { %3027 = vmatprep.subr.bf16.mxu0 %v3025_v46 }
 0xd81   : > { %4167 = vmatmul.mubr.msk.bf16.gmra.mrb[84].mxu0 %vm2646_vm6, %v2794_v9 }
 0xd82   : > { %2951 = vmatprep.mubr.bf16.mxu0 %v5393_v15 }
 0xd89   : > { %4170 = vmatmul.mubr.msk.bf16.vlgmr.msra.gmra.mrb[72].mxu0 %vm2646_vm6, %v2894_v28  ;;  %v4798_v28 = vld [vmem:[#allocation9 + $0x74] ss:$8 sps:$4 sm:$0x3f]  }
 0xd8a   : > { %2961 = vmatprep.mubr.bf16.mxu0 %v5393_v15  ;;  %3028 = vmatpush1.bf16.msra.mxu0 %v3022_v6  ;;  %v3318_v45 = vand.u32 %v4798_v28, %v6585_v21  ;;  %v4799_v21 = vld [vmem:[%s6920_s8] sm:$0xff]  }
 0xd8b   : > { %3120 = vmatprep.subr.bf16.mxu0 %v3118_v47  ;;  %3559 = vmatpush1.bf16.msra.mxu1 %v4799_v21 }
 0xd8c   : > { %3560 = vmatprep.subr.bf16.mxu1 %v5393_v15 }
 0xd8f   : > { %3561 = vmatpush1.bf16.msra.mxu1 %v4800_v56 }
 0xd90   : > { %3562 = vmatprep.subr.bf16.mxu1 %v5393_v15 }
 0xd91   : > { %4171 = vmatmul.mubr.msk.bf16.gmra.mrb[88].mxu0 %vm2646_vm6, %v2895_v60  ;;  %v3381_v60 = vsub.s32 0, %v5767_v3 }
 0xd92   : > { %3059 = vmatprep.mubr.bf16.mxu0 %v5393_v15 }
 0xd93   : > { %3563 = vmatpush1.bf16.msra.mxu1 %v4801_v44 }
 0xd94   : > { %3564 = vmatprep.subr.bf16.mxu1 %v5393_v15 }
 0xd97   : > { %3565 = vmatpush1.bf16.msra.mxu1 %v4802_v57 }
 0xd98   : > { %3566 = vmatprep.subr.bf16.mxu1 %v5393_v15 }
 0xd99   : > { %4174 = vmatmul.mubr.msk.bf16.vlgmr.msra.gmra.mrb[72].mxu0 %vm2646_vm6, %v3002_v7 }
 0xd9a   : > { %3069 = vmatprep.mubr.bf16.mxu0 %v5393_v15  ;;  %3121 = vmatpush1.bf16.msra.mxu0 %v3115_v49  ;;  %v3377_v49 = vld [vmem:[#allocation10] sm:$0x3] }
 0xd9b   : > { %3227 = vmatprep.subr.bf16.mxu0 %v3225_v12  ;;  %3567 = vmatpush1.bf16.msra.mxu1 %v4803_v16  ;;  %v3385_v12 = vsub.s32 1, %v5767_v3  ;;  %v3382_v36 = vrot.slane %v3377_v49, %v3381_v60 }
 0xd9c   : > { %3568 = vmatprep.subr.bf16.mxu1 %v5393_v15 }
 0xd9d   : > { %v3386_v28 = vrot.slane %v3377_v49, %v3385_v12 }
 0xd9f   : > { %3569 = vmatpush1.bf16.msra.mxu1 %v4804_v63 }
 0xda0   : > { %3570 = vmatprep.subr.bf16.mxu1 %v5393_v15 }
 0xda1   : > { %4175 = vmatmul.mubr.msk.bf16.gmra.mrb[92].mxu0 %vm2646_vm6, %v3003_v58 }
 0xda2   : > { %3152 = vmatprep.mubr.bf16.mxu0 %v5393_v15 }
 0xda3   : > { %3571 = vmatpush1.bf16.msra.mxu1 %v4805_v59 }
 0xda4   : > { %3572 = vmatprep.subr.bf16.mxu1 %v5393_v15 }
 0xda7   : > { %3573 = vmatpush1.bf16.msra.mxu1 %v4806_v14 }
 0xda8   : > { %3574 = vmatprep.subr.bf16.mxu1 %v5393_v15 }
 0xda9   : > { %4178 = vmatmul.mubr.msk.bf16.vlgmr.msra.gmra.mrb[72].mxu0 %vm2646_vm6, %v3095_v0 }
 0xdaa   : > { %3162 = vmatprep.mubr.bf16.mxu0 %v5393_v15  ;;  %3228 = vmatpush1.bf16.msra.mxu0 %v3222_v32 }
 0xdab   : > { %3320 = vmatprep.subr.bf16.mxu0 %v3318_v45  ;;  %3575 = vmatpush1.bf16.msra.mxu1 %v4807_v23 }
 0xdac   : > { %3576 = vmatprep.subr.bf16.mxu1 %v5393_v15 }
 0xdaf   : > { %3577 = vmatpush1.bf16.msra.mxu1 %v4808_v52 }
 0xdb1   : > { %4179 = vmatmul.mubr.msk.bf16.gmra.mrb[96].mxu0 %vm2646_vm6, %v3096_v31 }
 0xdb2   : > { %3259 = vmatprep.mubr.bf16.mxu0 %v5393_v15 }
 0xdb9   : > { %4182 = vmatmul.mubr.msk.bf16.vlgmr.msra.gmra.mrb[72].mxu0 %vm2646_vm6, %v3202_v39 }
 0xdba   : > { %3269 = vmatprep.mubr.bf16.mxu0 %v5393_v15  ;;  %3321 = vmatpush1.bf16.msra.mxu0 %v3315_v11 }
 0xdc1   : > { %4183 = vmatmul.mubr.msk.bf16.gmra.mrb[100].mxu0 %vm2646_vm6, %v3203_v41 }
 0xdc2   : > { %3352 = vmatprep.mubr.bf16.mxu0 %v5393_v15 }
 0xdc9   : > { %4186 = vmatmul.mubr.msk.bf16.vlgmr.msra.gmra.mrb[72].mxu0 %vm2646_vm6, %v3295_v62 }
 0xdca   : > { %3362 = vmatprep.mubr.bf16.mxu0 %v5393_v15 }
 0xdd1   : > { %4187 = vmatmul.mubr.msk.bf16.gmra.mrb[104].mxu0 %vm2646_vm6, %v3296_v8 }
 0xe34   : > { %v2705_v7 = vpop.f32.mrb[76].mxu0 }
 0xe35   : > { %v2707_v53 = vpop.f32.mrb[77].mxu0 }
 0xe36   : > { %v2709_v35 = vpop.f32.mrb[78].mxu0 }
 0xe37   : > { %v2710_v10 = vpop.f32.mrb[79].mxu0 }
 0xe44   : > { %v2776_v34 = vpop.f32.mrb[80].mxu0 }
 0xe45   : > { %v2777_v22 = vadd.f32 %v2776_v34, %v2705_v7  ;;  %v2778_v0 = vpop.f32.mrb[81].mxu0 }
 0xe46   : > { %v2779_v29 = vadd.f32 %v2778_v0, %v2707_v53  ;;  %v2780_v13 = vpop.f32.mrb[82].mxu0 }
 0xe47   : > { %v2781_v17 = vpop.f32.mrb[83].mxu0 }
 0xe54   : > { %v2862_v51 = vpop.f32.mrb[84].mxu0 }
 0xe55   : > { %v2873_v20 = vadd.f32 %v2862_v51, %v2777_v22  ;;  %v2864_v43 = vpop.f32.mrb[85].mxu0 }
 0xe56   : > { %v2874_v4 = vadd.f32 %v2864_v43, %v2779_v29  ;;  %v2866_v40 = vpop.f32.mrb[86].mxu0 }
 0xe57   : > { %v2867_v1 = vpop.f32.mrb[87].mxu0 }
 0xe64   : > { %v2963_v26 = vpop.f32.mrb[88].mxu0 }
 0xe65   : > { %v2974_v61 = vadd.f32 %v2963_v26, %v2873_v20  ;;  %v2965_v30 = vpop.f32.mrb[89].mxu0 }
 0xe66   : > { %v2975_v15 = vadd.f32 %v2965_v30, %v2874_v4  ;;  %v2967_v39 = vpop.f32.mrb[90].mxu0 }
 0xe67   : > { %v2968_v38 = vpop.f32.mrb[91].mxu0 }
 0xe74   : > { %v3071_v50 = vpop.f32.mrb[92].mxu0 }
 0xe75   : > { %v3082_v2 = vadd.f32 %v3071_v50, %v2974_v61  ;;  %v3073_v48 = vpop.f32.mrb[93].mxu0 }
 0xe76   : > { %v3083_v33 = vadd.f32 %v3073_v48, %v2975_v15  ;;  %v3075_v19 = vpop.f32.mrb[94].mxu0 }
 0xe77   : > { %v3076_v55 = vpop.f32.mrb[95].mxu0 }
 0xe84   : > { %v3164_v18 = vpop.f32.mrb[96].mxu0 }
 0xe85   : > { %v3175_v62 = vadd.f32 %v3164_v18, %v3082_v2  ;;  %v3166_v42 = vpop.f32.mrb[97].mxu0 }
 0xe86   : > { %v3176_v46 = vadd.f32 %v3166_v42, %v3083_v33  ;;  %v3168_v9 = vpop.f32.mrb[98].mxu0 }
 0xe87   : > { %v3169_v27 = vpop.f32.mrb[99].mxu0 }
 0xe94   : > { %v3271_v25 = vpop.f32.mrb[100].mxu0 }
 0xe95   : > { %v3282_v6 = vadd.f32 %v3271_v25, %v3175_v62  ;;  %v3273_v47 = vpop.f32.mrb[101].mxu0 }
 0xe96   : > { %v3283_v24 = vadd.f32 %v3273_v47, %v3176_v46  ;;  %v3275_v37 = vpop.f32.mrb[102].mxu0 }
 0xe97   : > { %v3276_v58 = vpop.f32.mrb[103].mxu0 }
 0xe9c   : > { %v3354_v32 = vpop.f32.mrb[72].mxu0 }
 0xe9d   : > { %v6810_v45 = vadd.f32 %v3382_v36, %v3354_v32  ;;  %v3356_v31 = vpop.f32.mrb[73].mxu0 }
 0xe9e   : > { %v6812_v54 = vadd.f32 %v3386_v28, %v3356_v31  ;;  %v3358_v11 = vpop.f32.mrb[74].mxu0 }
 0xe9f   : > { %v3395_v41 = vmin.f32 %v6810_v45, 20.0  ;;  %v6815_v8 = vadd.f32 %v3382_v36, %v3358_v11  ;;  %v3360_v21 = vpop.f32.mrb[75].mxu0  ;;  %vm3449_vm1 = vcmp.gt.f32.partialorder %v6810_v45, 20.0 }
 0xea0   : > { %v3396_v56 = vmin.f32 %v6812_v54, 20.0  ;;  %v6818_v44 = vadd.f32 %v3386_v28, %v3360_v21  ;;  %vm3450_vm5 = vcmp.gt.f32.partialorder %v6812_v54, 20.0 }
 0xea1   : > { %v3401_v3 = vmul.f32 1.442695, %v3395_v41  ;;  %v3397_v57 = vmin.f32 %v6815_v8, 20.0  ;;  %vm3451_vm11 = vcmp.gt.f32.partialorder %v6815_v8, 20.0 }
 0xea2   : > { %v3403_v16 = vmul.f32 1.442695, %v3396_v56  ;;  %v3398_v7 = vmin.f32 %v6818_v44, 20.0  ;;  %vm3452_vm4 = vcmp.gt.f32.partialorder %v6818_v44, 20.0 }
 0xea3   : > { %4974 = vpow2.f32 %v3401_v3  ;;  %v3405_v53 = vmul.f32 1.442695, %v3397_v57 }
 0xea4   : > { %4976 = vpow2.f32 %v3403_v16  ;;  %v3407_v63 = vmul.f32 1.442695, %v3398_v7  ;;  %v3364_v35 = vpop.f32.mrb[104].mxu0 }
 0xea5   : > { %4978 = vpow2.f32 %v3405_v53  ;;  %v3375_v10 = vadd.f32 %v3364_v35, %v3282_v6  ;;  %v3366_v59 = vpop.f32.mrb[105].mxu0 }
 0xea6   : > { %4980 = vpow2.f32 %v3407_v63  ;;  %v3376_v14 = vadd.f32 %v3366_v59, %v3283_v24  ;;  %v3368_v23 = vpop.f32.mrb[106].mxu0  ;;  %v4810_v59 = vld [vmem:[#allocation13 + $0x8] sm:$0xff]  }
 0xea7   : > { %v6822_v34 = vadd.f32 %v3382_v36, %v3375_v10  ;;  %v3369_v52 = vpop.f32.mrb[107].mxu0  ;;  %v4809_v10 = vld [vmem:[#allocation13] sm:$0xff]   ;;  %v4812_v23 = vld [vmem:[#allocation13 + $0x18] sm:$0xff]  }
 0xea8   : > { %v6824_v22 = vadd.f32 %v3386_v28, %v3376_v14  ;;  %4404 = vmatprep.subr.bf16.mxu1 %v4809_v10  ;;  %v4811_v14 = vld [vmem:[#allocation13 + $0x10] sm:$0xff]   ;;  %v4188_v52 = vld [vmem:[#allocation12] ss:$0 sm:$0xff] }
 0xea9   : > { %v3399_v0 = vmin.f32 %v6822_v34, 20.0  ;;  %vm3453_vm12 = vcmp.gt.f32.partialorder %v6822_v34, 20.0 }
 0xeaa   : > { %v3400_v29 = vmin.f32 %v6824_v22, 20.0  ;;  %vm3454_vm6 = vcmp.gt.f32.partialorder %v6824_v22, 20.0 }
 0xeab   : > { %v3409_v13 = vmul.f32 1.442695, %v3399_v0 }
 0xeac   : > { %v3411_v17 = vmul.f32 1.442695, %v3400_v29 }
 0xead   : > { %v4975_v51 = vpop.eup %4974  ;;  %4982 = vpow2.f32 %v3409_v13 }
 0xeae   : > { %v4977_v20 = vpop.eup %4976  ;;  %v3413_v43 = vadd.f32 2.0, %v4975_v51  ;;  %4984 = vpow2.f32 %v3411_v17 }
 0xeaf   : > { %v4979_v4 = vpop.eup %4978  ;;  %v3414_v40 = vadd.f32 2.0, %v4977_v20 }
 0xeb0   : > { %v4981_v1 = vpop.eup %4980  ;;  %v3419_v26 = vmul.f32 %v4975_v51, %v3413_v43  ;;  %v3415_v61 = vadd.f32 2.0, %v4979_v4 }
 0xeb1   : > { %v3420_v30 = vmul.f32 %v4977_v20, %v3414_v40  ;;  %v3416_v15 = vadd.f32 2.0, %v4981_v1 }
 0xeb2   : > { %v3431_v39 = vadd.f32 2.0, %v3419_v26  ;;  %v3421_v38 = vmul.f32 %v4979_v4, %v3415_v61  ;;  %v3425_v27 = vmul.f32 %v3419_v26, %v6810_v45 }
 0xeb3   : > { %v3432_v50 = vadd.f32 2.0, %v3420_v30  ;;  %v3422_v2 = vmul.f32 %v4981_v1, %v3416_v15  ;;  %v3426_v47 = vmul.f32 %v3420_v30, %v6812_v54 }
 0xeb4   : > { %4986 = vrcp.f32 %v3431_v39  ;;  %v3433_v48 = vadd.f32 2.0, %v3421_v38  ;;  %v3427_v37 = vmul.f32 %v3421_v38, %v6815_v8 }
 0xeb5   : > { %4988 = vrcp.f32 %v3432_v50  ;;  %v3434_v33 = vadd.f32 2.0, %v3422_v2  ;;  %v3428_v58 = vmul.f32 %v3422_v2, %v6818_v44 }
 0xeb6   : > { %4990 = vrcp.f32 %v3433_v48 }
 0xeb7   : > { %v4983_v19 = vpop.eup %4982  ;;  %4992 = vrcp.f32 %v3434_v33 }
 0xeb8   : > { %v4985_v55 = vpop.eup %4984  ;;  %v3417_v18 = vadd.f32 2.0, %v4983_v19 }
 0xeb9   : > { %v3418_v62 = vadd.f32 2.0, %v4985_v55 }
 0xeba   : > { %v3423_v42 = vmul.f32 %v4983_v19, %v3417_v18 }
 0xebb   : > { %v3424_v46 = vmul.f32 %v4985_v55, %v3418_v62 }
 0xebc   : > { %v3435_v9 = vadd.f32 2.0, %v3423_v42  ;;  %v3429_v57 = vmul.f32 %v3423_v42, %v6822_v34 }
 0xebd   : > { %v3436_v25 = vadd.f32 2.0, %v3424_v46  ;;  %v3430_v7 = vmul.f32 %v3424_v46, %v6824_v22 }
 0xebe   : > { %v4987_v6 = vpop.eup %4986  ;;  %4994 = vrcp.f32 %v3435_v9 }
 0xebf   : > { %v4989_v60 = vpop.eup %4988  ;;  %v3443_v24 = vmul.f32 %v4987_v6, %v3425_v27  ;;  %4996 = vrcp.f32 %v3436_v25 }
 0xec0   : > { %v4991_v49 = vpop.eup %4990  ;;  %v3444_v12 = vmul.f32 %v4989_v60, %v3426_v47 }
 0xec1   : > { %v4993_v36 = vpop.eup %4992  ;;  %v3445_v28 = vmul.f32 %v4991_v49, %v3427_v37  ;;  %v3455_v31 = vsel %vm3449_vm1, %v6810_v45, %v3443_v24 }
 0xec2   : > { %v3446_v32 = vmul.f32 %v4993_v36, %v3428_v58  ;;  %v3456_v21 = vsel %vm3450_vm5, %v6812_v54, %v3444_v12 }
 0xec3   : > { %v3457_v11 = vsel %vm3451_vm11, %v6815_v8, %v3445_v28 }
 0xec4   : > { %v3461_v41 = vpack.c.bf16 %v3457_v11, %v3455_v31  ;;  %v3458_v56 = vsel %vm3452_vm4, %v6818_v44, %v3446_v32 }
 0xec5   : > { %v3462_v3 = vpack.c.bf16 %v3458_v56, %v3456_v21  ;;  %v3745_v56 = vld [vmem:[#allocation16 + $0x10] sm:$0xf] }
 0xec7   : > { %4199 = vmatprep.mubr.msk.bf16.mxu1 %vm929_vm10, %v3462_v3 }
 0xec8   : > { %v4995_v16 = vpop.eup %4994  ;;  %3591 = vmatmul.mubr.bf16.vlgmr.msra.gmra.mrb[72].mxu1 %v3461_v41  ;;  %v4201_v41 = vld [vmem:[#allocation15] ss:$0 sm:$0xff] }
 0xec9   : > { %v4997_v45 = vpop.eup %4996  ;;  %v3447_v53 = vmul.f32 %v4995_v16, %v3429_v57  ;;  %4405 = vmatpush3.bf16.msra.mxu1 %v4809_v10  ;;  %v3743_v16 = vld [vmem:[#allocation16] sm:$0xff] }
 0xeca   : > { %v3448_v63 = vmul.f32 %v4997_v45, %v3430_v7  ;;  %4406 = vmatprep.subr.bf16.mxu1 %v4810_v59 }
 0xecb   : > { %v3459_v54 = vsel %vm3453_vm12, %v6822_v34, %v3447_v53  ;;  %v4813_v34 = vld [vmem:[#allocation13 + $0x20] sm:$0xff]  }
 0xecc   : > { %v3460_v8 = vsel %vm3454_vm6, %v6824_v22, %v3448_v63  ;;  %v3463_v35 = vpack.c.bf16 %v3459_v54, %v3459_v54 }
 0xecd   : > { %v3464_v44 = vpack.c.bf16 %v3460_v8, %v3460_v8  ;;  %4407 = vmatpush3.bf16.msra.mxu1 %v4810_v59 }
 0xece   : > { %4408 = vmatprep.subr.bf16.mxu1 %v4811_v14 }
 0xecf   : > { %4200 = vmatprep.mubr.msk.bf16.mxu1 %vm929_vm10, %v3464_v44  ;;  %v3744_v44 = vld [vmem:[#allocation16 + $0x8] sm:$0xff] }
 0xed0   : > { %3599 = vmatmul.mubr.bf16.gmra.mrb[76].mxu1 %v3463_v35 }
 0xed1   : > { %4409 = vmatpush3.bf16.msra.mxu1 %v4811_v14 }
 0xed2   : > { %4410 = vmatprep.subr.bf16.mxu1 %v4812_v23 }
 0xed5   : > { %4411 = vmatpush3.bf16.msra.mxu1 %v4812_v23 }
 0xed6   : > { %4412 = vmatprep.subr.bf16.mxu1 %v4813_v34 }
 0xed9   : > { %4413 = vmatpush3.bf16.msra.mxu1 %v4813_v34 }
 0xf9b   : > { %v3592_v22 = vpop.f32.mrb[72].mxu1 }
 0xf9c   : > { %v3593_v0 = vadd.f32 %v4188_v52, %v3592_v22  ;;  %v3594_v29 = vpop.f32.mrb[73].mxu1 }
 0xf9d   : > { %v3595_v13 = vpop.f32.mrb[74].mxu1 }
 0xf9e   : > { %v3606_v17 = vmin.f32 %v3593_v0, 20.0  ;;  %v3596_v51 = vadd.f32 %v4188_v52, %v3595_v13  ;;  %v3597_v20 = vpop.f32.mrb[75].mxu1  ;;  %vm3633_vm10 = vcmp.gt.f32.partialorder %v3593_v0, 20.0 }
 0xfa0   : > { %v3609_v43 = vmul.f32 1.442695, %v3606_v17  ;;  %v3607_v4 = vmin.f32 %v3596_v51, 20.0  ;;  %vm3634_vm7 = vcmp.gt.f32.partialorder %v3596_v51, 20.0 }
 0xfa2   : > { %4998 = vpow2.f32 %v3609_v43  ;;  %v3611_v40 = vmul.f32 1.442695, %v3607_v4 }
 0xfa3   : > { %v3600_v1 = vpop.f32.mrb[76].mxu1 }
 0xfa4   : > { %5000 = vpow2.f32 %v3611_v40  ;;  %v3601_v26 = vadd.f32 %v4188_v52, %v3600_v1  ;;  %v3602_v61 = vpop.f32.mrb[77].mxu1 }
 0xfa5   : > { %v3603_v30 = vpop.f32.mrb[78].mxu1 }
 0xfa6   : > { %v3608_v15 = vmin.f32 %v3601_v26, 20.0  ;;  %v3604_v39 = vpop.f32.mrb[79].mxu1  ;;  %vm3635_vm9 = vcmp.gt.f32.partialorder %v3601_v26, 20.0 }
 0xfa8   : > { %v3613_v38 = vmul.f32 1.442695, %v3608_v15 }
 0xfaa   : > { %5002 = vpow2.f32 %v3613_v38 }
 0xfac   : > { %v4999_v50 = vpop.eup %4998 }
 0xfad   : > { %v3615_v2 = vadd.f32 2.0, %v4999_v50 }
 0xfae   : > { %v5001_v48 = vpop.eup %5000 }
 0xfaf   : > { %v3618_v33 = vmul.f32 %v4999_v50, %v3615_v2  ;;  %v3616_v19 = vadd.f32 2.0, %v5001_v48 }
 0xfb1   : > { %v3624_v55 = vadd.f32 2.0, %v3618_v33  ;;  %v3619_v18 = vmul.f32 %v5001_v48, %v3616_v19  ;;  %v3621_v25 = vmul.f32 %v3618_v33, %v3593_v0 }
 0xfb3   : > { %5004 = vrcp.f32 %v3624_v55  ;;  %v3625_v62 = vadd.f32 2.0, %v3619_v18  ;;  %v3622_v60 = vmul.f32 %v3619_v18, %v3596_v51 }
 0xfb4   : > { %v5003_v42 = vpop.eup %5002 }
 0xfb5   : > { %5006 = vrcp.f32 %v3625_v62  ;;  %v3617_v46 = vadd.f32 2.0, %v5003_v42 }
 0xfb7   : > { %v3620_v9 = vmul.f32 %v5003_v42, %v3617_v46 }
 0xfb9   : > { %v3626_v27 = vadd.f32 2.0, %v3620_v9  ;;  %v3623_v36 = vmul.f32 %v3620_v9, %v3601_v26 }
 0xfbb   : > { %5008 = vrcp.f32 %v3626_v27 }
 0xfbd   : > { %v5005_v6 = vpop.eup %5004 }
 0xfbe   : > { %v3630_v47 = vmul.f32 %v5005_v6, %v3621_v25 }
 0xfbf   : > { %v5007_v24 = vpop.eup %5006 }
 0xfc0   : > { %v3631_v37 = vmul.f32 %v5007_v24, %v3622_v60  ;;  %v3636_v49 = vsel %vm3633_vm10, %v3593_v0, %v3630_v47 }
 0xfc2   : > { %v3637_v12 = vsel %vm3634_vm7, %v3596_v51, %v3631_v37 }
 0xfc3   : > { %v3639_v58 = vpack.c.bf16 %v3637_v12, %v3636_v49  ;;  %v5399_v12 = vmov 0.0|0.0  }
 0xfc4   : > { %4427 = vmatprep.subr.bf16.mxu1 %v5399_v12 }
 0xfc5   : > { %v5009_v28 = vpop.eup %5008  ;;  %4414 = vmatprep.mubr.msk.bf16.mxu1 %vm3688_vm8, %v3639_v58 }
 0xfc6   : > { %v3632_v32 = vmul.f32 %v5009_v28, %v3623_v36 }
 0xfc8   : > { %v3638_v31 = vsel %vm3635_vm9, %v3601_v26, %v3632_v32 }
 0xfc9   : > { %v3640_v11 = vpack.c.bf16 %v3638_v31, %v3638_v31 }
 0xfcb   : > { %4415 = vmatmul.mubr.msk.bf16.vlgmr.msra.gmra.mrb[80].mxu1 %vm3688_vm8, %v3640_v11 }
 0xfcc   : > { %4424 = vmatprep.mubr.msk.f32.mxu1 %vm5389_vm0, %v5388_v5  ;;  %vm3800_vm0 = vcmask 31744  }
0x109e   : > { %v4416_v21 = vpop.f32.mrb[80].mxu1 }
0x109f   : > { %v3738_v3 = vadd.f32 %v4416_v21, %v4201_v41  ;;  %v3729_v57 = vpop.f32.mrb[81].mxu1 }
0x10a0   : > { %v3730_v7 = vadd.f32 %v4201_v41, %v3729_v57  ;;  %v4417_v45 = vpop.f32.mrb[82].mxu1  ;;  %v3835_v57 = vld [vmem:[#allocation18] sm:$0xf] }
0x10a1   : > { %v3748_v53 = vmul.f32 %v3745_v56, %v3738_v3  ;;  %v3732_v63 = vpop.f32.mrb[83].mxu1 }
0x10a2   : > { %v3746_v54 = vmul.f32 %v3743_v16, %v3730_v7  ;;  %v3733_v8 = vadd.f32 %v4201_v41, %v3732_v63 }
0x10a3   : > { %3756 = vrot.lane.b32.xlu1 %v3748_v53, %s5395_s17 }
0x10a4   : > { %3788 = vrot.lane.b32.xlu0 %v3746_v54, %s5396_s24  ;;  %v3747_v35 = vmul.f32 %v3744_v44, %v3733_v8 }
0x10a7   : > { %3752 = vrot.lane.b32.xlu1 %v3746_v54, %s5395_s17 }
0x10a8   : > { %3754 = vrot.lane.b32.xlu0 %v3747_v35, %s5395_s17  ;;  %s4103_s17 = sshll.u32 %s6926_s30, 2 }
0x10a9   : > { %s619_s26 = scalar_lea.vmem %s6921_s21, %s4103_s17 }
0x10ab   : > { %3764 = vrot.lane.b32.xlu1 %v3746_v54, %s5397_s29 }
0x10ac   : > { %3766 = vrot.lane.b32.xlu0 %v3747_v35, %s5397_s29 }
0x10af   : > { %3776 = vrot.lane.b32.xlu1 %v3746_v54, %s5398_s3 }
0x10b0   : > { %3778 = vrot.lane.b32.xlu0 %v3747_v35, %s5398_s3 }
0x10b3   : > { %3790 = vrot.lane.b32.xlu1 %v3747_v35, %s5396_s24 }
0x10b4   : > { %3768 = vrot.lane.b32.xlu0 %v3748_v53, %s5397_s29 }
0x10b7   : > { %3780 = vrot.lane.b32.xlu1 %v3748_v53, %s5398_s3 }
0x10b8   : > { %3792 = vrot.lane.b32.xlu0 %v3748_v53, %s5396_s24 }
0x1115   : > { %v3757_v10 = vpop.permute.xlu1 %3756 }
0x1116   : > { %v3789_v59 = vpop.permute.xlu0 %3788  ;;  %v3763_v40 = vadd.f32 %v3757_v10, %v3748_v53 }
0x1119   : > { %v3753_v14 = vpop.permute.xlu1 %3752 }
0x111a   : > { %v3755_v23 = vpop.permute.xlu0 %3754  ;;  %v3761_v52 = vadd.f32 %v3753_v14, %v3746_v54 }
0x111b   : > { %v3762_v0 = vadd.f32 %v3755_v23, %v3747_v35 }
0x111d   : > { %v3765_v34 = vpop.permute.xlu1 %3764 }
0x111e   : > { %v3767_v22 = vpop.permute.xlu0 %3766  ;;  %v3773_v29 = vadd.f32 %v3765_v34, %v3761_v52 }
0x111f   : > { %v3774_v13 = vadd.f32 %v3767_v22, %v3762_v0 }
0x1121   : > { %v3777_v17 = vpop.permute.xlu1 %3776 }
0x1122   : > { %v3785_v51 = vadd.f32 %v3777_v17, %v3773_v29  ;;  %v3779_v20 = vpop.permute.xlu0 %3778 }
0x1123   : > { %v3786_v43 = vadd.f32 %v3779_v20, %v3774_v13 }
0x1124   : > { %v3797_v4 = vadd.f32 %v3789_v59, %v3785_v51 }
0x1125   : > { %v3791_v1 = vpop.permute.xlu1 %3790 }
0x1126   : > { %v3798_v26 = vadd.f32 %v3791_v1, %v3786_v43  ;;  %v3769_v61 = vpop.permute.xlu0 %3768  ;;  %v3801_v30 = vsel %vm3800_vm0, %v3797_v4, -inf }
0x1127   : > { %v3775_v15 = vadd.f32 %v3769_v61, %v3763_v40  ;;  %3802 = vmax.xlane.f32.xlu1 %v3801_v30 }
0x1128   : > { %v3804_v39 = vsel %vm3800_vm0, %v3798_v26, -inf }
0x1129   : > { %3805 = vmax.xlane.f32.xlu0 %v3804_v39  ;;  %v3781_v38 = vpop.permute.xlu1 %3780 }
0x112a   : > { %v3787_v50 = vadd.f32 %v3781_v38, %v3775_v15  ;;  %v3793_v2 = vpop.permute.xlu0 %3792 }
0x112c   : > { %v3799_v48 = vadd.f32 %v3793_v2, %v3787_v50 }
0x112e   : > { %v3808_v33 = vsel %vm3807_vm13, %v3799_v48, -inf }
0x112f   : > { %3809 = vmax.xlane.f32.xlu0 %v3808_v33 }
0x11b4   : > { %v3803_v19 = vpop.xlane.xlu1 %3802 }
0x11b5   : > { %v3811_v55 = vsub.f32 %v3797_v4, %v3803_v19 }
0x11b6   : > { %v3806_v18 = vpop.xlane.xlu0 %3805 }
0x11b7   : > { %v3814_v62 = vmul.f32 1.442695, %v3811_v55  ;;  %v3812_v42 = vsub.f32 %v3798_v26, %v3806_v18 }
0x11b9   : > { %5010 = vpow2.f32 %v3814_v62  ;;  %v3816_v46 = vmul.f32 1.442695, %v3812_v42 }
0x11bb   : > { %5012 = vpow2.f32 %v3816_v46 }
0x11bc   : > { %v3810_v9 = vpop.xlane.xlu0 %3809 }
0x11bd   : > { %v3813_v27 = vsub.f32 %v3799_v48, %v3810_v9 }
0x11bf   : > { %v3818_v25 = vmul.f32 1.442695, %v3813_v27 }
0x11c1   : > { %5014 = vpow2.f32 %v3818_v25 }
0x11c3   : > { %v5011_v6 = vpop.eup %5010 }
0x11c4   : > { %v3820_v47 = vsel %vm3800_vm0, %v5011_v6, 0.0 }
0x11c5   : > { %v5013_v60 = vpop.eup %5012  ;;  %3821 = vadd.xlane.f32.xlu1 %v3820_v47 }
0x11c6   : > { %v3823_v24 = vsel %vm3800_vm0, %v5013_v60, 0.0 }
0x11c7   : > { %3824 = vadd.xlane.f32.xlu0 %v3823_v24 }
0x11cb   : > { %v5015_v37 = vpop.eup %5014 }
0x11cc   : > { %v3826_v49 = vsel %vm3807_vm13, %v5015_v37, 0.0 }
0x11cd   : > { %3827 = vadd.xlane.f32.xlu1 %v3826_v49 }
0x1252   : > { %v3822_v58 = vpop.xlane.xlu1 %3821 }
0x1253   : > { %5016 = vrcp.f32 %v3822_v58 }
0x1254   : > { %v3825_v36 = vpop.xlane.xlu0 %3824 }
0x1255   : > { %5018 = vrcp.f32 %v3825_v36 }
0x125a   : > { %v3828_v28 = vpop.xlane.xlu1 %3827 }
0x125b   : > { %5020 = vrcp.f32 %v3828_v28 }
0x125d   : > { %v5017_v32 = vpop.eup %5016 }
0x125e   : > { %v3830_v11 = vmul.f32 %v5017_v32, %v5011_v6 }
0x125f   : > { %v5019_v31 = vpop.eup %5018 }
0x1260   : > { %v3832_v41 = vmul.f32 %v5019_v31, %v5013_v60 }
0x1262   : > { %v4428_v21 = vpack.c.bf16 %v3832_v41, %v3830_v11 }
0x1264   : > { %4429 = vmatpush3.bf16.msra.mxu1 %v4428_v21 }
0x1265   : > { %v5021_v56 = vpop.eup %5020  ;;  %4422 = vmatprep.subr.mxu1 %v5388_v5 }
0x1266   : > { %v3834_v3 = vmul.f32 %v5021_v56, %v5015_v37 }
0x1268   : > { %4423 = vmatpush3.msk.msra.mxu1 %vm650_vm2, %v3834_v3 }
0x1269   : > { %4425 = vmatmul.mubr.msk.f32.vlgmr.msra.gmra.mrb[84].mxu1 %vm3836_vm3, %v3835_v57 }
0x133c   : > { %v3909_v16 = vpop.f32.mrb[84].mxu1 }
0x133d   : > { %3913 = vst.msk [vmem:[%s619_s26] sm:$0xf] %vm3807_vm13, %v3909_v16  ;;  %v4426_v7 = vpop.f32.mrb[85].mxu1 }
0x133e PF: > { %s6922_s22 = sld [smem:[#allocation25_spill]] }
0x1344   : > { %s30_s29 = sadd.s32 1, %s6922_s22  }
0x1345   : > { %p27_p12 = scmp.ge.s32.totalorder %s30_s29, 4  }
0x1347   :  { %29 = sbr.rel (!%p27_p12) target bundleno = 10 (0xa), region = 161 }
0x134e   :  { %3933 = vsyncpa [#allocation3], 1 }
0x134f   :  { %3935 = vsyncpa [#allocation3 + $0x1], 1 }
0x1350   :  { %3936 = vsyncpa [#allocation5], 1 }
0x1351   :  { %3937 = vsyncpa [#allocation8], 1 }
0x1352   :  { %3938 = vsyncpa [#allocation11], 1 }
0x1353   :  { %3939 = vsyncpa [#allocation14], 1 }
0x1354   :  { %3940 = vsyncpa [#allocation17], 1 }

</bundles_post_ra>
